<compile_context>
chip_gen: v7x
topology: tpu7x:2x2x1
jax: 0.10.0
libtpu: 0.0.40
codegen_flags: <defaults>
</compile_context>

<pallas_src>
import functools

import jax
import jax.numpy as jnp
from jax.experimental import pallas as pl
from jax.experimental.pallas import tpu as pltpu


def _gelu_poly_dtype():
    """bf16 polynomial GELU on v6e/v7x (packed bf16 VALU); f32 on v5e/older."""
    try:
        kind = jax.devices()[0].device_kind.lower()
    except Exception:  # no device yet / CPU fallback
        return jnp.float32
    if ("v2" in kind) or ("v3" in kind) or ("v4" in kind) or ("v5" in kind):
        return jnp.float32
    return jnp.bfloat16


_GELU_POLY_DTYPE = _gelu_poly_dtype()


def _gelu(x, poly_dtype=_GELU_POLY_DTYPE):
    # tanh-approximate GELU. Polynomial on the VALU (bf16 where supported),
    # tanh on the EUP (its own bundle slot), bias/blend stay f32.
    # TODO(synk): fairseq/wav2vec2 use exact erf GELU; tanh approx differs ~1e-3.
    c = 0.7978845608028654  # sqrt(2/pi)
    xp = x.astype(poly_dtype)
    inner = (c * xp) * (1.0 + 0.044715 * xp * xp)     # VALU (packed bf16 on v6e/v7x)
    t = jnp.tanh(inner.astype(jnp.float32))           # EUP
    return 0.5 * x * (1.0 + t)                        # f32 blend on the accumulator


def ssl_backbone_kernel(x_ref, w0_ref, b0_ref, w1_ref, b1_ref, w2_ref, b2_ref,
                        out_ref):
    """x_ref: (tm, F) f32 frame tile; weights bf16 (resident); out_ref: (tm, D) bf16."""
    # fused framing cast: f32 waveform frames -> bf16 for the MXU (free VPU work)
    x = x_ref[...].astype(jnp.bfloat16)
    # layer 0: frame projection F -> D (bf16 MXU, f32 accumulate)
    h0 = jnp.dot(x, w0_ref[...], preferred_element_type=jnp.float32) + b0_ref[...]
    h0 = _gelu(h0).astype(jnp.bfloat16)
    # layer 1: encoder D -> D
    h1 = jnp.dot(h0, w1_ref[...], preferred_element_type=jnp.float32) + b1_ref[...]
    h1 = _gelu(h1).astype(jnp.bfloat16)
    # layer 2 (last): encoder D -> D  == ssl_features[-1]
    out_ref[...] = (
        jnp.dot(h1, w2_ref[...], preferred_element_type=jnp.float32)
        + b2_ref[...]).astype(out_ref.dtype)


@functools.partial(jax.jit, static_argnames=("frame", "tm"))
def ssl_model_forward(wav, wav_length, params, *, frame=128, tm=512):
    """Pallas implementation of SSL_Model.forward.

    wav:        [B, 1, T] float32  (torch NCW layout)
    wav_length: [B] int32
    params:     (w0, b0, w1, b1, w2, b2); weights pre-cast to bf16, biases f32.
    Returns ssl_features[-1] of shape [B, L, D] with L = T // frame (bfloat16).
    """
    w0, b0, w1, b1, w2, b2 = params
    B, _, T = wav.shape
    F = frame
    L = T // F
    D = w0.shape[1]

    # glue: squeeze(1) + strided framing (conv encoder with kernel == stride).
    # Pure reshape — no cast, no extra HBM pass (cast is fused into the kernel).
    x = wav.reshape(B, T)[:, : L * F].reshape(B * L, F)

    M = B * L
    tm = min(tm, M)
    # TODO(synk): arbitrary waveform lengths need a pl.cdiv grid + masked tail.
    assert M % tm == 0, "row count must tile evenly for this demo"
    grid = (M // tm,)

    cost = pl.CostEstimate(
        flops=2 * M * (F * D + 2 * D * D),
        transcendentals=2 * M * D,                      # two GELU tanh layers
        bytes_accessed=(M * F * 4                       # x (f32, cast in-kernel)
                        + (F * D + 2 * D * D) * 2       # weights (bf16)
                        + 3 * D * 4                     # biases (f32)
                        + M * D * 2),                   # output (bf16)
    )

    out_flat = pl.pallas_call(
        ssl_backbone_kernel,
        out_shape=jax.ShapeDtypeStruct((M, D), jnp.bfloat16),
        grid_spec=pltpu.PrefetchScalarGridSpec(
            num_scalar_prefetch=0,
            grid=grid,
            in_specs=[
                pl.BlockSpec((tm, F), lambda i: (i, 0)),   # frame tile (f32)
                pl.BlockSpec((F, D), lambda i: (0, 0)),    # W0 (bf16, resident)
                pl.BlockSpec((1, D), lambda i: (0, 0)),    # b0 (f32)
                pl.BlockSpec((D, D), lambda i: (0, 0)),    # W1
                pl.BlockSpec((1, D), lambda i: (0, 0)),    # b1
                pl.BlockSpec((D, D), lambda i: (0, 0)),    # W2
                pl.BlockSpec((1, D), lambda i: (0, 0)),    # b2
            ],
            out_specs=pl.BlockSpec((tm, D), lambda i: (i, 0)),  # lane-dense (D=256)
        ),
        compiler_params=pltpu.CompilerParams(
            dimension_semantics=("parallel",),              # 1 step per TC on v7x
            vmem_limit_bytes=32 * 1024 * 1024,
        ),
        cost_estimate=cost,
    )(x, w0, b0, w1, b1, w2, b2)

    ssl_last_layer = out_flat.reshape(B, L, D)
    # ssl_lens (returned by ssl_model but dropped by SSL_Model.forward)
    # TODO(synk): frames past wav_length of shorter samples are returned
    # unmasked; fairseq applies a padding mask downstream of this module.
    _ssl_lens = wav_length // F
    return ssl_last_layer


def _ref_forward(wav, params, frame=128):
    """Pure-JAX reference (same bf16-in / f32-accumulate numerics), f32 result."""
    w0, b0, w1, b1, w2, b2 = params
    B, _, T = wav.shape
    L = T // frame
    x = wav.reshape(B, T)[:, : L * frame].reshape(B * L, frame).astype(jnp.bfloat16)
    h0 = _gelu(jnp.dot(x, w0, preferred_element_type=jnp.float32) + b0)
    h1 = _gelu(jnp.dot(h0.astype(jnp.bfloat16), w1,
                       preferred_element_type=jnp.float32) + b1)
    h2 = jnp.dot(h1.astype(jnp.bfloat16), w2,
                 preferred_element_type=jnp.float32) + b2
    return h2.reshape(B, L, w0.shape[1])


if __name__ == "__main__":
    # batch=2, waveform length=65536 (~4 s @ 16 kHz), frame=128 -> L=512 per
    # sample, M = B*L = 1024 rows, tm=512 -> 2 parallel grid steps. D=256.
    B, T = 2, 65536
    FRAME, D = 128, 256  # ssl_out_dim = 256 (lane-dense)

    key = jax.random.PRNGKey(0)
    k_wav, k0, k1, k2, kb0, kb1, kb2 = jax.random.split(key, 7)

    wav = jax.random.normal(k_wav, (B, 1, T), dtype=jnp.float32)
    wav_length = jnp.array([T, T - 4096], dtype=jnp.int32)

    # deterministic synthetic SSL backbone parameters;
    # weights pre-cast to bf16 ONCE, outside the jitted forward.
    w0 = (jax.random.normal(k0, (FRAME, D), dtype=jnp.float32)
          * (1.0 / FRAME ** 0.5)).astype(jnp.bfloat16)
    b0 = jax.random.normal(kb0, (1, D), dtype=jnp.float32) * 0.02
    w1 = (jax.random.normal(k1, (D, D), dtype=jnp.float32)
          * (1.0 / D ** 0.5)).astype(jnp.bfloat16)
    b1 = jax.random.normal(kb1, (1, D), dtype=jnp.float32) * 0.02
    w2 = (jax.random.normal(k2, (D, D), dtype=jnp.float32)
          * (1.0 / D ** 0.5)).astype(jnp.bfloat16)
    b2 = jax.random.normal(kb2, (1, D), dtype=jnp.float32) * 0.02
    params = (w0, b0, w1, b1, w2, b2)

    out = ssl_model_forward(wav, wav_length, params, frame=FRAME, tm=512)
    out = jax.block_until_ready(out)

    ref = _ref_forward(wav, params, frame=FRAME)
    assert out.shape == (B, T // FRAME, D), out.shape
    assert out.dtype == jnp.bfloat16, out.dtype
    # bf16 output quantization dominates the tolerance here.
    assert jnp.allclose(out.astype(jnp.float32), ref, atol=5e-2, rtol=5e-2), \
        "mismatch vs reference"

    print("KERNEL_OK")
</pallas_src>

<mosaic_0001>
module attributes {stable_mosaic.version = 11 : i64} {
  func.func @ssl_backbone_kernel(%arg0: i32, %arg1: memref<512x128xf32, #tpu.memory_space<vmem>>, %arg2: memref<128x256xbf16, #tpu.memory_space<vmem>>, %arg3: memref<1x256xf32, #tpu.memory_space<vmem>>, %arg4: memref<256x256xbf16, #tpu.memory_space<vmem>>, %arg5: memref<1x256xf32, #tpu.memory_space<vmem>>, %arg6: memref<256x256xbf16, #tpu.memory_space<vmem>>, %arg7: memref<1x256xf32, #tpu.memory_space<vmem>>, %arg8: memref<512x256xbf16, #tpu.memory_space<vmem>>) attributes {dimension_semantics = [#tpu.dimension_semantics<parallel>], iteration_bounds = array<i64: 2>, scalar_prefetch = 0 : i64, scratch_operands = 0 : i64, tpu.core_type = #tpu.core_type<tc>, window_params = [{transform_indices = @transform_0, window_bounds = array<i64: 512, 128>}, {pipeline_mode = #tpu.pipeline_mode<synchronous>, transform_indices = @transform_1, window_bounds = array<i64: 128, 256>}, {pipeline_mode = #tpu.pipeline_mode<synchronous>, transform_indices = @transform_2, window_bounds = array<i64: 1, 256>}, {pipeline_mode = #tpu.pipeline_mode<synchronous>, transform_indices = @transform_3, window_bounds = array<i64: 256, 256>}, {pipeline_mode = #tpu.pipeline_mode<synchronous>, transform_indices = @transform_4, window_bounds = array<i64: 1, 256>}, {pipeline_mode = #tpu.pipeline_mode<synchronous>, transform_indices = @transform_5, window_bounds = array<i64: 256, 256>}, {pipeline_mode = #tpu.pipeline_mode<synchronous>, transform_indices = @transform_6, window_bounds = array<i64: 1, 256>}, {transform_indices = @transform_7, window_bounds = array<i64: 512, 256>}]} {
    %c0 = arith.constant 0 : index
    %c0_0 = arith.constant 0 : index
    %0 = vector.load %arg1[%c0, %c0_0] : memref<512x128xf32, #tpu.memory_space<vmem>>, vector<512x128xf32>
    %1 = arith.truncf %0 : vector<512x128xf32> to vector<512x128xbf16>
    %c0_1 = arith.constant 0 : index
    %c0_2 = arith.constant 0 : index
    %2 = vector.load %arg2[%c0_1, %c0_2] : memref<128x256xbf16, #tpu.memory_space<vmem>>, vector<128x256xbf16>
    %cst = arith.constant dense<0.000000e+00> : vector<512x256xf32>
    %3 = tpu.matmul %1, %2, %cst {dimension_numbers = #tpu.dot_dimension_numbers<[1], [0], [0], [1], [0, 0, 1, 1], [], []>} : vector<512x128xbf16>, vector<128x256xbf16>, vector<512x256xf32> -> vector<512x256xf32>
    %c0_3 = arith.constant 0 : index
    %c0_4 = arith.constant 0 : index
    %4 = vector.load %arg3[%c0_3, %c0_4] : memref<1x256xf32, #tpu.memory_space<vmem>>, vector<1x256xf32>
    %5 = vector.broadcast %4 : vector<1x256xf32> to vector<512x256xf32>
    %6 = arith.addf %3, %5 : vector<512x256xf32>
    %7 = arith.truncf %6 : vector<512x256xf32> to vector<512x256xbf16>
    %cst_5 = arith.constant 7.968750e-01 : bf16
    %8 = vector.broadcast %cst_5 : bf16 to vector<512x256xbf16>
    %9 = arith.mulf %8, %7 : vector<512x256xbf16>
    %cst_6 = arith.constant 4.467770e-02 : bf16
    %10 = vector.broadcast %cst_6 : bf16 to vector<512x256xbf16>
    %11 = arith.mulf %10, %7 : vector<512x256xbf16>
    %12 = arith.mulf %11, %7 : vector<512x256xbf16>
    %cst_7 = arith.constant 1.000000e+00 : bf16
    %13 = vector.broadcast %cst_7 : bf16 to vector<512x256xbf16>
    %14 = arith.addf %13, %12 : vector<512x256xbf16>
    %15 = arith.mulf %9, %14 : vector<512x256xbf16>
    %16 = arith.extf %15 : vector<512x256xbf16> to vector<512x256xf32>
    %17 = math.tanh %16 : vector<512x256xf32>
    %cst_8 = arith.constant 5.000000e-01 : f32
    %18 = vector.broadcast %cst_8 : f32 to vector<512x256xf32>
    %19 = arith.mulf %18, %6 : vector<512x256xf32>
    %cst_9 = arith.constant 1.000000e+00 : f32
    %20 = vector.broadcast %cst_9 : f32 to vector<512x256xf32>
    %21 = arith.addf %20, %17 : vector<512x256xf32>
    %22 = arith.mulf %19, %21 : vector<512x256xf32>
    %23 = arith.truncf %22 : vector<512x256xf32> to vector<512x256xbf16>
    %c0_10 = arith.constant 0 : index
    %c0_11 = arith.constant 0 : index
    %24 = vector.load %arg4[%c0_10, %c0_11] : memref<256x256xbf16, #tpu.memory_space<vmem>>, vector<256x256xbf16>
    %cst_12 = arith.constant dense<0.000000e+00> : vector<512x256xf32>
    %25 = tpu.matmul %23, %24, %cst_12 {dimension_numbers = #tpu.dot_dimension_numbers<[1], [0], [0], [1], [0, 0, 1, 1], [], []>} : vector<512x256xbf16>, vector<256x256xbf16>, vector<512x256xf32> -> vector<512x256xf32>
    %c0_13 = arith.constant 0 : index
    %c0_14 = arith.constant 0 : index
    %26 = vector.load %arg5[%c0_13, %c0_14] : memref<1x256xf32, #tpu.memory_space<vmem>>, vector<1x256xf32>
    %27 = vector.broadcast %26 : vector<1x256xf32> to vector<512x256xf32>
    %28 = arith.addf %25, %27 : vector<512x256xf32>
    %29 = arith.truncf %28 : vector<512x256xf32> to vector<512x256xbf16>
    %cst_15 = arith.constant 7.968750e-01 : bf16
    %30 = vector.broadcast %cst_15 : bf16 to vector<512x256xbf16>
    %31 = arith.mulf %30, %29 : vector<512x256xbf16>
    %cst_16 = arith.constant 4.467770e-02 : bf16
    %32 = vector.broadcast %cst_16 : bf16 to vector<512x256xbf16>
    %33 = arith.mulf %32, %29 : vector<512x256xbf16>
    %34 = arith.mulf %33, %29 : vector<512x256xbf16>
    %cst_17 = arith.constant 1.000000e+00 : bf16
    %35 = vector.broadcast %cst_17 : bf16 to vector<512x256xbf16>
    %36 = arith.addf %35, %34 : vector<512x256xbf16>
    %37 = arith.mulf %31, %36 : vector<512x256xbf16>
    %38 = arith.extf %37 : vector<512x256xbf16> to vector<512x256xf32>
    %39 = math.tanh %38 : vector<512x256xf32>
    %cst_18 = arith.constant 5.000000e-01 : f32
    %40 = vector.broadcast %cst_18 : f32 to vector<512x256xf32>
    %41 = arith.mulf %40, %28 : vector<512x256xf32>
    %cst_19 = arith.constant 1.000000e+00 : f32
    %42 = vector.broadcast %cst_19 : f32 to vector<512x256xf32>
    %43 = arith.addf %42, %39 : vector<512x256xf32>
    %44 = arith.mulf %41, %43 : vector<512x256xf32>
    %45 = arith.truncf %44 : vector<512x256xf32> to vector<512x256xbf16>
    %c0_20 = arith.constant 0 : index
    %c0_21 = arith.constant 0 : index
    %46 = vector.load %arg6[%c0_20, %c0_21] : memref<256x256xbf16, #tpu.memory_space<vmem>>, vector<256x256xbf16>
    %cst_22 = arith.constant dense<0.000000e+00> : vector<512x256xf32>
    %47 = tpu.matmul %45, %46, %cst_22 {dimension_numbers = #tpu.dot_dimension_numbers<[1], [0], [0], [1], [0, 0, 1, 1], [], []>} : vector<512x256xbf16>, vector<256x256xbf16>, vector<512x256xf32> -> vector<512x256xf32>
    %c0_23 = arith.constant 0 : index
    %c0_24 = arith.constant 0 : index
    %48 = vector.load %arg7[%c0_23, %c0_24] : memref<1x256xf32, #tpu.memory_space<vmem>>, vector<1x256xf32>
    %49 = vector.broadcast %48 : vector<1x256xf32> to vector<512x256xf32>
    %50 = arith.addf %47, %49 : vector<512x256xf32>
    %51 = arith.truncf %50 : vector<512x256xf32> to vector<512x256xbf16>
    %c0_25 = arith.constant 0 : index
    %c0_26 = arith.constant 0 : index
    %52 = vector.load %arg8[%c0_25, %c0_26] : memref<512x256xbf16, #tpu.memory_space<vmem>>, vector<512x256xbf16>
    tpu.vector_store %arg8[%c0_25, %c0_26], %51 {strides = array<i32>} : memref<512x256xbf16, #tpu.memory_space<vmem>>, vector<512x256xbf16>,
    return
  }
  func.func @transform_0(%arg0: i32) -> (i32, i32) {
    %c0_i32 = arith.constant 0 : i32
    %c0_i32_0 = arith.constant 0 : i32
    return %arg0, %c0_i32 : i32, i32
  }
  func.func @transform_1(%arg0: i32) -> (i32, i32) {
    %c0_i32 = arith.constant 0 : i32
    %c0_i32_0 = arith.constant 0 : i32
    %c0_i32_1 = arith.constant 0 : i32
    return %c0_i32, %c0_i32_0 : i32, i32
  }
  func.func @transform_2(%arg0: i32) -> (i32, i32) {
    %c0_i32 = arith.constant 0 : i32
    %c0_i32_0 = arith.constant 0 : i32
    %c0_i32_1 = arith.constant 0 : i32
    return %c0_i32, %c0_i32_0 : i32, i32
  }
  func.func @transform_3(%arg0: i32) -> (i32, i32) {
    %c0_i32 = arith.constant 0 : i32
    %c0_i32_0 = arith.constant 0 : i32
    %c0_i32_1 = arith.constant 0 : i32
    return %c0_i32, %c0_i32_0 : i32, i32
  }
  func.func @transform_4(%arg0: i32) -> (i32, i32) {
    %c0_i32 = arith.constant 0 : i32
    %c0_i32_0 = arith.constant 0 : i32
    %c0_i32_1 = arith.constant 0 : i32
    return %c0_i32, %c0_i32_0 : i32, i32
  }
  func.func @transform_5(%arg0: i32) -> (i32, i32) {
    %c0_i32 = arith.constant 0 : i32
    %c0_i32_0 = arith.constant 0 : i32
    %c0_i32_1 = arith.constant 0 : i32
    return %c0_i32, %c0_i32_0 : i32, i32
  }
  func.func @transform_6(%arg0: i32) -> (i32, i32) {
    %c0_i32 = arith.constant 0 : i32
    %c0_i32_0 = arith.constant 0 : i32
    %c0_i32_1 = arith.constant 0 : i32
    return %c0_i32, %c0_i32_0 : i32, i32
  }
  func.func @transform_7(%arg0: i32) -> (i32, i32) {
    %c0_i32 = arith.constant 0 : i32
    %c0_i32_0 = arith.constant 0 : i32
    return %arg0, %c0_i32 : i32, i32
  }
}

</mosaic_0001>

<bundles_post_ra>
// kernel: ssl_model_forward.1
= control target key start
LH: loop header
LB: loop body
LE: loop exit
PB: predicated region body
PF: predicated region fallthrough
CT: control target
= control target key end

     0   :  { %12 = vsyncpa [#allocation3], 0  ;;  %s9668_s0 = inlined_call_operand.hbm [shape: f32[1024,128], index: 0, kind: input, shape index: {}]   ;;  %s9669_s1 = inlined_call_operand.hbm [shape: bf16[128,256], index: 1, kind: input, shape index: {}]   ;;  %s9670_s2 = inlined_call_operand.vmem [shape: f32[1,256], index: 2, kind: input, shape index: {}]   ;;  %s9671_s3 = inlined_call_operand.hbm [shape: bf16[256,256], index: 3, kind: input, shape index: {}]   ;;  %s9672_s4 = inlined_call_operand.vmem [shape: f32[1,256], index: 4, kind: input, shape index: {}]   ;;  %s9673_s5 = inlined_call_operand.hbm [shape: bf16[256,256], index: 5, kind: input, shape index: {}]   ;;  %s9674_s6 = inlined_call_operand.vmem [shape: f32[1,256], index: 6, kind: input, shape index: {}]   ;;  %s9675_s7 = inlined_call_operand.hbm [shape: bf16[1024,256], index: 7, kind: output, shape index: {}]  }
   0x1   :  { %14 = vsyncpa [#allocation3 + $0x1], 0 }
   0x2   :  { %15 = vsyncpa [#allocation6], 0 }
   0x3   :  { %16 = vsyncpa [#allocation9], 0 }
   0x4   :  { %17 = vsyncpa [#allocation4], 0 }
   0x5   :  { %19 = vsyncpa [#allocation4 + $0x1], 0  ;;  %s5961_s24 = smov 0   ;;  %s5963_s25 = smov 0  }
   0x6   :  { %s5965_s26 = smov 0   ;;  %s5967_s27 = smov 0  }
   0x7 LB: > { %s5982_s28 = sadd.s32 4294967295, %s5909_s27   ;;  %s4759_s29 = sadd.s32 4294967294, %s5909_s27   ;;  %s5909_s27 = sphi %s5967_s27, %s10027_s27   ;;  %s5905_s26 = sphi %s5965_s26, %s10026_s26   ;;  %s5901_s25 = sphi %s5963_s25, %s10025_s25   ;;  %s5897_s24 = sphi %s5961_s24, %s10024_s24  }
   0x8   : > { %p45_p0 = scmp.ne.s32.totalorder %s5901_s25, %s5897_s24  ;;  %p9676_p1 = scmp.eq.s32.totalorder %s5982_s28, 0 }
   0x9   : > { %p201_p3 = scmp.eq.s32.totalorder %s4759_s29, 1  ;;  %p4760_p5 = scmp.ge.s32.totalorder %s5909_s27, 1 }
   0xa   : > { %p5991_p4 = por %p9676_p1, %p45_p0  ;;  %p208_p7 = scmp.lt.s32.totalorder %s5909_s27, 3 }
   0xb   : > { %p5996_p6 = por %p201_p3, %p45_p0  ;;  %s5911_s10 = smov [#allocation5]  }
   0xc   : > { %s9710_s30 = scalar_select %p5991_p4, 1, 0 }
   0xd   : > { %s9711_s8 = scalar_select %p5996_p6, 1, 0 }
   0xe   : > { %p6001_p8 = pnand %p4760_p5, %p208_p7  ;;  %s220_s11 = sshll.u32 %s5911_s10, 4  ;;  %s6005_s11 = int_to_ptr.vmem [resolvable:$true] %s220_s11 }
   0xf   : > { %9712 = sst [smem:[#allocation15_spill]] %s9711_s8  ;;  %s5912_s13 = smov [#allocation7]  }
  0x10   : > { %s9713_s9 = scalar_select %p6001_p8, 1, 0 }
  0x11   : > { %p5023_p9 = pneg %p6001_p8  ;;  %s236_s14 = sshll.u32 %s5912_s13, 4  ;;  %s6016_s14 = int_to_ptr.vmem [resolvable:$true] %s236_s14 }
  0x12   : > { %s5913_s15 = smov [#allocation8]   ;;  %s5721_s19 = scalar_lea.hbm %s9669_s1, 2048 }
  0x13   : > { %p6012_p11 = pnand %p5023_p9, %p9676_p1  ;;  %s6018_s16 = sshll.u32 %s5913_s15, 4  ;;  %s253_s16 = int_to_ptr.vmem [resolvable:$true] %s6018_s16 }
  0x14   : > { %p5722_p12 = scmp.ne.s32.totalorder %s9669_s1, %s5721_s19  ;;  %p5728_p5 = scmp.lt.u32.totalorder %s5721_s19, %s9669_s1 }
  0x15   : > { %p6028_p13 = pneg %p6012_p11 }
  0x17   : > { %p5724_p0 = pnand %p6028_p13, %p5722_p12 }
  0x19   : > { %p5725_p3 = pneg %p5724_p0 }
  0x1b   : > { %p5730_p7 = pnand %p5728_p5, %p5725_p3 }
  0x1d   : > { %5733 = shalt.err (!%p5730_p7)
}
  0x1e   : > { %s5734_s10 = scalar_lea.vmem %s6005_s11, 2048  ;;  %p5742_p2 = scmp.lt.s32.totalorder %s6005_s11, %s6005_s11 }
  0x1f   : > { %p5735_p9 = scmp.ne.s32.totalorder %s6005_s11, %s5734_s10  ;;  %p5743_p6 = scmp.lt.s32.totalorder %s5734_s10, %s5734_s10 }
  0x21   : > { %p5737_p10 = pnand %p5735_p9, %p6028_p13  ;;  %p5744_p12 = por %p5743_p6, %p5742_p2 }
  0x23   : > { %p5738_p1 = pneg %p5737_p10 }
  0x25   : > { %p5745_p0 = pnand %p5744_p12, %p5738_p1 }
  0x27   : > { %5748 = shalt.err (!%p5745_p0)
}
  0x28   : > { %s5914_s13 = smov 128   ;;  %s5915_s15 = smov 8  }
  0x29   : > { %5026 = dma.hbm_to_vmem [thread:$0]  (!%p6012_p11), %s9669_s1, 2048, %s6005_s11, [#allocation6], %s5914_s13, %s5914_s13, %s5915_s15  }
  0x2a   : > { %s5749_s21 = scalar_lea.hbm %s9671_s3, 4096 }
  0x2b   : > { %p5750_p1 = scmp.ne.s32.totalorder %s9671_s3, %s5749_s21  ;;  %p5756_p10 = scmp.lt.u32.totalorder %s5749_s21, %s9671_s3 }
  0x2d   : > { %p5752_p2 = pnand %p5750_p1, %p6028_p13 }
  0x2f   : > { %p5753_p6 = pneg %p5752_p2 }
  0x31   : > { %p5758_p3 = pnand %p5756_p10, %p5753_p6 }
  0x33   : > { %5761 = shalt.err (!%p5758_p3)
}
  0x34   : > { %s5762_s11 = scalar_lea.vmem %s6016_s14, 4096  ;;  %p5770_p12 = scmp.lt.s32.totalorder %s6016_s14, %s6016_s14 }
  0x35   : > { %p5763_p5 = scmp.ne.s32.totalorder %s6016_s14, %s5762_s11  ;;  %p5771_p0 = scmp.lt.s32.totalorder %s5762_s11, %s5762_s11 }
  0x37   : > { %p5765_p7 = pnand %p5763_p5, %p6028_p13  ;;  %p5772_p1 = por %p5771_p0, %p5770_p12 }
  0x39   : > { %p5766_p9 = pneg %p5765_p7 }
  0x3b   : > { %p5773_p2 = pnand %p5772_p1, %p5766_p9 }
  0x3d   : > { %5776 = shalt.err (!%p5773_p2)
}
  0x3e   : > { %5029 = dma.hbm_to_vmem [thread:$0]  (!%p6012_p11), %s9671_s3, 4096, %s6016_s14, [#allocation6], %s5914_s13, %s5914_s13, %s5915_s15  }
  0x3f   : > { %s5777_s20 = scalar_lea.hbm %s9673_s5, 4096 }
  0x40   : > { %p5778_p6 = scmp.ne.s32.totalorder %s9673_s5, %s5777_s20  ;;  %p5784_p5 = scmp.lt.u32.totalorder %s5777_s20, %s9673_s5 }
  0x42   : > { %p5780_p10 = pnand %p5778_p6, %p6028_p13 }
  0x44   : > { %p5781_p3 = pneg %p5780_p10 }
  0x46   : > { %p5786_p7 = pnand %p5784_p5, %p5781_p3 }
  0x48   : > { %5789 = shalt.err (!%p5786_p7)
}
  0x49   : > { %s5790_s11 = scalar_lea.vmem %s253_s16, 4096  ;;  %p5798_p1 = scmp.lt.s32.totalorder %s253_s16, %s253_s16 }
  0x4a   : > { %p5791_p9 = scmp.ne.s32.totalorder %s253_s16, %s5790_s11  ;;  %p5799_p2 = scmp.lt.s32.totalorder %s5790_s11, %s5790_s11 }
  0x4c   : > { %p5793_p12 = pnand %p5791_p9, %p6028_p13  ;;  %p5800_p4 = por %p5799_p2, %p5798_p1 }
  0x4e   : > { %p5794_p0 = pneg %p5793_p12 }
  0x50   : > { %p5801_p8 = pnand %p5800_p4, %p5794_p0 }
  0x52   : > { %5804 = shalt.err (!%p5801_p8)
}
  0x53   : > { %5032 = dma.hbm_to_vmem [thread:$0]  (!%p6012_p11), %s9673_s5, 4096, %s253_s16, [#allocation9], %s5914_s13, %s5914_s13, %s5915_s15  }
  0x54   : > { %s6101_s22 = sadd.s32 1, %s5909_s27   ;;  %s32_s17 = sadd.s32 1, %s5905_s26 }
  0x55   : > { %s29_s12 = ssub.s32 %s5909_s27, %s6101_s22  ;;  %p39_p8 = scmp.ne.s32.totalorder %s5905_s26, %s5901_s25 }
  0x56   : > { %p30_p4 = scmp.eq.s32.totalorder %s29_s12, 0  ;;  %p40_p13 = scmp.eq.s32.totalorder %s5909_s27, 0 }
  0x57   : > { %p5044_p6 = scmp.lt.s32.totalorder %s5909_s27, 2  ;;  %p9716_p3 = scmp.eq.s32.totalorder %s5982_s28, 1 }
  0x58   : > { %s6111_s18 = scalar_select %p30_p4, %s5905_s26, %s32_s17  }
  0x59   : > { %p41_p10 = por %p40_p13, %p39_p8  ;;  %p6115_p5 = por %p9716_p3, %p39_p8 }
  0x5a   : > { %s269_s20 = sand.u32 1, %s5905_s26   ;;  %s4924_s21 = sshll.u32 %s5909_s27, 13 }
  0x5b   : > { %s4765_s16 = sshll.u32 %s269_s20, 9  ;;  %s6124_s10 = scalar_lea.hbm %s9668_s0, %s4924_s21 }
  0x5c   : > { %s273_s11 = scalar_lea.vmem [#allocation2], %s4765_s16  ;;  %p6126_p11 = pnand %p5044_p6, %p41_p10 }
  0x5d   : > { %s280_s14 = sshll.u32 %s273_s11, 4  ;;  %s6132_s12 = scalar_lea.sflag [#allocation3], %s269_s20  ;;  %s6130_s14 = int_to_ptr.vmem [resolvable:$true] %s280_s14 }
  0x5e   : > { %s5805_s17 = scalar_lea.hbm %s6124_s10, 8192  ;;  %p5807_p9 = pneg %p6126_p11 }
  0x5f   : > { %p5806_p7 = scmp.ne.s32.totalorder %s6124_s10, %s5805_s17  ;;  %s5810_s23 = scalar_lea.hbm %s9668_s0, 16384 }
  0x60   : > { %p5811_p1 = scmp.lt.u32.totalorder %s6124_s10, %s9668_s0  ;;  %p5812_p2 = scmp.lt.u32.totalorder %s5810_s23, %s5805_s17 }
  0x61   : > { %p5808_p12 = pnand %p5807_p9, %p5806_p7  ;;  %p5814_p8 = scmp.lt.u32.totalorder %s5805_s17, %s6124_s10 }
  0x62   : > { %p5813_p4 = por %p5812_p2, %p5811_p1 }
  0x63   : > { %p5809_p0 = pneg %p5808_p12 }
  0x64   : > { %p5815_p13 = por %p5814_p8, %p5813_p4 }
  0x66   : > { %p5816_p6 = pnand %p5815_p13, %p5809_p0 }
  0x68   : > { %5819 = shalt.err (!%p5816_p6)
}
  0x69   : > { %s5820_s20 = scalar_lea.vmem %s6130_s14, 8192  ;;  %s5916_s21 = smov [#allocation2]  }
  0x6a   : > { %p5821_p10 = scmp.ne.s32.totalorder %s6130_s14, %s5820_s20  ;;  %s5825_s16 = sshll.u32 %s5916_s21, 4  ;;  %s5826_s16 = int_to_ptr.vmem [resolvable:$false] %s5825_s16 }
  0x6b   : > { %s5827_s29 = scalar_lea.vmem %s5826_s16, 16384  ;;  %p5828_p12 = scmp.lt.s32.totalorder %s6130_s14, %s5826_s16 }
  0x6c   : > { %p5823_p3 = pnand %p5821_p10, %p5807_p9  ;;  %p5829_p1 = scmp.lt.s32.totalorder %s5827_s29, %s5820_s20 }
  0x6e   : > { %p5824_p7 = pneg %p5823_p3  ;;  %p5830_p2 = por %p5829_p1, %p5828_p12 }
  0x70   : > { %p5831_p4 = pnand %p5830_p2, %p5824_p7 }
  0x72   : > { %5834 = shalt.err (!%p5831_p4)
}
  0x73   : > { %5036 = dma.hbm_to_vmem [thread:$0]  (!%p6126_p11), %s6124_s10, 8192, %s6130_s14, %s6132_s12, %s5914_s13, %s5914_s13, %s5915_s15  }
  0x74   : > { %p9719_p9 = scmp.ne.s32.totalorder %s9713_s9, 0 }
  0x76   : > { %292 = sbr.rel (%p9719_p9) target bundleno = 1266 (0x4f2), region = 48 }
  0x7d   : > { %s6166_s17 = sand.u32 1, %s5901_s25   ;;  %p9720_p0 = scmp.ne.s32.totalorder %s9710_s30, 0 }
  0x7e   : > { %s4769_s23 = sshll.u32 %s6166_s17, 9  ;;  %s295_s11 = scalar_lea.sflag [#allocation3], %s6166_s17 }
  0x7f   : > { %s6172_s8 = scalar_lea.vmem [#allocation2], %s4769_s23 }
  0x80   : > { %5880 = dma.done.wait (%p9720_p0), %s295_s11, 8192  }
  0x81   : > { %5882 = vsyncadd (%p9720_p0), %s295_s11, 4294959104  ;;  %p9721_p11 = scmp.eq.s32.totalorder %s5982_s28, 0 }
  0x83   : > { %5884 = dma.done.wait (%p9721_p11), [#allocation6], 6144   ;;  %p9722_p8 = pmov %p9721_p11 }
  0x85   : > { %5886 = vsyncadd (%p9722_p8), [#allocation6], 4294961152  ;;  %p9723_p13 = pmov %p9722_p8 }
  0x86   : > { %p9724_p6 = pmov %p9722_p8 }
  0x87   : > { %5888 = dma.done.wait (%p9723_p13), [#allocation9], 4096  }
  0x88   : > { %5890 = vsyncadd (%p9724_p6), [#allocation9], 4294963200  ;;  %v5917_v0 = vmov 0   ;;  %v5089_v1 = vld [vmem:[#allocation5 + $0x4] ss:$8 sps:$4 sm:$0xff]   ;;  %v349_v26 = vld [vmem:[%s6172_s8 + $0x10] sm:$0xff] }
  0x89   : > { %583 = vmatprep.mubr.bf16.mxu0 %v5917_v0  ;;  %743 = vmatprep.mubr.bf16.mxu1 %v5917_v0  ;;  %v5091_v2 = vld [vmem:[#allocation5] ss:$8 sps:$4 sm:$0xff]   ;;  %v5092_v3 = vld [vmem:[#allocation5 + $0x14] ss:$8 sps:$4 sm:$0xff]   ;;  %v5094_v4 = vld [vmem:[#allocation5 + $0x10] ss:$8 sps:$4 sm:$0xff]  }
  0x8a   : > { %551 = vmatprep.subr.bf16.mxu0 %v5089_v1  ;;  %4991 = vmatprep.subr.bf16.mxu1 %v5089_v1  ;;  %v5095_v5 = vld [vmem:[#allocation5 + $0x24] ss:$8 sps:$4 sm:$0xff]   ;;  %v5097_v6 = vld [vmem:[#allocation5 + $0x20] ss:$8 sps:$4 sm:$0xff]   ;;  %v5098_v7 = vld [vmem:[#allocation5 + $0x34] ss:$8 sps:$4 sm:$0xff]  }
  0x8b   : > { %552 = vmatpush1.bf16.msra.mxu0 %v5091_v2  ;;  %4999 = vmatpush1.bf16.msra.mxu1 %v5091_v2  ;;  %v5100_v8 = vld [vmem:[#allocation5 + $0x30] ss:$8 sps:$4 sm:$0xff]   ;;  %v5101_v9 = vld [vmem:[#allocation5 + $0x44] ss:$8 sps:$4 sm:$0xff]   ;;  %v5103_v10 = vld [vmem:[#allocation5 + $0x40] ss:$8 sps:$4 sm:$0xff]  }
  0x8c   : > { %553 = vmatprep.subr.bf16.mxu0 %v5092_v3  ;;  %4992 = vmatprep.subr.bf16.mxu1 %v5092_v3  ;;  %v5104_v11 = vld [vmem:[#allocation5 + $0x54] ss:$8 sps:$4 sm:$0xff]   ;;  %v5106_v12 = vld [vmem:[#allocation5 + $0x50] ss:$8 sps:$4 sm:$0xff]   ;;  %v5107_v13 = vld [vmem:[#allocation5 + $0x64] ss:$8 sps:$4 sm:$0xff]  }
  0x8d   : > { %v5109_v14 = vld [vmem:[#allocation5 + $0x60] ss:$8 sps:$4 sm:$0xff]   ;;  %v5110_v15 = vld [vmem:[#allocation5 + $0x74] ss:$8 sps:$4 sm:$0xff]   ;;  %v5112_v16 = vld [vmem:[#allocation5 + $0x70] ss:$8 sps:$4 sm:$0xff]  }
  0x8e   : > { %v347_v17 = vld [vmem:[%s6172_s8] sm:$0xff]  ;;  %v348_v18 = vld [vmem:[%s6172_s8 + $0x8] sm:$0xff]  ;;  %v5118_v25 = vld [vmem:[#allocation7 + $0x14] ss:$8 sps:$4 sm:$0xff]   ;;  %s9339_s12 = scalar_lea.vmem [#allocation10], %s4769_s23  ;;  %s4990_s20 = sshll.u32 %s5982_s28, 13 }
  0x8f   : > { %554 = vmatpush1.bf16.msra.mxu0 %v5094_v4  ;;  %5000 = vmatpush1.bf16.msra.mxu1 %v5094_v4  ;;  %v379_v19 = vld [vmem:[%s6172_s8 + $0x100] sm:$0xff]  ;;  %v380_v20 = vld [vmem:[%s6172_s8 + $0x108] sm:$0xff]  ;;  %v411_v22 = vpack.c.bf16 %v348_v18, %v347_v17  ;;  %v350_v27 = vld [vmem:[%s6172_s8 + $0x18] sm:$0xff]  ;;  %s4657_s21 = sshll.u32 %s9339_s12, 4  ;;  %s9620_s23 = scalar_lea.hbm %s9675_s7, %s4990_s20  ;;  %s9622_s21 = int_to_ptr.vmem [resolvable:$true] %s4657_s21 }
  0x90   : > { %555 = vmatprep.subr.bf16.mxu0 %v5095_v5  ;;  %4993 = vmatprep.subr.bf16.mxu1 %v5095_v5  ;;  %v5115_v21 = vld [vmem:[#allocation7 + $0x4] ss:$8 sps:$4 sm:$0xff]   ;;  %v427_v23 = vpack.c.bf16 %v380_v20, %v379_v19  ;;  %v5113_v24 = vld [vmem:[#allocation7] ss:$8 sps:$4 sm:$0xff]   ;;  %v381_v28 = vld [vmem:[%s6172_s8 + $0x110] sm:$0xff]  ;;  %v412_v32 = vpack.c.bf16 %v350_v27, %v349_v26  ;;  %s4643_s28 = scalar_lea.sflag [#allocation4], %s6166_s17 }
  0x91   : > { %v382_v29 = vld [vmem:[%s6172_s8 + $0x118] sm:$0xff]  ;;  %v5121_v31 = vld [vmem:[#allocation7 + $0x24] ss:$8 sps:$4 sm:$0xff]   ;;  %v5119_v34 = vld [vmem:[#allocation7 + $0x20] ss:$8 sps:$4 sm:$0xff]   ;;  %s5835_s11 = scalar_lea.vmem %s9622_s21, 8192 }
  0x92   : > { %v5116_v30 = vld [vmem:[#allocation7 + $0x10] ss:$8 sps:$4 sm:$0xff]   ;;  %v428_v33 = vpack.c.bf16 %v382_v29, %v381_v28  ;;  %v5124_v35 = vld [vmem:[#allocation7 + $0x34] ss:$8 sps:$4 sm:$0xff]   ;;  %v351_v36 = vld [vmem:[%s6172_s8 + $0x20] sm:$0xff]  ;;  %p5836_p10 = scmp.ne.s32.totalorder %s9622_s21, %s5835_s11 }
  0x93   : > { %556 = vmatpush1.bf16.msra.mxu0 %v5097_v6  ;;  %5001 = vmatpush1.bf16.msra.mxu1 %v5097_v6  ;;  %v352_v37 = vld [vmem:[%s6172_s8 + $0x28] sm:$0xff]  ;;  %v383_v38 = vld [vmem:[%s6172_s8 + $0x120] sm:$0xff]  ;;  %v5122_v40 = vld [vmem:[#allocation7 + $0x30] ss:$8 sps:$4 sm:$0xff]  }
  0x94   : > { %557 = vmatprep.subr.bf16.mxu0 %v5098_v7  ;;  %4994 = vmatprep.subr.bf16.mxu1 %v5098_v7  ;;  %v384_v39 = vld [vmem:[%s6172_s8 + $0x128] sm:$0xff]  ;;  %v413_v42 = vpack.c.bf16 %v352_v37, %v351_v36  ;;  %v5130_v45 = vld [vmem:[#allocation7 + $0x54] ss:$8 sps:$4 sm:$0xff]   ;;  %v5128_v50 = vld [vmem:[#allocation7 + $0x50] ss:$8 sps:$4 sm:$0xff]   ;;  %p5837_p3 = pnand %p5836_p10, %p6115_p5 }
  0x95   : > { %v5127_v41 = vld [vmem:[#allocation7 + $0x44] ss:$8 sps:$4 sm:$0xff]   ;;  %v429_v43 = vpack.c.bf16 %v384_v39, %v383_v38  ;;  %v5125_v44 = vld [vmem:[#allocation7 + $0x40] ss:$8 sps:$4 sm:$0xff]   ;;  %v353_v46 = vld [vmem:[%s6172_s8 + $0x30] sm:$0xff] }
  0x96   : > { %v354_v47 = vld [vmem:[%s6172_s8 + $0x38] sm:$0xff]  ;;  %v385_v48 = vld [vmem:[%s6172_s8 + $0x130] sm:$0xff]  ;;  %v5133_v51 = vld [vmem:[#allocation7 + $0x64] ss:$8 sps:$4 sm:$0xff]   ;;  %p5838_p7 = pneg %p5837_p3 }
  0x97   : > { %558 = vmatpush1.bf16.msra.mxu0 %v5100_v8  ;;  %5002 = vmatpush1.bf16.msra.mxu1 %v5100_v8  ;;  %v386_v49 = vld [vmem:[%s6172_s8 + $0x138] sm:$0xff]  ;;  %v414_v52 = vpack.c.bf16 %v354_v47, %v353_v46  ;;  %v5131_v54 = vld [vmem:[#allocation7 + $0x60] ss:$8 sps:$4 sm:$0xff]   ;;  %v5139_v61 = vld [vmem:[#allocation7 + $0x84] ss:$8 sps:$4 sm:$0xff]  }
  0x98   : > { %559 = vmatprep.subr.bf16.mxu0 %v5101_v9  ;;  %4995 = vmatprep.subr.bf16.mxu1 %v5101_v9  ;;  %v430_v53 = vpack.c.bf16 %v386_v49, %v385_v48  ;;  %v5136_v55 = vld [vmem:[#allocation7 + $0x74] ss:$8 sps:$4 sm:$0xff]   ;;  %v355_v56 = vld [vmem:[%s6172_s8 + $0x40] sm:$0xff]  ;;  %v356_v57 = vld [vmem:[%s6172_s8 + $0x48] sm:$0xff] }
  0x99   : > { %v387_v58 = vld [vmem:[%s6172_s8 + $0x140] sm:$0xff]  ;;  %v388_v59 = vld [vmem:[%s6172_s8 + $0x148] sm:$0xff]  ;;  %v5134_v60 = vld [vmem:[#allocation7 + $0x70] ss:$8 sps:$4 sm:$0xff]   ;;  %v415_v62 = vpack.c.bf16 %v356_v57, %v355_v56 }
  0x9a   : > { %v431_v63 = vpack.c.bf16 %v388_v59, %v387_v58  ;;  %v5137_v1 = vld [vmem:[#allocation7 + $0x80] ss:$8 sps:$4 sm:$0xff]   ;;  %v5142_v2 = vld [vmem:[#allocation7 + $0x94] ss:$8 sps:$4 sm:$0xff]   ;;  %v5140_v7 = vld [vmem:[#allocation7 + $0x90] ss:$8 sps:$4 sm:$0xff]  }
  0x9b   : > { %560 = vmatpush1.bf16.msra.mxu0 %v5103_v10  ;;  %5003 = vmatpush1.bf16.msra.mxu1 %v5103_v10  ;;  %v357_v3 = vld [vmem:[%s6172_s8 + $0x50] sm:$0xff]  ;;  %v358_v4 = vld [vmem:[%s6172_s8 + $0x58] sm:$0xff]  ;;  %v5145_v8 = vld [vmem:[#allocation7 + $0xa4] ss:$8 sps:$4 sm:$0xff]  }
  0x9c   : > { %561 = vmatprep.subr.bf16.mxu0 %v5104_v11  ;;  %4996 = vmatprep.subr.bf16.mxu1 %v5104_v11  ;;  %v389_v5 = vld [vmem:[%s6172_s8 + $0x150] sm:$0xff]  ;;  %v390_v6 = vld [vmem:[%s6172_s8 + $0x158] sm:$0xff]  ;;  %v416_v9 = vpack.c.bf16 %v358_v4, %v357_v3  ;;  %v5143_v11 = vld [vmem:[#allocation7 + $0xa0] ss:$8 sps:$4 sm:$0xff]  }
  0x9d   : > { %v432_v10 = vpack.c.bf16 %v390_v6, %v389_v5  ;;  %v5146_v17 = vld [vmem:[#allocation7 + $0xb0] ss:$8 sps:$4 sm:$0xff]   ;;  %v363_v26 = vld [vmem:[%s6172_s8 + $0x80] sm:$0xff]  ;;  %v364_v27 = vld [vmem:[%s6172_s8 + $0x88] sm:$0xff] }
  0x9e   : > { %v361_v20 = vld [vmem:[%s6172_s8 + $0x70] sm:$0xff]  ;;  %v395_v28 = vld [vmem:[%s6172_s8 + $0x180] sm:$0xff]  ;;  %v396_v29 = vld [vmem:[%s6172_s8 + $0x188] sm:$0xff] }
  0x9f   : > { %562 = vmatpush1.bf16.msra.mxu0 %v5106_v12  ;;  %5004 = vmatpush1.bf16.msra.mxu1 %v5106_v12  ;;  %v5148_v12 = vld [vmem:[#allocation7 + $0xb4] ss:$8 sps:$4 sm:$0xff]   ;;  %v367_v38 = vld [vmem:[%s6172_s8 + $0xa0] sm:$0xff]  ;;  %v368_v39 = vld [vmem:[%s6172_s8 + $0xa8] sm:$0xff] }
  0xa0   : > { %563 = vmatprep.subr.bf16.mxu0 %v5107_v13  ;;  %4997 = vmatprep.subr.bf16.mxu1 %v5107_v13  ;;  %v359_v13 = vld [vmem:[%s6172_s8 + $0x60] sm:$0xff]  ;;  %v401_v46 = vld [vmem:[%s6172_s8 + $0x1b0] sm:$0xff]  ;;  %v402_v47 = vld [vmem:[%s6172_s8 + $0x1b8] sm:$0xff] }
  0xa1   : > { %v438_v49 = vpack.c.bf16 %v402_v47, %v401_v46  ;;  %v373_v56 = vld [vmem:[%s6172_s8 + $0xd0] sm:$0xff]  ;;  %v374_v57 = vld [vmem:[%s6172_s8 + $0xd8] sm:$0xff]  ;;  %v407_v3 = vld [vmem:[%s6172_s8 + $0x1e0] sm:$0xff] }
  0xa2   : > { %v405_v58 = vld [vmem:[%s6172_s8 + $0x1d0] sm:$0xff]  ;;  %v406_v59 = vld [vmem:[%s6172_s8 + $0x1d8] sm:$0xff]  ;;  %v408_v4 = vld [vmem:[%s6172_s8 + $0x1e8] sm:$0xff] }
  0xa3   : > { %564 = vmatpush1.bf16.msra.mxu0 %v5109_v14  ;;  %5005 = vmatpush1.bf16.msra.mxu1 %v5109_v14  ;;  %v360_v14 = vld [vmem:[%s6172_s8 + $0x68] sm:$0xff]  ;;  %v5154_v5 = vld [vmem:[#allocation7 + $0xd4] ss:$8 sps:$4 sm:$0xff]   ;;  %v5152_v6 = vld [vmem:[#allocation7 + $0xd0] ss:$8 sps:$4 sm:$0xff]  }
  0xa4   : > { %565 = vmatprep.subr.bf16.mxu0 %v5110_v15  ;;  %4998 = vmatprep.subr.bf16.mxu1 %v5110_v15  ;;  %v391_v15 = vld [vmem:[%s6172_s8 + $0x160] sm:$0xff]  ;;  %v417_v18 = vpack.c.bf16 %v360_v14, %v359_v13  ;;  %v409_v13 = vld [vmem:[%s6172_s8 + $0x1f0] sm:$0xff]  ;;  %v410_v14 = vld [vmem:[%s6172_s8 + $0x1f8] sm:$0xff] }
  0xa7   : > { %566 = vmatpush1.bf16.msra.mxu0 %v5112_v16  ;;  %5006 = vmatpush1.bf16.msra.mxu1 %v5112_v16  ;;  %v392_v16 = vld [vmem:[%s6172_s8 + $0x168] sm:$0xff] }
  0xa8   : > { %2196 = vmatprep.subr.bf16.mxu1 %v5115_v21  ;;  %v433_v19 = vpack.c.bf16 %v392_v16, %v391_v15  ;;  %v362_v21 = vld [vmem:[%s6172_s8 + $0x78] sm:$0xff]  ;;  %v442_v16 = vpack.c.bf16 %v410_v14, %v409_v13 }
  0xaa   : > { %584 = vmatmul.mubr.bf16.vlgmr.msra.gmra.mrb[0].mxu0 %v411_v22  ;;  %744 = vmatmul.mubr.bf16.vlgmr.msra.gmra.mrb[0].mxu1 %v427_v23  ;;  %v393_v22 = vld [vmem:[%s6172_s8 + $0x170] sm:$0xff]  ;;  %v394_v23 = vld [vmem:[%s6172_s8 + $0x178] sm:$0xff] }
  0xab   : > { %593 = vmatprep.mubr.bf16.mxu0 %v5917_v0  ;;  %753 = vmatprep.mubr.bf16.mxu1 %v5917_v0 }
  0xac   : > { %2197 = vmatpush1.bf16.msra.mxu1 %v5113_v24  ;;  %v418_v24 = vpack.c.bf16 %v362_v21, %v361_v20 }
  0xad   : > { %2198 = vmatprep.subr.bf16.mxu1 %v5118_v25  ;;  %v434_v25 = vpack.c.bf16 %v394_v23, %v393_v22 }
  0xb0   : > { %2199 = vmatpush1.bf16.msra.mxu1 %v5116_v30  ;;  %v419_v30 = vpack.c.bf16 %v364_v27, %v363_v26 }
  0xb1   : > { %2200 = vmatprep.subr.bf16.mxu1 %v5121_v31  ;;  %v435_v31 = vpack.c.bf16 %v396_v29, %v395_v28 }
  0xb2   : > { %594 = vmatmul.mubr.bf16.gmra.mrb[4].mxu0 %v412_v32  ;;  %754 = vmatmul.mubr.bf16.gmra.mrb[4].mxu1 %v428_v33  ;;  %v365_v32 = vld [vmem:[%s6172_s8 + $0x90] sm:$0xff]  ;;  %v366_v33 = vld [vmem:[%s6172_s8 + $0x98] sm:$0xff] }
  0xb3   : > { %603 = vmatprep.mubr.bf16.mxu0 %v5917_v0  ;;  %763 = vmatprep.mubr.bf16.mxu1 %v5917_v0  ;;  %v420_v36 = vpack.c.bf16 %v366_v33, %v365_v32 }
  0xb4   : > { %2201 = vmatpush1.bf16.msra.mxu1 %v5119_v34  ;;  %v397_v34 = vld [vmem:[%s6172_s8 + $0x190] sm:$0xff] }
  0xb5   : > { %2202 = vmatprep.subr.bf16.mxu1 %v5124_v35  ;;  %v398_v35 = vld [vmem:[%s6172_s8 + $0x198] sm:$0xff] }
  0xb6   : > { %v436_v37 = vpack.c.bf16 %v398_v35, %v397_v34 }
  0xb8   : > { %2203 = vmatpush1.bf16.msra.mxu1 %v5122_v40  ;;  %v399_v40 = vld [vmem:[%s6172_s8 + $0x1a0] sm:$0xff] }
  0xb9   : > { %2204 = vmatprep.subr.bf16.mxu1 %v5127_v41  ;;  %v400_v41 = vld [vmem:[%s6172_s8 + $0x1a8] sm:$0xff] }
  0xba   : > { %604 = vmatmul.mubr.bf16.gmra.mrb[8].mxu0 %v413_v42  ;;  %764 = vmatmul.mubr.bf16.gmra.mrb[8].mxu1 %v429_v43  ;;  %v421_v42 = vpack.c.bf16 %v368_v39, %v367_v38  ;;  %v437_v43 = vpack.c.bf16 %v400_v41, %v399_v40 }
  0xbb   : > { %613 = vmatprep.mubr.bf16.mxu0 %v5917_v0  ;;  %773 = vmatprep.mubr.bf16.mxu1 %v5917_v0 }
  0xbc   : > { %2205 = vmatpush1.bf16.msra.mxu1 %v5125_v44  ;;  %v369_v44 = vld [vmem:[%s6172_s8 + $0xb0] sm:$0xff] }
  0xbd   : > { %2206 = vmatprep.subr.bf16.mxu1 %v5130_v45  ;;  %v370_v45 = vld [vmem:[%s6172_s8 + $0xb8] sm:$0xff] }
  0xbe   : > { %v422_v48 = vpack.c.bf16 %v370_v45, %v369_v44 }
  0xc0   : > { %2207 = vmatpush1.bf16.msra.mxu1 %v5128_v50  ;;  %v371_v50 = vld [vmem:[%s6172_s8 + $0xc0] sm:$0xff] }
  0xc1   : > { %2208 = vmatprep.subr.bf16.mxu1 %v5133_v51  ;;  %v372_v51 = vld [vmem:[%s6172_s8 + $0xc8] sm:$0xff] }
  0xc2   : > { %614 = vmatmul.mubr.bf16.gmra.mrb[12].mxu0 %v414_v52  ;;  %774 = vmatmul.mubr.bf16.gmra.mrb[12].mxu1 %v430_v53  ;;  %v403_v52 = vld [vmem:[%s6172_s8 + $0x1c0] sm:$0xff]  ;;  %v404_v53 = vld [vmem:[%s6172_s8 + $0x1c8] sm:$0xff] }
  0xc3   : > { %623 = vmatprep.mubr.bf16.mxu0 %v5917_v0  ;;  %783 = vmatprep.mubr.bf16.mxu1 %v5917_v0 }
  0xc4   : > { %2209 = vmatpush1.bf16.msra.mxu1 %v5131_v54  ;;  %v423_v54 = vpack.c.bf16 %v372_v51, %v371_v50 }
  0xc5   : > { %2210 = vmatprep.subr.bf16.mxu1 %v5136_v55  ;;  %v439_v55 = vpack.c.bf16 %v404_v53, %v403_v52 }
  0xc8   : > { %2211 = vmatpush1.bf16.msra.mxu1 %v5134_v60  ;;  %v424_v60 = vpack.c.bf16 %v374_v57, %v373_v56 }
  0xc9   : > { %2212 = vmatprep.subr.bf16.mxu1 %v5139_v61  ;;  %v440_v61 = vpack.c.bf16 %v406_v59, %v405_v58 }
  0xca   : > { %624 = vmatmul.mubr.bf16.gmra.mrb[16].mxu0 %v415_v62  ;;  %784 = vmatmul.mubr.bf16.gmra.mrb[16].mxu1 %v431_v63  ;;  %v5151_v62 = vld [vmem:[#allocation7 + $0xc4] ss:$8 sps:$4 sm:$0xff]   ;;  %v5149_v63 = vld [vmem:[#allocation7 + $0xc0] ss:$8 sps:$4 sm:$0xff]  }
  0xcb   : > { %633 = vmatprep.mubr.bf16.mxu0 %v5917_v0  ;;  %793 = vmatprep.mubr.bf16.mxu1 %v5917_v0 }
  0xcc   : > { %2213 = vmatpush1.bf16.msra.mxu1 %v5137_v1  ;;  %v375_v1 = vld [vmem:[%s6172_s8 + $0xe0] sm:$0xff] }
  0xcd   : > { %2214 = vmatprep.subr.bf16.mxu1 %v5142_v2  ;;  %v376_v2 = vld [vmem:[%s6172_s8 + $0xe8] sm:$0xff] }
  0xd0   : > { %2215 = vmatpush1.bf16.msra.mxu1 %v5140_v7  ;;  %v425_v7 = vpack.c.bf16 %v376_v2, %v375_v1 }
  0xd1   : > { %2216 = vmatprep.subr.bf16.mxu1 %v5145_v8  ;;  %v441_v8 = vpack.c.bf16 %v408_v4, %v407_v3 }
  0xd2   : > { %634 = vmatmul.mubr.bf16.gmra.mrb[20].mxu0 %v416_v9  ;;  %794 = vmatmul.mubr.bf16.gmra.mrb[20].mxu1 %v432_v10  ;;  %v5157_v9 = vld [vmem:[#allocation7 + $0xe4] ss:$8 sps:$4 sm:$0xff]   ;;  %v5155_v10 = vld [vmem:[#allocation7 + $0xe0] ss:$8 sps:$4 sm:$0xff]  }
  0xd3   : > { %643 = vmatprep.mubr.bf16.mxu0 %v5917_v0  ;;  %803 = vmatprep.mubr.bf16.mxu1 %v5917_v0 }
  0xd4   : > { %2217 = vmatpush1.bf16.msra.mxu1 %v5143_v11  ;;  %v377_v11 = vld [vmem:[%s6172_s8 + $0xf0] sm:$0xff] }
  0xd5   : > { %2218 = vmatprep.subr.bf16.mxu1 %v5148_v12  ;;  %v378_v12 = vld [vmem:[%s6172_s8 + $0xf8] sm:$0xff]  ;;  %s5918_s8 = smov [#allocation10]  }
  0xd6   : > { %v426_v15 = vpack.c.bf16 %v378_v12, %v377_v11  ;;  %s5839_s30 = sshll.u32 %s5918_s8, 4  ;;  %s5840_s30 = int_to_ptr.vmem [resolvable:$false] %s5839_s30 }
  0xd7   : > { %s5841_s9 = scalar_lea.vmem %s5840_s30, 16384  ;;  %p5842_p12 = scmp.lt.s32.totalorder %s9622_s21, %s5840_s30 }
  0xd8   : > { %2219 = vmatpush1.bf16.msra.mxu1 %v5146_v17  ;;  %v5160_v17 = vld [vmem:[#allocation7 + $0xf4] ss:$8 sps:$4 sm:$0xff]   ;;  %p5843_p1 = scmp.lt.s32.totalorder %s5841_s9, %s5835_s11 }
  0xd9   : > { %2220 = vmatprep.subr.bf16.mxu1 %v5151_v62 }
  0xda   : > { %644 = vmatmul.mubr.bf16.gmra.mrb[24].mxu0 %v417_v18  ;;  %804 = vmatmul.mubr.bf16.gmra.mrb[24].mxu1 %v433_v19  ;;  %v5158_v18 = vld [vmem:[#allocation7 + $0xf0] ss:$8 sps:$4 sm:$0xff]   ;;  %v461_v19 = vlaneseq  ;;  %p5844_p2 = por %p5843_p1, %p5842_p12 }
  0xdb   : > { %653 = vmatprep.mubr.bf16.mxu0 %v5917_v0  ;;  %813 = vmatprep.mubr.bf16.mxu1 %v5917_v0 }
  0xdc   : > { %2221 = vmatpush1.bf16.msra.mxu1 %v5149_v63  ;;  %v462_v20 = vshrl.u32 %v461_v19, 7  ;;  %p5845_p4 = pnand %p5844_p2, %p5838_p7 }
  0xdd   : > { %2222 = vmatprep.subr.bf16.mxu1 %v5154_v5 }
  0xde   : > { %v6282_v21 = vsub.s32 0, %v462_v20  ;;  %v6287_v22 = vsub.s32 1, %v462_v20 }
  0xe0   : > { %2223 = vmatpush1.bf16.msra.mxu1 %v5152_v6  ;;  %9725 = vst [vmem:[#allocation16_spill] sm:$0xff] %v6282_v21  ;;  %9726 = vst [vmem:[#allocation17_spill] sm:$0xff] %v6287_v22 }
  0xe1   : > { %2224 = vmatprep.subr.bf16.mxu1 %v5157_v9 }
  0xe2   : > { %654 = vmatmul.mubr.bf16.gmra.mrb[28].mxu0 %v418_v24  ;;  %814 = vmatmul.mubr.bf16.gmra.mrb[28].mxu1 %v434_v25 }
  0xe3   : > { %663 = vmatprep.mubr.bf16.mxu0 %v5917_v0  ;;  %823 = vmatprep.mubr.bf16.mxu1 %v5917_v0 }
  0xe4   : > { %2225 = vmatpush1.bf16.msra.mxu1 %v5155_v10 }
  0xe5   : > { %2226 = vmatprep.subr.bf16.mxu1 %v5160_v17 }
  0xe8   : > { %2227 = vmatpush1.bf16.msra.mxu1 %v5158_v18 }
  0xea   : > { %664 = vmatmul.mubr.bf16.gmra.mrb[32].mxu0 %v419_v30  ;;  %824 = vmatmul.mubr.bf16.gmra.mrb[32].mxu1 %v435_v31 }
  0xeb   : > { %673 = vmatprep.mubr.bf16.mxu0 %v5917_v0  ;;  %833 = vmatprep.mubr.bf16.mxu1 %v5917_v0 }
  0xf2   : > { %674 = vmatmul.mubr.bf16.gmra.mrb[36].mxu0 %v420_v36  ;;  %834 = vmatmul.mubr.bf16.gmra.mrb[36].mxu1 %v436_v37 }
  0xf3   : > { %683 = vmatprep.mubr.bf16.mxu0 %v5917_v0  ;;  %843 = vmatprep.mubr.bf16.mxu1 %v5917_v0 }
  0xfa   : > { %684 = vmatmul.mubr.bf16.gmra.mrb[40].mxu0 %v421_v42  ;;  %844 = vmatmul.mubr.bf16.gmra.mrb[40].mxu1 %v437_v43 }
  0xfb   : > { %693 = vmatprep.mubr.bf16.mxu0 %v5917_v0  ;;  %853 = vmatprep.mubr.bf16.mxu1 %v5917_v0 }
 0x102   : > { %694 = vmatmul.mubr.bf16.gmra.mrb[44].mxu0 %v422_v48  ;;  %854 = vmatmul.mubr.bf16.gmra.mrb[44].mxu1 %v438_v49 }
 0x103   : > { %703 = vmatprep.mubr.bf16.mxu0 %v5917_v0  ;;  %863 = vmatprep.mubr.bf16.mxu1 %v5917_v0 }
 0x10a   : > { %704 = vmatmul.mubr.bf16.gmra.mrb[48].mxu0 %v423_v54  ;;  %864 = vmatmul.mubr.bf16.gmra.mrb[48].mxu1 %v439_v55 }
 0x10b   : > { %713 = vmatprep.mubr.bf16.mxu0 %v5917_v0  ;;  %873 = vmatprep.mubr.bf16.mxu1 %v5917_v0 }
 0x112   : > { %714 = vmatmul.mubr.bf16.gmra.mrb[52].mxu0 %v424_v60  ;;  %874 = vmatmul.mubr.bf16.gmra.mrb[52].mxu1 %v440_v61 }
 0x113   : > { %723 = vmatprep.mubr.bf16.mxu0 %v5917_v0  ;;  %883 = vmatprep.mubr.bf16.mxu1 %v5917_v0 }
 0x11a   : > { %724 = vmatmul.mubr.bf16.gmra.mrb[56].mxu0 %v425_v7  ;;  %884 = vmatmul.mubr.bf16.gmra.mrb[56].mxu1 %v441_v8 }
 0x11b   : > { %733 = vmatprep.mubr.bf16.mxu0 %v5917_v0  ;;  %893 = vmatprep.mubr.bf16.mxu1 %v5917_v0  ;;  %v459_v0 = vld [vmem:[%s9670_s2] sm:$0x3] }
 0x11c   : > { %v6290_v23 = vrot.slane %v459_v0, %v6282_v21  ;;  %v6293_v25 = vrot.slane %v459_v0, %v6287_v22 }
 0x122   : > { %734 = vmatmul.mubr.bf16.gmra.mrb[60].mxu0 %v426_v15  ;;  %894 = vmatmul.mubr.bf16.gmra.mrb[60].mxu1 %v442_v16 }
 0x17d   : > { %v585_v24 = vpop.f32.mrb[0].mxu0  ;;  %v745_v26 = vpop.f32.mrb[0].mxu1 }
 0x17e   : > { %v587_v27 = vpop.f32.mrb[1].mxu0  ;;  %v746_v28 = vadd.f32 %v745_v26, %v6290_v23  ;;  %v747_v29 = vpop.f32.mrb[1].mxu1  ;;  %v586_v33 = vadd.f32 %v585_v24, %v6290_v23 }
 0x17f   : > { %v589_v30 = vpop.f32.mrb[2].mxu0  ;;  %v748_v31 = vadd.f32 %v747_v29, %v6293_v25  ;;  %v749_v32 = vpop.f32.mrb[2].mxu1  ;;  %v588_v38 = vadd.f32 %v587_v27, %v6293_v25 }
 0x180   : > { %v590_v34 = vadd.f32 %v589_v30, %v6290_v23  ;;  %v591_v35 = vpop.f32.mrb[3].mxu0  ;;  %v750_v36 = vadd.f32 %v749_v32, %v6290_v23  ;;  %v751_v37 = vpop.f32.mrb[3].mxu1  ;;  %v6332_v4 = vmul.f32 0.5, %v586_v33  ;;  %v6336_v7 = vmul.f32 0.5, %v746_v28 }
 0x181   : > { %v6302_v39 = vadd.f32 %v591_v35, %v6293_v25  ;;  %v6305_v40 = vadd.f32 %v751_v37, %v6293_v25  ;;  %v6338_v8 = vmul.f32 0.5, %v588_v38  ;;  %v6342_v16 = vmul.f32 0.5, %v748_v31 }
 0x182   : > { %v904_v41 = vpack.c.bf16 %v590_v34, %v586_v33  ;;  %v6307_v42 = vpack.c.bf16 %v750_v36, %v746_v28  ;;  %9727 = vst [vmem:[#allocation18_spill] sm:$0xff] %v6336_v7  ;;  %v6340_v12 = vmul.f32 0.5, %v590_v34  ;;  %v6345_v20 = vmul.f32 0.5, %v750_v36 }
 0x183   : > { %v905_v43 = vpack.c.bf16 %v6302_v39, %v588_v38  ;;  %v6311_v44 = vpack.c.bf16 %v6305_v40, %v748_v31  ;;  %9728 = vst [vmem:[#allocation19_spill] sm:$0xff] %v6342_v16 }
 0x184   : > { %v1032_v45 = vmul.bf16 1027030327, %v904_v41  ;;  %v968_v53 = vmul.bf16 1061961548, %v904_v41  ;;  %v1064_v19 = vmul.bf16 1027030327, %v6307_v42 }
 0x185   : > { %v1033_v46 = vmul.bf16 1027030327, %v905_v43  ;;  %v595_v47 = vpop.f32.mrb[4].mxu0  ;;  %v6313_v52 = vpop.f32.mrb[4].mxu1  ;;  %v969_v59 = vmul.bf16 1061961548, %v905_v43 }
 0x186   : > { %v1096_v48 = vmul.bf16 %v1032_v45, %v904_v41  ;;  %v597_v49 = vpop.f32.mrb[5].mxu0  ;;  %v596_v55 = vadd.f32 %v595_v47, %v6290_v23  ;;  %v6319_v58 = vpop.f32.mrb[5].mxu1  ;;  %9729 = vst [vmem:[#allocation20_spill] sm:$0xff] %v6345_v20  ;;  %v6364_v38 = vmul.bf16 %v1064_v19, %v6307_v42  ;;  %v1065_v41 = vmul.bf16 1027030327, %v6311_v44 }
 0x187   : > { %v1097_v50 = vmul.bf16 %v1033_v46, %v905_v43  ;;  %v599_v51 = vpop.f32.mrb[6].mxu0  ;;  %v6322_v61 = vadd.f32 %v597_v49, %v6293_v25  ;;  %v6327_v63 = vpop.f32.mrb[6].mxu1  ;;  %v1547_v43 = vmul.f32 0.5, %v6302_v39  ;;  %v6371_v47 = vmul.f32 0.5, %v6305_v40 }
 0x188   : > { %v1160_v54 = vadd.bf16 1065369472, %v1096_v48  ;;  %v6317_v56 = vadd.f32 %v599_v51, %v6290_v23  ;;  %v601_v57 = vpop.f32.mrb[7].mxu0  ;;  %v6330_v3 = vpop.f32.mrb[7].mxu1  ;;  %v1001_v51 = vmul.bf16 1061961548, %v6311_v44  ;;  %v1129_v40 = vmul.bf16 %v1065_v41, %v6311_v44 }
 0x189   : > { %v1161_v60 = vadd.bf16 1065369472, %v1097_v50  ;;  %v6325_v62 = vadd.f32 %v601_v57, %v6293_v25  ;;  %9730 = vst [vmem:[#allocation21_spill] sm:$0xff] %v6371_v47  ;;  %v1000_v50 = vmul.bf16 1061961548, %v6307_v42 }
 0x18a   : > { %v1224_v1 = vmul.bf16 %v1160_v54, %v968_v53  ;;  %v906_v2 = vpack.c.bf16 %v6317_v56, %v596_v55  ;;  %v6376_v53 = vmul.f32 0.5, %v596_v55 }
 0x18b   : > { %v1225_v5 = vmul.bf16 %v1161_v60, %v969_v59  ;;  %v907_v6 = vpack.c.bf16 %v6325_v62, %v6322_v61 }
 0x18c   : > { %v1288_v9 = vunpack.c.l.bf16 %v1224_v1  ;;  %v1290_v10 = vunpack.c.h.bf16 %v1224_v1  ;;  %v1034_v11 = vmul.bf16 1027030327, %v906_v2  ;;  %v970_v24 = vmul.bf16 1061961548, %v906_v2 }
 0x18d   : > { %v1291_v13 = vunpack.c.h.bf16 %v1225_v5  ;;  %v1035_v14 = vmul.bf16 1027030327, %v907_v6  ;;  %v605_v15 = vpop.f32.mrb[8].mxu0  ;;  %v1289_v0 = vunpack.c.l.bf16 %v1225_v5  ;;  %v971_v32 = vmul.bf16 1061961548, %v907_v6 }
 0x18e   : > { %5209 = vtanh.f32 %v1288_v9  ;;  %v1098_v17 = vmul.bf16 %v1034_v11, %v906_v2  ;;  %v607_v18 = vpop.f32.mrb[9].mxu0  ;;  %v6348_v29 = vadd.f32 %v605_v15, %v6290_v23  ;;  %v1192_v1 = vadd.bf16 1065369472, %v6364_v38 }
 0x18f   : > { %5211 = vtanh.f32 %v1290_v10  ;;  %v1099_v26 = vmul.bf16 %v1035_v14, %v907_v6  ;;  %v609_v27 = vpop.f32.mrb[10].mxu0  ;;  %v6354_v34 = vadd.f32 %v607_v18, %v6293_v25 }
 0x190   : > { %5213 = vtanh.f32 %v1291_v13  ;;  %v1162_v28 = vadd.bf16 1065369472, %v1098_v17  ;;  %v6351_v30 = vadd.f32 %v609_v27, %v6290_v23  ;;  %v611_v31 = vpop.f32.mrb[11].mxu0 }
 0x191   : > { %v1163_v33 = vadd.bf16 1065369472, %v1099_v26  ;;  %v6357_v35 = vadd.f32 %v611_v31, %v6293_v25  ;;  %5215 = vtanh.f32 %v1289_v0  ;;  %v6392_v0 = vpop.f32.mrb[8].mxu1  ;;  %v1193_v31 = vadd.bf16 1065369472, %v1129_v40 }
 0x192   : > { %v6359_v36 = vmul.bf16 %v1162_v28, %v970_v24  ;;  %v908_v37 = vpack.c.bf16 %v6351_v30, %v6348_v29  ;;  %9731 = vst [vmem:[#allocation22_spill] sm:$0xff] %v6392_v0  ;;  %v1551_v40 = vmul.f32 0.5, %v6325_v62 }
 0x193   : > { %v1227_v45 = vmul.bf16 %v1163_v33, %v971_v32  ;;  %v909_v46 = vpack.c.bf16 %v6357_v35, %v6354_v34  ;;  %v6398_v32 = vpop.f32.mrb[9].mxu1 }
 0x194   : > { %v1294_v48 = vunpack.c.h.bf16 %v6359_v36  ;;  %v1036_v49 = vmul.bf16 1027030327, %v908_v37  ;;  %v972_v5 = vmul.bf16 1061961548, %v908_v37  ;;  %9732 = vst [vmem:[#allocation23_spill] sm:$0xff] %v6398_v32 }
 0x195   : > { %v1295_v54 = vunpack.c.h.bf16 %v1227_v45  ;;  %v1037_v57 = vmul.bf16 1027030327, %v909_v46  ;;  %v615_v59 = vpop.f32.mrb[12].mxu0  ;;  %v1293_v2 = vunpack.c.l.bf16 %v1227_v45  ;;  %v973_v55 = vmul.bf16 1061961548, %v909_v46  ;;  %v6407_v45 = vpop.f32.mrb[10].mxu1 }
 0x196   : > { %5217 = vtanh.f32 %v1294_v48  ;;  %v1100_v39 = vmul.bf16 %v1036_v49, %v908_v37  ;;  %v617_v60 = vpop.f32.mrb[13].mxu0  ;;  %v6381_v11 = vadd.f32 %v615_v59, %v6290_v23  ;;  %9733 = vst [vmem:[#allocation24_spill] sm:$0xff] %v6407_v45  ;;  %v6413_v48 = vmul.f32 0.5, %v6322_v61 }
 0x197   : > { %5219 = vtanh.f32 %v1295_v54  ;;  %v1101_v6 = vmul.bf16 %v1037_v57, %v909_v46  ;;  %v619_v42 = vpop.f32.mrb[14].mxu0  ;;  %v6387_v44 = vadd.f32 %v617_v60, %v6293_v25  ;;  %v1550_v49 = vmul.f32 0.5, %v6317_v56 }
 0x198   : > { %v5210_v9 = vpop.eup %5209  ;;  %v1164_v10 = vadd.bf16 1065369472, %v1100_v39  ;;  %v6384_v13 = vadd.f32 %v619_v42, %v6290_v23  ;;  %v621_v14 = vpop.f32.mrb[15].mxu0  ;;  %5221 = vtanh.f32 %v1293_v2 }
 0x199   : > { %v5212_v15 = vpop.eup %5211  ;;  %v1672_v17 = vadd.f32 1.0, %v5210_v9  ;;  %v1165_v18 = vadd.bf16 1065369472, %v1101_v6  ;;  %v6390_v19 = vadd.f32 %v621_v14, %v6293_v25  ;;  %v6425_v9 = vmul.bf16 %v1192_v1, %v1000_v50 }
 0x19a   : > { %v5214_v24 = vpop.eup %5213  ;;  %v1674_v26 = vadd.f32 1.0, %v5212_v15  ;;  %v6394_v27 = vmul.bf16 %v1164_v10, %v972_v5  ;;  %v910_v28 = vpack.c.bf16 %v6384_v13, %v6381_v11 }
 0x19b   : > { %v6401_v33 = vmul.f32 %v1672_v17, %v6332_v4  ;;  %v1675_v37 = vadd.f32 1.0, %v5214_v24  ;;  %v6403_v38 = vmul.bf16 %v1165_v18, %v973_v55  ;;  %v911_v41 = vpack.c.bf16 %v6390_v19, %v6387_v44  ;;  %v6417_v4 = vpop.f32.mrb[11].mxu1  ;;  %v5216_v56 = vpop.eup %5215  ;;  %9735 = vst [vmem:[#allocation26_spill] sm:$0xff] %v6425_v9 }
 0x19c   : > { %v6410_v46 = vmul.f32 %v1674_v26, %v6340_v12  ;;  %v1298_v54 = vunpack.c.h.bf16 %v6394_v27  ;;  %9734 = vst [vmem:[#allocation25_spill] sm:$0xff] %v6417_v4  ;;  %v1038_v39 = vmul.bf16 1027030327, %v910_v28  ;;  %v974_v55 = vmul.bf16 1061961548, %v910_v28 }
 0x19d   : > { %v6419_v57 = vmul.f32 %v1675_v37, %v1547_v43  ;;  %v1299_v59 = vunpack.c.h.bf16 %v6403_v38  ;;  %v625_v60 = vpop.f32.mrb[16].mxu0  ;;  %v1039_v61 = vmul.bf16 1027030327, %v911_v41  ;;  %v6427_v43 = vmul.bf16 %v1193_v31, %v1001_v51 }
 0x19e   : > { %5223 = vtanh.f32 %v1298_v54  ;;  %v627_v5 = vpop.f32.mrb[17].mxu0  ;;  %v1102_v6 = vmul.bf16 %v1038_v39, %v910_v28  ;;  %v6430_v2 = vadd.f32 %v625_v60, %v6290_v23  ;;  %v975_v1 = vmul.bf16 1061961548, %v911_v41 }
 0x19f   : > { %5225 = vtanh.f32 %v1299_v59  ;;  %v629_v42 = vpop.f32.mrb[18].mxu0  ;;  %9736 = vst [vmem:[#allocation27_spill] sm:$0xff] %v6427_v43  ;;  %v1103_v14 = vmul.bf16 %v1039_v61, %v911_v41  ;;  %v6436_v26 = vadd.f32 %v627_v5, %v6293_v25  ;;  %v1673_v39 = vadd.f32 1.0, %v5216_v56 }
 0x1a0   : > { %v5218_v10 = vpop.eup %5217  ;;  %v6433_v15 = vadd.f32 %v629_v42, %v6290_v23  ;;  %v631_v62 = vpop.f32.mrb[19].mxu0  ;;  %v1166_v24 = vadd.bf16 1065369472, %v1102_v6  ;;  %v6452_v61 = vmul.f32 0.5, %v6348_v29  ;;  %v6457_v6 = vmul.f32 0.5, %v6354_v34 }
 0x1a1   : > { %v5220_v17 = vpop.eup %5219  ;;  %v1678_v18 = vadd.f32 1.0, %v5218_v10  ;;  %v6439_v50 = vadd.f32 %v631_v62, %v6293_v25  ;;  %v1167_v28 = vadd.bf16 1065369472, %v1103_v14  ;;  %v1555_v14 = vmul.f32 0.5, %v6357_v35 }
 0x1a2   : > { %v1679_v51 = vadd.f32 1.0, %v5220_v17  ;;  %v912_v31 = vpack.c.bf16 %v6433_v15, %v6430_v2  ;;  %v6445_v54 = vmul.bf16 %v1166_v24, %v974_v55  ;;  %v5222_v17 = vpop.eup %5221  ;;  %v1801_v34 = vmul.f32 %v1673_v39, %v6338_v8 }
 0x1a3   : > { %v6443_v37 = vmul.f32 %v1678_v18, %v1550_v49  ;;  %v913_v59 = vpack.c.bf16 %v6439_v50, %v6436_v26  ;;  %v6454_v5 = vmul.bf16 %v1167_v28, %v975_v1  ;;  %v1554_v49 = vmul.f32 0.5, %v6351_v30 }
 0x1a4   : > { %v6449_v60 = vmul.f32 %v1679_v51, %v1551_v40  ;;  %v1040_v41 = vmul.bf16 1027030327, %v912_v31  ;;  %v1302_v42 = vunpack.c.h.bf16 %v6445_v54  ;;  %v976_v18 = vmul.bf16 1061961548, %v912_v31 }
 0x1a5   : > { %v1041_v10 = vmul.bf16 1027030327, %v913_v59  ;;  %v635_v55 = vpop.f32.mrb[20].mxu0  ;;  %v1303_v40 = vunpack.c.h.bf16 %v6454_v5  ;;  %v977_v29 = vmul.bf16 1061961548, %v913_v59 }
 0x1a6   : > { %v1104_v56 = vmul.bf16 %v1040_v41, %v912_v31  ;;  %v637_v62 = vpop.f32.mrb[21].mxu0  ;;  %5227 = vtanh.f32 %v1302_v42  ;;  %v6466_v28 = vadd.f32 %v635_v55, %v6290_v23  ;;  %v1929_v31 = vpack.c.bf16 %v6419_v57, %v1801_v34  ;;  %v6487_v57 = vpop.f32.mrb[12].mxu1 }
 0x1a7   : > { %v1105_v24 = vmul.bf16 %v1041_v10, %v913_v59  ;;  %v639_v51 = vpop.f32.mrb[22].mxu0  ;;  %5229 = vtanh.f32 %v1303_v40  ;;  %9737 = vst [vmem:[#allocation28_spill] sm:$0xff] %v6487_v57 }
 0x1a8   : > { %v5224_v30 = vpop.eup %5223  ;;  %v1168_v1 = vadd.bf16 1065369472, %v1104_v56  ;;  %v6469_v35 = vadd.f32 %v639_v51, %v6290_v23  ;;  %v641_v41 = vpop.f32.mrb[23].mxu0  ;;  %2228 = vmatprep.mubr.bf16.mxu1 %v1929_v31  ;;  %v6482_v56 = vadd.f32 %v637_v62, %v6293_v25  ;;  %v1296_v62 = vunpack.c.l.bf16 %v6394_v27 }
 0x1a9   : > { %v5226_v12 = vpop.eup %5225  ;;  %v1682_v22 = vadd.f32 1.0, %v5224_v30  ;;  %v1169_v21 = vadd.bf16 1065369472, %v1105_v24  ;;  %v6485_v59 = vadd.f32 %v641_v41, %v6293_v25  ;;  %v1558_v24 = vmul.f32 0.5, %v6384_v13 }
 0x1aa   : > { %v1683_v42 = vadd.f32 1.0, %v5226_v12  ;;  %v6472_v10 = vmul.bf16 %v1168_v1, %v976_v18  ;;  %v914_v8 = vpack.c.bf16 %v6469_v35, %v6466_v28  ;;  %v1292_v12 = vunpack.c.l.bf16 %v6359_v36 }
 0x1ab   : > { %v6477_v55 = vmul.f32 %v1682_v22, %v1554_v49  ;;  %v6479_v40 = vmul.bf16 %v1169_v21, %v977_v29  ;;  %v9738_v21 = vpack.c.bf16 %v6410_v46, %v6401_v33  ;;  %v6497_v49 = vpop.f32.mrb[13].mxu1  ;;  %v915_v36 = vpack.c.bf16 %v6485_v59, %v6482_v56 }
 0x1ac   : > { %v6490_v18 = vmul.f32 %v1683_v42, %v1555_v14  ;;  %v1306_v22 = vunpack.c.h.bf16 %v6472_v10  ;;  %9739 = vst [vmem:[#allocation29_spill] sm:$0xff] %v6497_v49  ;;  %v1042_v34 = vmul.bf16 1027030327, %v914_v8  ;;  %v6503_v51 = vpop.f32.mrb[14].mxu1  ;;  %v1297_v13 = vunpack.c.l.bf16 %v6403_v38 }
 0x1ad   : > { %2229 = vmatmul.mubr.bf16.vlgmr.msra.gmra.mrb[64].mxu1 %v9738_v21  ;;  %v1307_v29 = vunpack.c.h.bf16 %v6479_v40  ;;  %v645_v14 = vpop.f32.mrb[24].mxu0  ;;  %9740 = vst [vmem:[#allocation30_spill] sm:$0xff] %v6503_v51  ;;  %v1559_v30 = vmul.f32 0.5, %v6390_v19  ;;  %v1677_v33 = vadd.f32 1.0, %v5222_v17  ;;  %v6507_v1 = vpop.f32.mrb[15].mxu1 }
 0x1ae   : > { %5231 = vtanh.f32 %v1306_v22  ;;  %v647_v46 = vpop.f32.mrb[25].mxu0  ;;  %9741 = vst [vmem:[#allocation31_spill] sm:$0xff] %v6507_v1  ;;  %v978_v27 = vmul.bf16 1061961548, %v914_v8  ;;  %v1106_v41 = vmul.bf16 %v1042_v34, %v914_v8  ;;  %v1043_v31 = vmul.bf16 1027030327, %v915_v36 }
 0x1af   : > { %5233 = vtanh.f32 %v1307_v29  ;;  %v649_v42 = vpop.f32.mrb[26].mxu0  ;;  %v979_v21 = vmul.bf16 1061961548, %v915_v36  ;;  %v1805_v39 = vmul.f32 %v1677_v33, %v6413_v48  ;;  %v6511_v7 = vadd.f32 %v645_v14, %v6290_v23 }
 0x1b0   : > { %5235 = vtanh.f32 %v1292_v12  ;;  %v651_v38 = vpop.f32.mrb[27].mxu0  ;;  %v5228_v16 = vpop.eup %5227  ;;  %v1170_v19 = vadd.bf16 1065369472, %v1106_v41  ;;  %v1107_v22 = vmul.bf16 %v1043_v31, %v915_v36  ;;  %v6514_v17 = vadd.f32 %v649_v42, %v6290_v23 }
 0x1b1   : > { %v6517_v29 = vadd.f32 %v651_v38, %v6293_v25  ;;  %v5230_v8 = vpop.eup %5229  ;;  %v1686_v34 = vadd.f32 1.0, %v5228_v16  ;;  %v1931_v1 = vpack.c.bf16 %v6449_v60, %v1805_v39  ;;  %v6521_v48 = vadd.f32 %v647_v46, %v6293_v25 }
 0x1b2   : > { %5237 = vtanh.f32 %v1297_v13  ;;  %v1687_v12 = vadd.f32 1.0, %v5230_v8  ;;  %v6523_v14 = vmul.bf16 %v1170_v19, %v978_v27  ;;  %v1171_v33 = vadd.bf16 1065369472, %v1107_v22 }
 0x1b3   : > { %v916_v36 = vpack.c.bf16 %v6514_v17, %v6511_v7  ;;  %v6527_v41 = vmul.f32 %v1686_v34, %v1558_v24  ;;  %v1301_v31 = vunpack.c.l.bf16 %v6454_v5  ;;  %2238 = vmatprep.mubr.bf16.mxu1 %v1931_v1  ;;  %v917_v16 = vpack.c.bf16 %v6517_v29, %v6521_v48 }
 0x1b4   : > { %v6534_v39 = vmul.f32 0.5, %v6381_v11  ;;  %v6536_v13 = vmul.f32 %v1687_v12, %v1559_v30  ;;  %v1310_v46 = vunpack.c.h.bf16 %v6523_v14  ;;  %v6539_v27 = vmul.bf16 %v1171_v33, %v979_v21 }
 0x1b5   : > { %v655_v42 = vpop.f32.mrb[28].mxu0  ;;  %v6542_v24 = vmul.f32 0.5, %v6387_v44  ;;  %v1562_v5 = vmul.f32 0.5, %v6433_v15  ;;  %v1044_v1 = vmul.bf16 1027030327, %v916_v36  ;;  %5239 = vtanh.f32 %v1296_v62 }
 0x1b6   : > { %v1563_v38 = vmul.f32 0.5, %v6439_v50  ;;  %5241 = vtanh.f32 %v1310_v46  ;;  %v1311_v11 = vunpack.c.h.bf16 %v6539_v27  ;;  %v1045_v19 = vmul.bf16 1027030327, %v917_v16  ;;  %v657_v30 = vpop.f32.mrb[29].mxu0 }
 0x1b7   : > { %v980_v8 = vmul.bf16 1061961548, %v916_v36  ;;  %v1108_v34 = vmul.bf16 %v1044_v1, %v916_v36  ;;  %v6548_v21 = vadd.f32 %v655_v42, %v6290_v23  ;;  %v659_v12 = vpop.f32.mrb[30].mxu0  ;;  %5243 = vtanh.f32 %v1301_v31  ;;  %v6554_v36 = vpop.f32.mrb[16].mxu1 }
 0x1b8   : > { %v5232_v22 = vpop.eup %5231  ;;  %5245 = vtanh.f32 %v1311_v11  ;;  %v1109_v15 = vmul.bf16 %v1045_v19, %v917_v16  ;;  %v6551_v62 = vadd.f32 %v659_v12, %v6290_v23  ;;  %v661_v50 = vpop.f32.mrb[31].mxu0  ;;  %v981_v51 = vmul.bf16 1061961548, %v917_v16  ;;  %9742 = vst [vmem:[#allocation32_spill] sm:$0xff] %v6554_v36 }
 0x1b9   : > { %v5234_v44 = vpop.eup %5233  ;;  %v1690_v33 = vadd.f32 1.0, %v5232_v22  ;;  %v1172_v49 = vadd.bf16 1065369472, %v1108_v34  ;;  %v6560_v19 = vpop.f32.mrb[17].mxu1  ;;  %v6567_v16 = vadd.f32 %v657_v30, %v6293_v25  ;;  %v6570_v34 = vadd.f32 %v661_v50, %v6293_v25 }
 0x1ba   : > { %v5236_v46 = vpop.eup %5235  ;;  %v1691_v60 = vadd.f32 1.0, %v5234_v44  ;;  %v1173_v31 = vadd.bf16 1065369472, %v1109_v15  ;;  %v918_v11 = vpack.c.bf16 %v6551_v62, %v6548_v21  ;;  %9743 = vst [vmem:[#allocation33_spill] sm:$0xff] %v6560_v19  ;;  %v6575_v44 = vmul.f32 0.5, %v6430_v2 }
 0x1bb   : > { %v6556_v42 = vmul.f32 %v1690_v33, %v1562_v5  ;;  %v1676_v1 = vadd.f32 1.0, %v5236_v46  ;;  %v6564_v4 = vmul.bf16 %v1172_v49, %v980_v8  ;;  %v6572_v5 = vpop.f32.mrb[18].mxu1  ;;  %v1300_v49 = vunpack.c.l.bf16 %v6445_v54 }
 0x1bc   : > { %v5238_v22 = vpop.eup %5237  ;;  %v6562_v12 = vmul.f32 %v1691_v60, %v1563_v38  ;;  %9744 = vst [vmem:[#allocation34_spill] sm:$0xff] %v6572_v5  ;;  %v6578_v15 = vmul.bf16 %v1173_v31, %v981_v51  ;;  %v6580_v38 = vpop.f32.mrb[19].mxu1  ;;  %v1046_v8 = vmul.bf16 1027030327, %v918_v11  ;;  %v919_v50 = vpack.c.bf16 %v6570_v34, %v6567_v16 }
 0x1bd   : > { %v1804_v33 = vmul.f32 %v1676_v1, %v6376_v53  ;;  %v1681_v46 = vadd.f32 1.0, %v5238_v22  ;;  %v665_v60 = vpop.f32.mrb[32].mxu0  ;;  %9745 = vst [vmem:[#allocation35_spill] sm:$0xff] %v6580_v38  ;;  %v1314_v30 = vunpack.c.h.bf16 %v6564_v4  ;;  %v1566_v2 = vmul.f32 0.5, %v6469_v35  ;;  %v6594_v20 = vpop.f32.mrb[20].mxu1 }
 0x1be   : > { %v667_v57 = vpop.f32.mrb[33].mxu0  ;;  %v1315_v53 = vunpack.c.h.bf16 %v6578_v15  ;;  %v1305_v22 = vunpack.c.l.bf16 %v6479_v40  ;;  %v1110_v54 = vmul.bf16 %v1046_v8, %v918_v11  ;;  %v1047_v38 = vmul.bf16 1027030327, %v919_v50  ;;  %9746 = vst [vmem:[#allocation36_spill] sm:$0xff] %v6594_v20 }
 0x1bf   : > { %v1930_v19 = vpack.c.bf16 %v6443_v37, %v1804_v33  ;;  %v1809_v51 = vmul.f32 %v1681_v46, %v6457_v6  ;;  %v669_v1 = vpop.f32.mrb[34].mxu0  ;;  %v5240_v31 = vpop.eup %5239  ;;  %5247 = vtanh.f32 %v1314_v30  ;;  %v982_v32 = vmul.bf16 1061961548, %v918_v11 }
 0x1c0   : > { %v671_v5 = vpop.f32.mrb[35].mxu0  ;;  %v5242_v36 = vpop.eup %5241  ;;  %5249 = vtanh.f32 %v1315_v53  ;;  %v1680_v35 = vadd.f32 1.0, %v5240_v31  ;;  %v1174_v0 = vadd.bf16 1065369472, %v1110_v54  ;;  %v1111_v47 = vmul.bf16 %v1047_v38, %v919_v50 }
 0x1c1   : > { %2239 = vmatmul.mubr.bf16.gmra.mrb[68].mxu1 %v1930_v19  ;;  %v1933_v45 = vpack.c.bf16 %v6490_v18, %v1809_v51  ;;  %v5244_v37 = vpop.eup %5243  ;;  %v1694_v33 = vadd.f32 1.0, %v5242_v36  ;;  %5251 = vtanh.f32 %v1300_v49  ;;  %v1567_v46 = vmul.f32 0.5, %v6485_v59  ;;  %v6600_v36 = vpop.f32.mrb[21].mxu1 }
 0x1c2   : > { %v5246_v6 = vpop.eup %5245  ;;  %v1808_v40 = vmul.f32 %v1680_v35, %v6452_v61  ;;  %v983_v30 = vmul.bf16 1061961548, %v919_v50  ;;  %v1685_v8 = vadd.f32 1.0, %v5244_v37  ;;  %v6598_v53 = vmul.bf16 %v1174_v0, %v982_v32  ;;  %9747 = vst [vmem:[#allocation37_spill] sm:$0xff] %v6600_v36  ;;  %v6608_v50 = vpop.f32.mrb[22].mxu1 }
 0x1c3   : > { %2248 = vmatprep.mubr.bf16.mxu1 %v1933_v45  ;;  %v6596_v19 = vmul.f32 %v1694_v33, %v1566_v2  ;;  %v1695_v18 = vadd.f32 1.0, %v5246_v6  ;;  %v1175_v11 = vadd.bf16 1065369472, %v1111_v47  ;;  %v1304_v38 = vunpack.c.l.bf16 %v6472_v10  ;;  %9748 = vst [vmem:[#allocation38_spill] sm:$0xff] %v6608_v50  ;;  %v6618_v51 = vpop.f32.mrb[23].mxu1 }
 0x1c4   : > { %v1932_v49 = vpack.c.bf16 %v6477_v55, %v1808_v40  ;;  %v1813_v45 = vmul.f32 %v1685_v8, %v6542_v24  ;;  %v6606_v61 = vadd.f32 %v665_v60, %v6290_v23  ;;  %v1318_v0 = vunpack.c.h.bf16 %v6598_v53  ;;  %9749 = vst [vmem:[#allocation39_spill] sm:$0xff] %v6618_v51 }
 0x1c5   : > { %v675_v59 = vpop.f32.mrb[36].mxu0  ;;  %v6610_v2 = vmul.f32 %v1695_v18, %v1567_v46  ;;  %v6613_v32 = vmul.bf16 %v1175_v11, %v983_v30  ;;  %v6616_v47 = vadd.f32 %v667_v57, %v6293_v25  ;;  %v6622_v24 = vadd.f32 %v669_v1, %v6290_v23 }
 0x1c6   : > { %v677_v10 = vpop.f32.mrb[37].mxu0  ;;  %v1935_v55 = vpack.c.bf16 %v6536_v13, %v1813_v45  ;;  %v6625_v60 = vadd.f32 %v671_v5, %v6293_v25  ;;  %5253 = vtanh.f32 %v1305_v22  ;;  %v6628_v54 = vmul.f32 0.5, %v6436_v26 }
 0x1c7   : > { %v679_v31 = vpop.f32.mrb[38].mxu0  ;;  %v6631_v35 = vmul.f32 0.5, %v6466_v28  ;;  %5255 = vtanh.f32 %v1318_v0  ;;  %v1319_v57 = vunpack.c.h.bf16 %v6613_v32  ;;  %v6635_v13 = vmul.f32 0.5, %v6482_v56 }
 0x1c8   : > { %v681_v37 = vpop.f32.mrb[39].mxu0  ;;  %v1570_v1 = vmul.f32 0.5, %v6514_v17  ;;  %v920_v5 = vpack.c.bf16 %v6622_v24, %v6606_v61  ;;  %v921_v26 = vpack.c.bf16 %v6625_v60, %v6616_v47  ;;  %v1308_v28 = vunpack.c.l.bf16 %v6523_v14 }
 0x1c9   : > { %2249 = vmatmul.mubr.bf16.gmra.mrb[72].mxu1 %v1932_v49  ;;  %v5248_v22 = vpop.eup %5247  ;;  %v1571_v33 = vmul.f32 0.5, %v6517_v29  ;;  %5257 = vtanh.f32 %v1319_v57  ;;  %v6645_v6 = vadd.f32 %v679_v31, %v6290_v23  ;;  %v6648_v40 = vadd.f32 %v675_v59, %v6290_v23 }
 0x1ca   : > { %2258 = vmatprep.mubr.bf16.mxu1 %v1935_v55  ;;  %v5250_v56 = vpop.eup %5249  ;;  %v1698_v46 = vadd.f32 1.0, %v5248_v22  ;;  %v1048_v17 = vmul.bf16 1027030327, %v920_v5  ;;  %5259 = vtanh.f32 %v1304_v38  ;;  %v1309_v8 = vunpack.c.l.bf16 %v6539_v27  ;;  %v6658_v38 = vpop.f32.mrb[24].mxu1 }
 0x1cb   : > { %v5252_v30 = vpop.eup %5251  ;;  %v1699_v18 = vadd.f32 1.0, %v5250_v56  ;;  %v1574_v14 = vmul.f32 0.5, %v6551_v62  ;;  %v1049_v11 = vmul.bf16 1027030327, %v921_v26  ;;  %v922_v0 = vpack.c.bf16 %v6645_v6, %v6648_v40  ;;  %9750 = vst [vmem:[#allocation40_spill] sm:$0xff] %v6658_v38 }
 0x1cc   : > { %v6652_v29 = vmul.f32 %v1698_v46, %v1570_v1  ;;  %v1684_v49 = vadd.f32 1.0, %v5252_v30  ;;  %v1112_v45 = vmul.bf16 %v1048_v17, %v920_v5  ;;  %v6663_v27 = vadd.f32 %v677_v10, %v6293_v25  ;;  %v6668_v1 = vpop.f32.mrb[25].mxu1 }
 0x1cd   : > { %v6656_v55 = vpop.f32.mrb[40].mxu0  ;;  %v6660_v59 = vmul.f32 %v1699_v18, %v1571_v33  ;;  %v1113_v31 = vmul.bf16 %v1049_v11, %v921_v26  ;;  %v6666_v62 = vadd.f32 %v681_v37, %v6293_v25  ;;  %9751 = vst [vmem:[#allocation41_spill] sm:$0xff] %v6668_v1  ;;  %v984_v56 = vmul.bf16 1061961548, %v920_v5  ;;  %v6673_v10 = vpop.f32.mrb[26].mxu1 }
 0x1ce   : > { %v687_v57 = vpop.f32.mrb[41].mxu0  ;;  %v1812_v22 = vmul.f32 %v1684_v49, %v6534_v39  ;;  %v1176_v46 = vadd.bf16 1065369472, %v1112_v45  ;;  %v1050_v17 = vmul.bf16 1027030327, %v922_v0  ;;  %5261 = vtanh.f32 %v1309_v8  ;;  %9752 = vst [vmem:[#allocation42_spill] sm:$0xff] %v6673_v10 }
 0x1cf   : > { %v985_v30 = vmul.bf16 1061961548, %v921_v26  ;;  %v1177_v51 = vadd.bf16 1065369472, %v1113_v31  ;;  %v923_v33 = vpack.c.bf16 %v6666_v62, %v6663_v27  ;;  %v689_v18 = vpop.f32.mrb[42].mxu0  ;;  %5263 = vtanh.f32 %v1308_v28  ;;  %v6678_v5 = vpop.f32.mrb[27].mxu1 }
 0x1d0   : > { %v5254_v11 = vpop.eup %5253  ;;  %v1934_v37 = vpack.c.bf16 %v6527_v41, %v1812_v22  ;;  %v6676_v38 = vmul.bf16 %v1176_v46, %v984_v56  ;;  %v1114_v1 = vmul.bf16 %v1050_v17, %v922_v0  ;;  %v691_v39 = vpop.f32.mrb[43].mxu0  ;;  %9753 = vst [vmem:[#allocation43_spill] sm:$0xff] %v6678_v5  ;;  %v1575_v26 = vmul.f32 0.5, %v6570_v34 }
 0x1d1   : > { %v5256_v49 = vpop.eup %5255  ;;  %v6681_v45 = vmul.bf16 %v1177_v51, %v985_v30  ;;  %v1689_v31 = vadd.f32 1.0, %v5254_v11  ;;  %v1051_v8 = vmul.bf16 1027030327, %v923_v33  ;;  %v986_v50 = vmul.bf16 1061961548, %v922_v0  ;;  %v6686_v5 = vpop.f32.mrb[28].mxu1 }
 0x1d2   : > { %v1702_v36 = vadd.f32 1.0, %v5256_v49  ;;  %2259 = vmatmul.mubr.bf16.gmra.mrb[76].mxu1 %v1934_v37  ;;  %v1322_v10 = vunpack.c.h.bf16 %v6676_v38  ;;  %v1178_v41 = vadd.bf16 1065369472, %v1114_v1  ;;  %v987_v46 = vmul.bf16 1061961548, %v923_v33  ;;  %9754 = vst [vmem:[#allocation44_spill] sm:$0xff] %v6686_v5 }
 0x1d3   : > { %v5258_v22 = vpop.eup %5257  ;;  %v1323_v56 = vunpack.c.h.bf16 %v6681_v45  ;;  %v1817_v28 = vmul.f32 %v1689_v31, %v6628_v54  ;;  %v1115_v17 = vmul.bf16 %v1051_v8, %v923_v33  ;;  %v6692_v49 = vpop.f32.mrb[29].mxu1  ;;  %v6698_v33 = vmul.f32 0.5, %v6511_v7 }
 0x1d4   : > { %v5260_v34 = vpop.eup %5259  ;;  %v6688_v51 = vmul.f32 %v1702_v36, %v1574_v14  ;;  %v1703_v30 = vadd.f32 1.0, %v5258_v22  ;;  %5265 = vtanh.f32 %v1322_v10  ;;  %v6690_v11 = vmul.bf16 %v1178_v41, %v986_v50  ;;  %9755 = vst [vmem:[#allocation45_spill] sm:$0xff] %v6692_v49  ;;  %v6695_v31 = vpop.f32.mrb[30].mxu1 }
 0x1d5   : > { %v695_v37 = vpop.f32.mrb[44].mxu0  ;;  %5267 = vtanh.f32 %v1323_v56  ;;  %v1937_v0 = vpack.c.bf16 %v6562_v12, %v1817_v28  ;;  %v1688_v1 = vadd.f32 1.0, %v5260_v34  ;;  %v1179_v20 = vadd.bf16 1065369472, %v1115_v17  ;;  %9756 = vst [vmem:[#allocation46_spill] sm:$0xff] %v6695_v31  ;;  %v6706_v8 = vpop.f32.mrb[31].mxu1 }
 0x1d6   : > { %v697_v54 = vpop.f32.mrb[45].mxu0  ;;  %v6701_v36 = vmul.f32 0.5, %v6521_v48  ;;  %v6703_v14 = vmul.f32 %v1703_v30, %v1575_v26  ;;  %v1326_v50 = vunpack.c.h.bf16 %v6690_v11  ;;  %9757 = vst [vmem:[#allocation47_spill] sm:$0xff] %v6706_v8  ;;  %v6709_v12 = vmul.f32 0.5, %v6548_v21 }
 0x1d7   : > { %v699_v10 = vpop.f32.mrb[46].mxu0  ;;  %2268 = vmatprep.mubr.bf16.mxu1 %v1937_v0  ;;  %v1816_v41 = vmul.f32 %v1688_v1, %v6575_v44  ;;  %v6712_v22 = vmul.bf16 %v1179_v20, %v987_v46  ;;  %v6715_v7 = vadd.f32 %v689_v18, %v6290_v23  ;;  %v6719_v26 = vadd.f32 %v6656_v55, %v6290_v23 }
 0x1d8   : > { %v701_v48 = vpop.f32.mrb[47].mxu0  ;;  %5269 = vtanh.f32 %v1326_v50  ;;  %v6722_v56 = vadd.f32 %v687_v57, %v6293_v25  ;;  %v6725_v21 = vadd.f32 %v691_v39, %v6293_v25  ;;  %v5262_v28 = vpop.eup %5261  ;;  %v1312_v44 = vunpack.c.l.bf16 %v6564_v4 }
 0x1d9   : > { %v1313_v20 = vunpack.c.l.bf16 %v6578_v15  ;;  %v1936_v18 = vpack.c.bf16 %v6556_v42, %v1816_v41  ;;  %v1327_v46 = vunpack.c.h.bf16 %v6712_v22  ;;  %v5264_v17 = vpop.eup %5263  ;;  %v1316_v34 = vunpack.c.l.bf16 %v6598_v53 }
 0x1da   : > { %v1693_v55 = vadd.f32 1.0, %v5262_v28  ;;  %v924_v57 = vpack.c.bf16 %v6715_v7, %v6719_v26  ;;  %v925_v39 = vpack.c.bf16 %v6725_v21, %v6722_v56  ;;  %v1317_v30 = vunpack.c.l.bf16 %v6613_v32 }
 0x1db   : > { %v1578_v4 = vmul.f32 0.5, %v6622_v24  ;;  %2269 = vmatmul.mubr.bf16.gmra.mrb[80].mxu1 %v1936_v18  ;;  %5271 = vtanh.f32 %v1327_v46  ;;  %v1692_v15 = vadd.f32 1.0, %v5264_v17  ;;  %v1579_v42 = vmul.f32 0.5, %v6625_v60 }
 0x1dc   : > { %v1821_v0 = vmul.f32 %v1693_v55, %v6635_v13  ;;  %v1052_v1 = vmul.bf16 1027030327, %v924_v57  ;;  %v6741_v53 = vadd.f32 %v695_v37, %v6290_v23  ;;  %v988_v41 = vmul.bf16 1061961548, %v924_v57 }
 0x1dd   : > { %v1820_v50 = vmul.f32 %v1692_v15, %v6631_v35  ;;  %v1053_v28 = vmul.bf16 1027030327, %v925_v39  ;;  %5273 = vtanh.f32 %v1313_v20  ;;  %v6744_v8 = vpop.f32.mrb[48].mxu0  ;;  %v6748_v60 = vadd.f32 %v699_v10, %v6290_v23 }
 0x1de   : > { %v5266_v32 = vpop.eup %5265  ;;  %v1939_v24 = vpack.c.bf16 %v6610_v2, %v1821_v0  ;;  %v1116_v18 = vmul.bf16 %v1052_v1, %v924_v57  ;;  %5275 = vtanh.f32 %v1312_v44  ;;  %v6750_v13 = vpop.f32.mrb[49].mxu0  ;;  %v989_v35 = vmul.bf16 1061961548, %v925_v39 }
 0x1df   : > { %v5268_v46 = vpop.eup %5267  ;;  %v1706_v37 = vadd.f32 1.0, %v5266_v32  ;;  %v1938_v17 = vpack.c.bf16 %v6596_v19, %v1820_v50  ;;  %v1117_v55 = vmul.bf16 %v1053_v28, %v925_v39  ;;  %v709_v15 = vpop.f32.mrb[50].mxu0  ;;  %v6754_v49 = vadd.f32 %v697_v54, %v6293_v25  ;;  %v5161_v19 = vld [vmem:[#allocation8] ss:$8 sps:$4 sm:$0xff]   ;;  %v5163_v39 = vld [vmem:[#allocation8 + $0x4] ss:$8 sps:$4 sm:$0xff]  }
 0x1e0   : > { %v1707_v20 = vadd.f32 1.0, %v5268_v46  ;;  %2278 = vmatprep.mubr.bf16.mxu1 %v1939_v24  ;;  %v1180_v31 = vadd.bf16 1065369472, %v1116_v18  ;;  %v926_v2 = vpack.c.bf16 %v6748_v60, %v6741_v53  ;;  %v6758_v10 = vpop.f32.mrb[51].mxu0  ;;  %v6763_v0 = vadd.f32 %v701_v48, %v6293_v25  ;;  %v6772_v24 = vpop.f32.mrb[32].mxu1  ;;  %3841 = vmatprep.subr.bf16.mxu0 %v5163_v39 }
 0x1e1   : > { %v6760_v44 = vmul.f32 %v1706_v37, %v1578_v4  ;;  %v1181_v57 = vadd.bf16 1065369472, %v1117_v55  ;;  %5277 = vtanh.f32 %v1317_v30  ;;  %v6766_v50 = vmul.f32 0.5, %v6567_v16  ;;  %9758 = vst [vmem:[#allocation48_spill] sm:$0xff] %v6772_v24  ;;  %v6779_v46 = vpop.f32.mrb[33].mxu1  ;;  %3842 = vmatpush1.bf16.msra.mxu0 %v5161_v19 }
 0x1e2   : > { %v5270_v1 = vpop.eup %5269  ;;  %v6768_v54 = vmul.f32 %v1707_v20, %v1579_v42  ;;  %v6770_v28 = vmul.bf16 %v1180_v31, %v988_v41  ;;  %v1054_v32 = vmul.bf16 1027030327, %v926_v2  ;;  %v1582_v4 = vmul.f32 0.5, %v6645_v6  ;;  %9759 = vst [vmem:[#allocation49_spill] sm:$0xff] %v6779_v46  ;;  %v6787_v6 = vpop.f32.mrb[34].mxu1 }
 0x1e3   : > { %v1710_v18 = vadd.f32 1.0, %v5270_v1  ;;  %2279 = vmatmul.mubr.bf16.gmra.mrb[84].mxu1 %v1938_v17  ;;  %v6775_v48 = vmul.bf16 %v1181_v57, %v989_v35  ;;  %v927_v30 = vpack.c.bf16 %v6763_v0, %v6754_v49  ;;  %v6782_v16 = vmul.f32 0.5, %v6606_v61  ;;  %9760 = vst [vmem:[#allocation50_spill] sm:$0xff] %v6787_v6 }
 0x1e4   : > { %v1330_v31 = vunpack.c.h.bf16 %v6770_v28  ;;  %v1118_v42 = vmul.bf16 %v1054_v32, %v926_v2  ;;  %5279 = vtanh.f32 %v1316_v34  ;;  %v1583_v35 = vmul.f32 0.5, %v6666_v62 }
 0x1e5   : > { %v6785_v41 = vpop.f32.mrb[52].mxu0  ;;  %v5272_v37 = vpop.eup %5271  ;;  %v6789_v17 = vmul.f32 %v1710_v18, %v1582_v4  ;;  %v1331_v55 = vunpack.c.h.bf16 %v6775_v48  ;;  %v990_v20 = vmul.bf16 1061961548, %v926_v2  ;;  %v1055_v1 = vmul.bf16 1027030327, %v927_v30 }
 0x1e6   : > { %v6793_v57 = vpop.f32.mrb[53].mxu0  ;;  %v1711_v61 = vadd.f32 1.0, %v5272_v37  ;;  %5281 = vtanh.f32 %v1330_v31  ;;  %v1182_v39 = vadd.bf16 1065369472, %v1118_v42  ;;  %v6798_v19 = vmul.f32 0.5, %v6616_v47 }
 0x1e7   : > { %v6795_v34 = vpop.f32.mrb[54].mxu0  ;;  %v5274_v32 = vpop.eup %5273  ;;  %v6801_v4 = vmul.f32 0.5, %v6648_v40  ;;  %5283 = vtanh.f32 %v1331_v55  ;;  %v6804_v62 = vadd.f32 %v709_v15, %v6290_v23  ;;  %v1119_v6 = vmul.bf16 %v1055_v1, %v927_v30  ;;  %v5164_v1 = vld [vmem:[#allocation8 + $0x10] ss:$8 sps:$4 sm:$0xff]  }
 0x1e8   : > { %v6806_v2 = vpop.f32.mrb[55].mxu0  ;;  %v5276_v18 = vpop.eup %5275  ;;  %v6808_v37 = vmul.f32 %v1711_v61, %v1583_v35  ;;  %v1697_v31 = vadd.f32 1.0, %v5274_v32  ;;  %v6810_v42 = vmul.bf16 %v1182_v39, %v990_v20  ;;  %v1321_v46 = vunpack.c.l.bf16 %v6681_v45 }
 0x1e9   : > { %v1696_v47 = vadd.f32 1.0, %v5276_v18  ;;  %v9761_v24 = vunpack.c.h.bf16 %v6425_v9  ;;  %v6817_v40 = vadd.f32 %v6744_v8, %v6290_v23  ;;  %v991_v35 = vmul.bf16 1061961548, %v927_v30  ;;  %v6821_v32 = vpop.f32.mrb[35].mxu1 }
 0x1ea   : > { %v1825_v15 = vmul.f32 %v1697_v31, %v6701_v36  ;;  %v1334_v55 = vunpack.c.h.bf16 %v6810_v42  ;;  %v1183_v61 = vadd.bf16 1065369472, %v1119_v6  ;;  %9762 = vst [vmem:[#allocation51_spill] sm:$0xff] %v6821_v32  ;;  %v6824_v39 = vmul.f32 0.5, %v6663_v27  ;;  %v5166_v36 = vld [vmem:[#allocation8 + $0x14] ss:$8 sps:$4 sm:$0xff]  }
 0x1eb   : > { %5285 = vtanh.f32 %v9761_v24  ;;  %v5278_v20 = vpop.eup %5277  ;;  %v1824_v45 = vmul.f32 %v1696_v47, %v6698_v33  ;;  %v9763_v24 = vunpack.c.h.bf16 %v6427_v43  ;;  %v928_v8 = vpack.c.bf16 %v6804_v62, %v6817_v40  ;;  %v6831_v18 = vpop.f32.mrb[36].mxu1  ;;  %3843 = vmatprep.subr.bf16.mxu0 %v5166_v36 }
 0x1ec   : > { %9764 = vst [vmem:[#allocation52_spill] sm:$0xff] %v6831_v18  ;;  %v1941_v30 = vpack.c.bf16 %v6660_v59, %v1825_v15  ;;  %v6834_v6 = vmul.bf16 %v1183_v61, %v991_v35  ;;  %v1701_v31 = vadd.f32 1.0, %v5278_v20  ;;  %v6838_v9 = vpop.f32.mrb[37].mxu1  ;;  %v6843_v47 = vadd.f32 %v6750_v13, %v6293_v25  ;;  %3844 = vmatpush1.bf16.msra.mxu0 %v5164_v1 }
 0x1ed   : > { %5287 = vtanh.f32 %v9763_v24  ;;  %v6836_v27 = vpop.f32.mrb[56].mxu0  ;;  %9765 = vst [vmem:[#allocation53_spill] sm:$0xff] %v6838_v9  ;;  %v1940_v33 = vpack.c.bf16 %v6652_v29, %v1824_v45  ;;  %v1056_v24 = vmul.bf16 1027030327, %v928_v8  ;;  %v6847_v18 = vadd.f32 %v6758_v10, %v6293_v25  ;;  %v6851_v15 = vpop.f32.mrb[38].mxu1 }
 0x1ee   : > { %5289 = vtanh.f32 %v1334_v55  ;;  %v6849_v59 = vpop.f32.mrb[57].mxu0  ;;  %9766 = vst [vmem:[#allocation54_spill] sm:$0xff] %v6851_v15  ;;  %v5280_v55 = vpop.eup %5279  ;;  %v1320_v35 = vunpack.c.l.bf16 %v6676_v38  ;;  %2288 = vmatprep.mubr.bf16.mxu1 %v1941_v30  ;;  %v1335_v29 = vunpack.c.h.bf16 %v6834_v6  ;;  %v1829_v61 = vmul.f32 %v1701_v31, %v6766_v50 }
 0x1ef   : > { %5291 = vtanh.f32 %v1321_v46  ;;  %v6856_v13 = vpop.f32.mrb[58].mxu0  ;;  %2289 = vmatmul.mubr.bf16.gmra.mrb[88].mxu1 %v1940_v33  ;;  %v1700_v20 = vadd.f32 1.0, %v5280_v55  ;;  %v1120_v45 = vmul.bf16 %v1056_v24, %v928_v8  ;;  %v929_v36 = vpack.c.bf16 %v6847_v18, %v6843_v47 }
 0x1f0   : > { %v6861_v15 = vpop.f32.mrb[59].mxu0  ;;  %v5282_v38 = vpop.eup %5281  ;;  %v1586_v30 = vmul.f32 0.5, %v6715_v7  ;;  %v1587_v9 = vmul.f32 0.5, %v6725_v21  ;;  %5293 = vtanh.f32 %v1335_v29  ;;  %v1943_v50 = vpack.c.bf16 %v6703_v14, %v1829_v61  ;;  %v5167_v61 = vld [vmem:[#allocation8 + $0x20] ss:$8 sps:$4 sm:$0xff]  }
 0x1f1   : > { %v5284_v46 = vpop.eup %5283  ;;  %v1714_v1 = vadd.f32 1.0, %v5282_v38  ;;  %v1828_v31 = vmul.f32 %v1700_v20, %v6709_v12  ;;  %v992_v33 = vmul.bf16 1061961548, %v928_v8  ;;  %v1184_v55 = vadd.bf16 1065369472, %v1120_v45  ;;  %v6871_v7 = vpop.f32.mrb[39].mxu1 }
 0x1f2   : > { %v1715_v24 = vadd.f32 1.0, %v5284_v46  ;;  %2298 = vmatprep.mubr.bf16.mxu1 %v1943_v50  ;;  %v1057_v10 = vmul.bf16 1027030327, %v929_v36  ;;  %5295 = vtanh.f32 %v1320_v35  ;;  %v6869_v32 = vadd.f32 %v6313_v52, %v6290_v23  ;;  %9767 = vst [vmem:[#allocation55_spill] sm:$0xff] %v6871_v7  ;;  %v5169_v20 = vld [vmem:[#allocation8 + $0x24] ss:$8 sps:$4 sm:$0xff]  }
 0x1f3   : > { %v6874_v29 = vmul.f32 0.5, %v6719_v26  ;;  %v6876_v14 = vmul.f32 %v1714_v1, %v1586_v30  ;;  %v1942_v12 = vpack.c.bf16 %v6688_v51, %v1828_v31  ;;  %v6879_v8 = vmul.bf16 %v1184_v55, %v992_v33  ;;  %v6881_v45 = vpop.f32.mrb[40].mxu1  ;;  %3845 = vmatprep.subr.bf16.mxu0 %v5169_v20  ;;  %v9771_v55 = vld [vmem:[#allocation20_spill] sm:$0xff] }
 0x1f4   : > { %9768 = vst [vmem:[#allocation56_spill] sm:$0xff] %v6881_v45  ;;  %v6883_v35 = vmul.f32 %v1715_v24, %v1587_v9  ;;  %v1121_v38 = vmul.bf16 %v1057_v10, %v929_v36  ;;  %v6887_v50 = vadd.f32 %v6327_v63, %v6290_v23  ;;  %v6891_v30 = vpop.f32.mrb[41].mxu1  ;;  %v993_v1 = vmul.bf16 1061961548, %v929_v36  ;;  %3846 = vmatpush1.bf16.msra.mxu0 %v5167_v61 }
 0x1f5   : > { %v5286_v21 = vpop.eup %5285  ;;  %v6889_v26 = vpop.f32.mrb[60].mxu0  ;;  %9769 = vst [vmem:[#allocation57_spill] sm:$0xff] %v6891_v30  ;;  %v1338_v51 = vunpack.c.h.bf16 %v6879_v8  ;;  %v6896_v31 = vadd.f32 %v6319_v58, %v6293_v25  ;;  %v6900_v9 = vadd.f32 %v6330_v3, %v6293_v25  ;;  %v1325_v3 = vunpack.c.l.bf16 %v6712_v22 }
 0x1f6   : > { %v1738_v52 = vadd.f32 1.0, %v5286_v21  ;;  %v6902_v10 = vpop.f32.mrb[61].mxu0  ;;  %v6904_v63 = vpop.f32.mrb[42].mxu1  ;;  %v1185_v30 = vadd.bf16 1065369472, %v1121_v38  ;;  %v938_v36 = vpack.c.bf16 %v6887_v50, %v6869_v32  ;;  %v1590_v45 = vmul.f32 0.5, %v6748_v60 }
 0x1f7   : > { %v5288_v46 = vpop.eup %5287  ;;  %9770 = vst [vmem:[#allocation58_spill] sm:$0xff] %v6904_v63  ;;  %v6911_v58 = vpop.f32.mrb[62].mxu0  ;;  %2299 = vmatmul.mubr.bf16.gmra.mrb[92].mxu1 %v1942_v12  ;;  %5297 = vtanh.f32 %v1338_v51  ;;  %v9773_v38 = vld [vmem:[#allocation21_spill] sm:$0xff]  ;;  %v6926_v61 = vmul.f32 0.5, %v6741_v53  ;;  %v939_v12 = vpack.c.bf16 %v6900_v9, %v6896_v31  ;;  %v6937_v53 = vadd.f32 %v6785_v41, %v6290_v23 }
 0x1f8   : > { %v5290_v33 = vpop.eup %5289  ;;  %v6907_v24 = vmul.f32 %v1738_v52, %v9771_v55  ;;  %v1739_v21 = vadd.f32 1.0, %v5288_v46  ;;  %v6915_v20 = vpop.f32.mrb[63].mxu0  ;;  %v6918_v52 = vmul.f32 0.5, %v6722_v56  ;;  %v6923_v55 = vmul.bf16 %v1185_v30, %v993_v1 }
 0x1f9   : > { %v1718_v7 = vadd.f32 1.0, %v5290_v33  ;;  %v5292_v63 = vpop.eup %5291  ;;  %v1591_v33 = vmul.f32 0.5, %v6763_v0  ;;  %v1002_v43 = vmul.bf16 1061961548, %v938_v36  ;;  %v6943_v0 = vpop.f32.mrb[43].mxu1  ;;  %v6949_v41 = vmul.f32 0.5, %v6754_v49 }
 0x1fa   : > { %9772 = vst [vmem:[#allocation20_spill] sm:$0xff] %v6907_v24  ;;  %v6921_v46 = vmul.f32 %v1739_v21, %v9773_v38  ;;  %v1066_v24 = vmul.bf16 1027030327, %v938_v36  ;;  %v1705_v60 = vadd.f32 1.0, %v5292_v63  ;;  %v5294_v51 = vpop.eup %5293  ;;  %v1339_v56 = vunpack.c.h.bf16 %v6923_v55  ;;  %9775 = vst [vmem:[#allocation59_spill] sm:$0xff] %v6943_v0 }
 0x1fb   : > { %v6928_v22 = vmul.f32 %v1718_v7, %v1590_v45  ;;  %v1719_v38 = vadd.f32 1.0, %v5294_v51  ;;  %v1067_v7 = vmul.bf16 1027030327, %v939_v12  ;;  %v1003_v63 = vmul.bf16 1061961548, %v939_v12 }
 0x1fc   : > { %9774 = vst [vmem:[#allocation21_spill] sm:$0xff] %v6921_v46  ;;  %v1130_v21 = vmul.bf16 %v1066_v24, %v938_v36  ;;  %v1833_v30 = vmul.f32 %v1705_v60, %v6798_v19  ;;  %v5296_v45 = vpop.eup %5295  ;;  %5299 = vtanh.f32 %v1339_v56  ;;  %v6941_v46 = vadd.f32 %v6795_v34, %v6290_v23  ;;  %v5170_v56 = vld [vmem:[#allocation8 + $0x30] ss:$8 sps:$4 sm:$0xff]  }
 0x1fd   : > { %v6945_v5 = vmul.f32 %v1719_v38, %v1591_v33  ;;  %v1704_v19 = vadd.f32 1.0, %v5296_v45  ;;  %v1131_v36 = vmul.bf16 %v1067_v7, %v939_v12  ;;  %v6957_v34 = vadd.f32 %v6806_v2, %v6293_v25  ;;  %v6959_v33 = vpop.f32.mrb[44].mxu1 }
 0x1fe   : > { %v1194_v1 = vadd.bf16 1065369472, %v1130_v21  ;;  %v1945_v24 = vpack.c.bf16 %v6768_v54, %v1833_v30  ;;  %v930_v51 = vpack.c.bf16 %v6941_v46, %v6937_v53  ;;  %v5172_v21 = vld [vmem:[#allocation8 + $0x34] ss:$8 sps:$4 sm:$0xff]   ;;  %9777 = vst [vmem:[#allocation61_spill] sm:$0xff] %v6959_v33  ;;  %v6964_v49 = vadd.f32 %v6793_v57, %v6293_v25 }
 0x1ff   : > { %v1832_v54 = vmul.f32 %v1704_v19, %v6782_v16  ;;  %v1195_v12 = vadd.bf16 1065369472, %v1131_v36  ;;  %5301 = vtanh.f32 %v1325_v3  ;;  %3847 = vmatprep.subr.bf16.mxu0 %v5172_v21  ;;  %v6974_v16 = vmul.f32 0.5, %v6817_v40  ;;  %v9781_v40 = vld [vmem:[#allocation22_spill] sm:$0xff] }
 0x200   : > { %v6951_v60 = vmul.bf16 %v1194_v1, %v1002_v43  ;;  %2308 = vmatprep.mubr.bf16.mxu1 %v1945_v24  ;;  %v6966_v43 = vpop.f32.mrb[45].mxu1  ;;  %v1058_v7 = vmul.bf16 1027030327, %v930_v51  ;;  %v931_v3 = vpack.c.bf16 %v6957_v34, %v6964_v49  ;;  %3848 = vmatpush1.bf16.msra.mxu0 %v5170_v56  ;;  %v1594_v19 = vmul.f32 0.5, %v6804_v62  ;;  %v9784_v62 = vld [vmem:[#allocation23_spill] sm:$0xff] }
 0x201   : > { %9778 = vst [vmem:[#allocation62_spill] sm:$0xff] %v6966_v43  ;;  %v6971_v45 = vpop.f32.mrb[46].mxu1  ;;  %v5298_v1 = vpop.eup %5297  ;;  %v1944_v57 = vpack.c.bf16 %v6760_v44, %v1832_v54  ;;  %v6977_v24 = vmul.bf16 %v1195_v12, %v1003_v63  ;;  %v994_v2 = vmul.bf16 1061961548, %v930_v51  ;;  %v6985_v43 = vadd.f32 %v9781_v40, %v6290_v23 }
 0x202   : > { %9776 = vst [vmem:[#allocation60_spill] sm:$0xff] %v6951_v60  ;;  %v1358_v30 = vunpack.c.h.bf16 %v6951_v60  ;;  %9779 = vst [vmem:[#allocation63_spill] sm:$0xff] %v6971_v45  ;;  %v1722_v36 = vadd.f32 1.0, %v5298_v1  ;;  %v1122_v38 = vmul.bf16 %v1058_v7, %v930_v51  ;;  %v1059_v45 = vmul.bf16 1027030327, %v931_v3  ;;  %v7002_v1 = vpop.f32.mrb[47].mxu1 }
 0x203   : > { %9780 = vst [vmem:[#allocation64_spill] sm:$0xff] %v6977_v24  ;;  %2309 = vmatmul.mubr.bf16.gmra.mrb[96].mxu1 %v1944_v57  ;;  %v1359_v21 = vunpack.c.h.bf16 %v6977_v24  ;;  %v9783_v54 = vunpack.c.l.bf16 %v6690_v11  ;;  %v6993_v56 = vadd.f32 %v9784_v62, %v6293_v25  ;;  %v6996_v12 = vmul.f32 0.5, %v6843_v47  ;;  %9786 = vst [vmem:[#allocation23_spill] sm:$0xff] %v7002_v1  ;;  %v5173_v62 = vld [vmem:[#allocation8 + $0x40] ss:$8 sps:$4 sm:$0xff]  }
 0x204   : > { %5303 = vtanh.f32 %v1358_v30  ;;  %v6987_v44 = vmul.f32 %v1722_v36, %v1594_v19  ;;  %v1186_v63 = vadd.bf16 1065369472, %v1122_v38  ;;  %v1123_v51 = vmul.bf16 %v1059_v45, %v931_v3  ;;  %v9785_v30 = vld [vmem:[#allocation24_spill] sm:$0xff]  ;;  %v9787_v36 = vld [vmem:[#allocation25_spill] sm:$0xff] }
 0x205   : > { %5305 = vtanh.f32 %v9783_v54  ;;  %v7000_v7 = vadd.f32 %v9785_v30, %v6290_v23  ;;  %v995_v19 = vmul.bf16 1061961548, %v931_v3  ;;  %v7009_v40 = vadd.f32 %v9787_v36, %v6293_v25  ;;  %v7021_v36 = vpop.f32.mrb[48].mxu1 }
 0x206   : > { %9782 = vst [vmem:[#allocation22_spill] sm:$0xff] %v6987_v44  ;;  %5307 = vtanh.f32 %v1359_v21  ;;  %v5300_v57 = vpop.eup %5299  ;;  %v7005_v11 = vmul.bf16 %v1186_v63, %v994_v2  ;;  %v1595_v47 = vmul.f32 0.5, %v6847_v18  ;;  %v1187_v45 = vadd.bf16 1065369472, %v1123_v51  ;;  %v5175_v63 = vld [vmem:[#allocation8 + $0x44] ss:$8 sps:$4 sm:$0xff]  }
 0x207   : > { %v1723_v21 = vadd.f32 1.0, %v5300_v57  ;;  %v940_v54 = vpack.c.bf16 %v7000_v7, %v6985_v43  ;;  %v7016_v1 = vmul.f32 0.5, %v6869_v32  ;;  %v941_v3 = vpack.c.bf16 %v7009_v40, %v6993_v56  ;;  %9789 = vst [vmem:[#allocation25_spill] sm:$0xff] %v7021_v36  ;;  %v7028_v30 = vpop.f32.mrb[49].mxu1  ;;  %3849 = vmatprep.subr.bf16.mxu0 %v5175_v63 }
 0x208   : > { %v1342_v2 = vunpack.c.h.bf16 %v7005_v11  ;;  %v1614_v51 = vmul.f32 0.5, %v6887_v50  ;;  %v7026_v38 = vmul.bf16 %v1187_v45, %v995_v19  ;;  %9790 = vst [vmem:[#allocation65_spill] sm:$0xff] %v7028_v30  ;;  %v7034_v44 = vpop.f32.mrb[50].mxu1  ;;  %v7039_v50 = vadd.f32 %v6849_v59, %v6293_v25  ;;  %3850 = vmatpush1.bf16.msra.mxu0 %v5173_v62 }
 0x209   : > { %9788 = vst [vmem:[#allocation24_spill] sm:$0xff] %v7016_v1  ;;  %v5302_v18 = vpop.eup %5301  ;;  %v7023_v57 = vmul.f32 %v1723_v21, %v1595_v47  ;;  %v1068_v33 = vmul.bf16 1027030327, %v940_v54  ;;  %v7032_v1 = vadd.f32 %v6836_v27, %v6290_v23  ;;  %v1069_v0 = vmul.bf16 1027030327, %v941_v3  ;;  %9791 = vst [vmem:[#allocation66_spill] sm:$0xff] %v7034_v44 }
 0x20a   : > { %5309 = vtanh.f32 %v1342_v2  ;;  %v1709_v32 = vadd.f32 1.0, %v5302_v18  ;;  %v1343_v47 = vunpack.c.h.bf16 %v7026_v38  ;;  %v1004_v21 = vmul.bf16 1061961548, %v940_v54 }
 0x20b   : > { %v1132_v36 = vmul.bf16 %v1068_v33, %v940_v54  ;;  %v1005_v2 = vmul.bf16 1061961548, %v941_v3  ;;  %v1133_v18 = vmul.bf16 %v1069_v0, %v941_v3  ;;  %v7044_v27 = vadd.f32 %v6856_v13, %v6290_v23 }
 0x20c   : > { %v1837_v45 = vmul.f32 %v1709_v32, %v6824_v39  ;;  %5311 = vtanh.f32 %v1343_v47  ;;  %v7048_v33 = vadd.f32 %v6861_v15, %v6293_v25  ;;  %v1615_v59 = vmul.f32 0.5, %v6900_v9 }
 0x20d   : > { %v1196_v44 = vadd.bf16 1065369472, %v1132_v36  ;;  %v1197_v30 = vadd.bf16 1065369472, %v1133_v18  ;;  %v932_v39 = vpack.c.bf16 %v7044_v27, %v7032_v1  ;;  %v7061_v15 = vmul.f32 0.5, %v6896_v31 }
 0x20e   : > { %v5304_v19 = vpop.eup %5303  ;;  %v1947_v62 = vpack.c.bf16 %v6808_v37, %v1837_v45  ;;  %v933_v36 = vpack.c.bf16 %v7048_v33, %v7039_v50  ;;  %v5176_v18 = vld [vmem:[#allocation8 + $0x50] ss:$8 sps:$4 sm:$0xff]  }
 0x20f   : > { %v1742_v63 = vadd.f32 1.0, %v5304_v19  ;;  %v5306_v54 = vpop.eup %5305  ;;  %v7056_v32 = vmul.bf16 %v1196_v44, %v1004_v21  ;;  %9793 = vst [vmem:[#allocation68_spill] sm:$0xff] %v7061_v15  ;;  %v7063_v9 = vmul.bf16 %v1197_v30, %v1005_v2  ;;  %v1060_v37 = vmul.bf16 1027030327, %v932_v39  ;;  %v7065_v19 = vpop.f32.mrb[51].mxu1 }
 0x210   : > { %v5308_v0 = vpop.eup %5307  ;;  %v1708_v13 = vadd.f32 1.0, %v5306_v54  ;;  %2318 = vmatprep.mubr.bf16.mxu1 %v1947_v62  ;;  %9794 = vst [vmem:[#allocation69_spill] sm:$0xff] %v7065_v19  ;;  %v7077_v62 = vpop.f32.mrb[52].mxu1  ;;  %v1061_v45 = vmul.bf16 1027030327, %v933_v36 }
 0x211   : > { %v7054_v3 = vmul.f32 %v1742_v63, %v1614_v51  ;;  %v1743_v47 = vadd.f32 1.0, %v5308_v0  ;;  %v7069_v51 = vmul.f32 0.5, %v6937_v53  ;;  %v1362_v21 = vunpack.c.h.bf16 %v7056_v32  ;;  %v5178_v63 = vld [vmem:[#allocation8 + $0x54] ss:$8 sps:$4 sm:$0xff]   ;;  %9796 = vst [vmem:[#allocation71_spill] sm:$0xff] %v7077_v62 }
 0x212   : > { %v1836_v44 = vmul.f32 %v1708_v13, %v6801_v4  ;;  %v1363_v30 = vunpack.c.h.bf16 %v7063_v9  ;;  %v1124_v2 = vmul.bf16 %v1060_v37, %v932_v39  ;;  %v1598_v0 = vmul.f32 0.5, %v6941_v46  ;;  %3851 = vmatprep.subr.bf16.mxu0 %v5178_v63  ;;  %v7081_v4 = vpop.f32.mrb[53].mxu1 }
 0x213   : > { %9792 = vst [vmem:[#allocation67_spill] sm:$0xff] %v7054_v3  ;;  %v7074_v54 = vmul.f32 %v1743_v47, %v1615_v59  ;;  %5313 = vtanh.f32 %v1362_v21  ;;  %9797 = vst [vmem:[#allocation72_spill] sm:$0xff] %v7081_v4  ;;  %v996_v19 = vmul.bf16 1061961548, %v932_v39  ;;  %v9798_v59 = vld [vmem:[#allocation28_spill] sm:$0xff]  ;;  %3852 = vmatpush1.bf16.msra.mxu0 %v5176_v18  ;;  %v7087_v37 = vpop.f32.mrb[54].mxu1  ;;  %v1125_v46 = vmul.bf16 %v1061_v45, %v933_v36 }
 0x214   : > { %v1946_v53 = vpack.c.bf16 %v6789_v17, %v1836_v44  ;;  %v5310_v13 = vpop.eup %5309  ;;  %5315 = vtanh.f32 %v1363_v30  ;;  %v1188_v31 = vadd.bf16 1065369472, %v1124_v2  ;;  %v7085_v47 = vadd.f32 %v9798_v59, %v6290_v23  ;;  %9799 = vst [vmem:[#allocation28_spill] sm:$0xff] %v7087_v37  ;;  %v9801_v44 = vld [vmem:[#allocation30_spill] sm:$0xff] }
 0x215   : > { %9795 = vst [vmem:[#allocation70_spill] sm:$0xff] %v7074_v54  ;;  %v1726_v62 = vadd.f32 1.0, %v5310_v13  ;;  %v9800_v17 = vunpack.c.l.bf16 %v6775_v48  ;;  %v7093_v21 = vadd.f32 %v9801_v44, %v6290_v23  ;;  %v7096_v39 = vmul.f32 0.5, %v6964_v49  ;;  %v9803_v48 = vld [vmem:[#allocation29_spill] sm:$0xff] }
 0x216   : > { %2319 = vmatmul.mubr.bf16.gmra.mrb[100].mxu1 %v1946_v53  ;;  %v7098_v63 = vmul.bf16 %v1188_v31, %v996_v19  ;;  %v997_v30 = vmul.bf16 1061961548, %v933_v36  ;;  %v9802_v18 = vunpack.c.l.bf16 %v6770_v28  ;;  %v5312_v2 = vpop.eup %5311  ;;  %v1189_v45 = vadd.bf16 1065369472, %v1125_v46  ;;  %v7113_v28 = vpop.f32.mrb[55].mxu1 }
 0x217   : > { %5317 = vtanh.f32 %v9800_v17  ;;  %v7102_v13 = vmul.f32 %v1726_v62, %v1598_v0  ;;  %v7106_v53 = vadd.f32 %v9803_v48, %v6293_v25  ;;  %v942_v59 = vpack.c.bf16 %v7093_v21, %v7085_v47  ;;  %9804 = vst [vmem:[#allocation30_spill] sm:$0xff] %v7113_v28  ;;  %v9806_v17 = vld [vmem:[#allocation31_spill] sm:$0xff]  ;;  %v5181_v49 = vld [vmem:[#allocation8 + $0x64] ss:$8 sps:$4 sm:$0xff]   ;;  %v7128_v28 = vpop.f32.mrb[56].mxu1 }
 0x218   : > { %5319 = vtanh.f32 %v9802_v18  ;;  %v1599_v19 = vmul.f32 0.5, %v6957_v34  ;;  %v1727_v31 = vadd.f32 1.0, %v5312_v2  ;;  %v1346_v36 = vunpack.c.h.bf16 %v7098_v63  ;;  %v5179_v2 = vld [vmem:[#allocation8 + $0x60] ss:$8 sps:$4 sm:$0xff]   ;;  %9807 = vst [vmem:[#allocation31_spill] sm:$0xff] %v7128_v28  ;;  %3853 = vmatprep.subr.bf16.mxu0 %v5181_v49 }
 0x219   : > { %v7116_v62 = vmul.f32 0.5, %v6985_v43  ;;  %v7118_v0 = vmul.bf16 %v1189_v45, %v997_v30  ;;  %v1070_v46 = vmul.bf16 1027030327, %v942_v59  ;;  %v7122_v44 = vadd.f32 %v9806_v17, %v6293_v25  ;;  %v7133_v17 = vpop.f32.mrb[57].mxu1  ;;  %3854 = vmatpush1.bf16.msra.mxu0 %v5179_v2 }
 0x21a   : > { %v7125_v48 = vmul.f32 %v1727_v31, %v1599_v19  ;;  %v1618_v34 = vmul.f32 0.5, %v7000_v7  ;;  %5321 = vtanh.f32 %v1346_v36  ;;  %v1006_v30 = vmul.bf16 1061961548, %v942_v59  ;;  %9808 = vst [vmem:[#allocation73_spill] sm:$0xff] %v7133_v17  ;;  %v7151_v36 = vpop.f32.mrb[58].mxu1 }
 0x21b   : > { %9805 = vst [vmem:[#allocation29_spill] sm:$0xff] %v7116_v62  ;;  %v1347_v43 = vunpack.c.h.bf16 %v7118_v0  ;;  %v1134_v45 = vmul.bf16 %v1070_v46, %v942_v59  ;;  %v943_v37 = vpack.c.bf16 %v7122_v44, %v7106_v53  ;;  %v7137_v19 = vadd.f32 %v6889_v26, %v6290_v23  ;;  %9809 = vst [vmem:[#allocation74_spill] sm:$0xff] %v7151_v36  ;;  %v7172_v24 = vpop.f32.mrb[59].mxu1 }
 0x21c   : > { %v7141_v7 = vadd.f32 %v6902_v10, %v6293_v25  ;;  %v7145_v31 = vadd.f32 %v6911_v58, %v6290_v23  ;;  %v7149_v59 = vadd.f32 %v6915_v20, %v6293_v25  ;;  %v1619_v18 = vmul.f32 0.5, %v7009_v40  ;;  %9812 = vst [vmem:[#allocation77_spill] sm:$0xff] %v7172_v24 }
 0x21d   : > { %v5314_v46 = vpop.eup %5313  ;;  %5323 = vtanh.f32 %v1347_v43  ;;  %v1198_v26 = vadd.bf16 1065369472, %v1134_v45  ;;  %v1071_v17 = vmul.bf16 1027030327, %v943_v37  ;;  %v7155_v28 = vmul.f32 0.5, %v6993_v56 }
 0x21e   : > { %v5316_v10 = vpop.eup %5315  ;;  %v1746_v58 = vadd.f32 1.0, %v5314_v46  ;;  %v934_v4 = vpack.c.bf16 %v7145_v31, %v7137_v19  ;;  %v935_v20 = vpack.c.bf16 %v7149_v59, %v7141_v7  ;;  %v7162_v36 = vmul.f32 0.5, %v7032_v1 }
 0x21f   : > { %9810 = vst [vmem:[#allocation75_spill] sm:$0xff] %v7155_v28  ;;  %v1747_v40 = vadd.f32 1.0, %v5316_v10  ;;  %v7164_v43 = vmul.bf16 %v1198_v26, %v1006_v30  ;;  %v1135_v45 = vmul.bf16 %v1071_v17, %v943_v37  ;;  %v1007_v3 = vmul.bf16 1061961548, %v943_v37  ;;  %v9813_v37 = vld [vmem:[#allocation32_spill] sm:$0xff] }
 0x220   : > { %v7166_v62 = vmul.f32 %v1746_v58, %v1618_v34  ;;  %v1062_v46 = vmul.bf16 1027030327, %v934_v4  ;;  %v1602_v54 = vmul.f32 0.5, %v7044_v27  ;;  %v998_v26 = vmul.bf16 1061961548, %v934_v4 }
 0x221   : > { %v5318_v49 = vpop.eup %5317  ;;  %v7168_v28 = vmul.f32 %v1747_v40, %v1619_v18  ;;  %v1366_v60 = vunpack.c.h.bf16 %v7164_v43  ;;  %v1199_v30 = vadd.bf16 1065369472, %v1135_v45  ;;  %v1063_v10 = vmul.bf16 1027030327, %v935_v20 }
 0x222   : > { %v5320_v2 = vpop.eup %5319  ;;  %9811 = vst [vmem:[#allocation76_spill] sm:$0xff] %v7166_v62  ;;  %v1713_v56 = vadd.f32 1.0, %v5318_v49  ;;  %v1126_v17 = vmul.bf16 %v1062_v46, %v934_v4  ;;  %v7178_v18 = vadd.f32 %v9813_v37, %v6290_v23  ;;  %v5184_v46 = vld [vmem:[#allocation8 + $0x74] ss:$8 sps:$4 sm:$0xff]   ;;  %v9819_v37 = vld [vmem:[#allocation33_spill] sm:$0xff] }
 0x223   : > { %v1712_v15 = vadd.f32 1.0, %v5320_v2  ;;  %5325 = vtanh.f32 %v1366_v60  ;;  %v7181_v49 = vmul.bf16 %v1199_v30, %v1007_v3  ;;  %v9814_v2 = vunpack.c.l.bf16 %v6834_v6  ;;  %v7193_v6 = vpop.f32.mrb[60].mxu1  ;;  %3855 = vmatprep.subr.bf16.mxu0 %v5184_v46 }
 0x224   : > { %v1841_v1 = vmul.f32 %v1713_v56, %v6918_v52  ;;  %v5322_v58 = vpop.eup %5321  ;;  %v1190_v40 = vadd.bf16 1065369472, %v1126_v17  ;;  %v1127_v45 = vmul.bf16 %v1063_v10, %v935_v20  ;;  %v5182_v56 = vld [vmem:[#allocation8 + $0x70] ss:$8 sps:$4 sm:$0xff]   ;;  %9816 = vst [vmem:[#allocation32_spill] sm:$0xff] %v7193_v6  ;;  %v7246_v60 = vmul.f32 0.5, %v7106_v53 }
 0x225   : > { %v1840_v34 = vmul.f32 %v1712_v15, %v6874_v29  ;;  %5327 = vtanh.f32 %v9814_v2  ;;  %v1730_v52 = vadd.f32 1.0, %v5322_v58  ;;  %v9815_v29 = vunpack.c.l.bf16 %v6810_v42  ;;  %v9817_v17 = vld [vmem:[#allocation34_spill] sm:$0xff]  ;;  %3856 = vmatpush1.bf16.msra.mxu0 %v5182_v56 }
 0x226   : > { %v1949_v27 = vpack.c.bf16 %v6883_v35, %v1841_v1  ;;  %v1603_v15 = vmul.f32 0.5, %v7048_v33  ;;  %v1367_v35 = vunpack.c.h.bf16 %v7181_v49  ;;  %v7191_v3 = vmul.bf16 %v1190_v40, %v998_v26  ;;  %v7201_v33 = vpop.f32.mrb[61].mxu1 }
 0x227   : > { %v1948_v4 = vpack.c.bf16 %v6876_v14, %v1840_v34  ;;  %5329 = vtanh.f32 %v9815_v29  ;;  %v5324_v1 = vpop.eup %5323  ;;  %v7195_v30 = vmul.f32 %v1730_v52, %v1602_v54  ;;  %v999_v14 = vmul.bf16 1061961548, %v935_v20  ;;  %9818 = vst [vmem:[#allocation34_spill] sm:$0xff] %v7201_v33  ;;  %v7208_v54 = vpop.f32.mrb[62].mxu1 }
 0x228   : > { %2328 = vmatprep.mubr.bf16.mxu1 %v1949_v27  ;;  %v1191_v42 = vadd.bf16 1065369472, %v1127_v45  ;;  %v7199_v34 = vadd.f32 %v9817_v17, %v6290_v23  ;;  %v1731_v10 = vadd.f32 1.0, %v5324_v1  ;;  %5331 = vtanh.f32 %v1367_v35  ;;  %9820 = vst [vmem:[#allocation33_spill] sm:$0xff] %v7208_v54  ;;  %v9821_v45 = vld [vmem:[#allocation35_spill] sm:$0xff]  ;;  %v7225_v35 = vpop.f32.mrb[63].mxu1 }
 0x229   : > { %2329 = vmatmul.mubr.bf16.gmra.mrb[104].mxu1 %v1948_v4  ;;  %v1350_v26 = vunpack.c.h.bf16 %v7191_v3  ;;  %v7206_v58 = vadd.f32 %v9819_v37, %v6293_v25  ;;  %v1341_v20 = vunpack.c.l.bf16 %v7026_v38  ;;  %v7212_v27 = vmul.f32 0.5, %v7039_v50  ;;  %9822 = vst [vmem:[#allocation35_spill] sm:$0xff] %v7225_v35  ;;  %v9823_v1 = vld [vmem:[#allocation36_spill] sm:$0xff]  ;;  %v5190_v54 = vld [vmem:[#allocation8 + $0x94] ss:$8 sps:$4 sm:$0xff]  }
 0x22a   : > { %v7214_v40 = vmul.bf16 %v1191_v42, %v999_v14  ;;  %v944_v2 = vpack.c.bf16 %v7199_v34, %v7178_v18  ;;  %v7219_v4 = vmul.f32 %v1731_v10, %v1603_v15  ;;  %v7223_v29 = vadd.f32 %v9821_v45, %v6293_v25  ;;  %v9826_v45 = vld [vmem:[#allocation38_spill] sm:$0xff]  ;;  %v5187_v38 = vld [vmem:[#allocation8 + $0x84] ss:$8 sps:$4 sm:$0xff]  }
 0x22b   : > { %5333 = vtanh.f32 %v1350_v26  ;;  %v7231_v14 = vadd.f32 %v9823_v1, %v6290_v23  ;;  %v7234_v56 = vmul.f32 0.5, %v7085_v47  ;;  %v1622_v15 = vmul.f32 0.5, %v7093_v21  ;;  %v5185_v1 = vld [vmem:[#allocation8 + $0x80] ss:$8 sps:$4 sm:$0xff]   ;;  %3857 = vmatprep.subr.bf16.mxu0 %v5187_v38 }
 0x22c   : > { %v1351_v50 = vunpack.c.h.bf16 %v7214_v40  ;;  %v1072_v46 = vmul.bf16 1027030327, %v944_v2  ;;  %v945_v42 = vpack.c.bf16 %v7223_v29, %v7206_v58  ;;  %v9825_v17 = vunpack.c.l.bf16 %v6923_v55  ;;  %3858 = vmatpush1.bf16.msra.mxu0 %v5185_v1 }
 0x22d   : > { %9824 = vst [vmem:[#allocation36_spill] sm:$0xff] %v7234_v56  ;;  %v5326_v10 = vpop.eup %5325  ;;  %v1008_v26 = vmul.bf16 1061961548, %v944_v2  ;;  %v7243_v52 = vadd.f32 %v9826_v45, %v6290_v23  ;;  %v9827_v33 = vunpack.c.l.bf16 %v6879_v8  ;;  %v5188_v8 = vld [vmem:[#allocation8 + $0x90] ss:$8 sps:$4 sm:$0xff]   ;;  %3859 = vmatprep.subr.bf16.mxu0 %v5190_v54 }
 0x22e   : > { %5335 = vtanh.f32 %v9825_v17  ;;  %v1136_v37 = vmul.bf16 %v1072_v46, %v944_v2  ;;  %v1750_v21 = vadd.f32 1.0, %v5326_v10  ;;  %v1073_v35 = vmul.bf16 1027030327, %v945_v42  ;;  %v9828_v2 = vld [vmem:[#allocation37_spill] sm:$0xff] }
 0x22f   : > { %5337 = vtanh.f32 %v1351_v50  ;;  %v5328_v47 = vpop.eup %5327  ;;  %v7252_v46 = vadd.f32 %v9828_v2, %v6293_v25  ;;  %v946_v45 = vpack.c.bf16 %v7243_v52, %v7231_v14  ;;  %v1009_v10 = vmul.bf16 1061961548, %v945_v42 }
 0x230   : > { %5339 = vtanh.f32 %v9827_v33  ;;  %v1717_v17 = vadd.f32 1.0, %v5328_v47  ;;  %v1200_v50 = vadd.bf16 1065369472, %v1136_v37  ;;  %v7256_v6 = vmul.f32 %v1750_v21, %v1622_v15  ;;  %v9829_v15 = vld [vmem:[#allocation39_spill] sm:$0xff]  ;;  %3860 = vmatpush1.bf16.msra.mxu0 %v5188_v8 }
 0x231   : > { %v5330_v55 = vpop.eup %5329  ;;  %v1137_v24 = vmul.bf16 %v1073_v35, %v945_v42  ;;  %v1623_v33 = vmul.f32 0.5, %v7122_v44  ;;  %v1074_v2 = vmul.bf16 1027030327, %v946_v45  ;;  %v7265_v21 = vadd.f32 %v9829_v15, %v6293_v25  ;;  %v5193_v35 = vld [vmem:[#allocation8 + $0xa4] ss:$8 sps:$4 sm:$0xff]  }
 0x232   : > { %v1716_v53 = vadd.f32 1.0, %v5330_v55  ;;  %v1845_v37 = vmul.f32 %v1717_v17, %v6949_v41  ;;  %v7260_v47 = vmul.bf16 %v1200_v50, %v1008_v26  ;;  %v5332_v56 = vpop.eup %5331  ;;  %5341 = vtanh.f32 %v1341_v20  ;;  %3861 = vmatprep.subr.bf16.mxu0 %v5193_v35 }
 0x233   : > { %v1201_v38 = vadd.bf16 1065369472, %v1137_v24  ;;  %v1751_v42 = vadd.f32 1.0, %v5332_v56  ;;  %v1010_v41 = vmul.bf16 1061961548, %v946_v45  ;;  %v1138_v17 = vmul.bf16 %v1074_v2, %v946_v45 }
 0x234   : > { %v1844_v62 = vmul.f32 %v1716_v53, %v6926_v61  ;;  %v1951_v1 = vpack.c.bf16 %v6945_v5, %v1845_v37  ;;  %v1370_v44 = vunpack.c.h.bf16 %v7260_v47  ;;  %v947_v61 = vpack.c.bf16 %v7265_v21, %v7252_v46  ;;  %v5191_v24 = vld [vmem:[#allocation8 + $0xa0] ss:$8 sps:$4 sm:$0xff]  }
 0x235   : > { %v5334_v26 = vpop.eup %5333  ;;  %v7270_v54 = vmul.bf16 %v1201_v38, %v1009_v10  ;;  %v7274_v50 = vmul.f32 %v1751_v42, %v1623_v33  ;;  %v1606_v20 = vmul.f32 0.5, %v7145_v31  ;;  %v1344_v53 = vunpack.c.l.bf16 %v7098_v63  ;;  %3862 = vmatpush1.bf16.msra.mxu0 %v5191_v24 }
 0x236   : > { %v1950_v55 = vpack.c.bf16 %v6928_v22, %v1844_v62  ;;  %v1734_v56 = vadd.f32 1.0, %v5334_v26  ;;  %2338 = vmatprep.mubr.bf16.mxu1 %v1951_v1  ;;  %5343 = vtanh.f32 %v1370_v44  ;;  %v1607_v22 = vmul.f32 0.5, %v7149_v59  ;;  %v5194_v44 = vld [vmem:[#allocation8 + $0xb0] ss:$8 sps:$4 sm:$0xff]   ;;  %v5196_v26 = vld [vmem:[#allocation8 + $0xb4] ss:$8 sps:$4 sm:$0xff]  }
 0x237   : > { %v1371_v62 = vunpack.c.h.bf16 %v7270_v54  ;;  %v1202_v45 = vadd.bf16 1065369472, %v1138_v17  ;;  %v1075_v37 = vmul.bf16 1027030327, %v947_v61  ;;  %v9830_v31 = vunpack.c.l.bf16 %v7005_v11  ;;  %v9831_v17 = vld [vmem:[#allocation40_spill] sm:$0xff]  ;;  %3863 = vmatprep.subr.bf16.mxu0 %v5196_v26 }
 0x238   : > { %v5336_v5 = vpop.eup %5335  ;;  %2339 = vmatmul.mubr.bf16.gmra.mrb[108].mxu1 %v1950_v55  ;;  %v7280_v8 = vmul.f32 %v1734_v56, %v1606_v20  ;;  %v1011_v63 = vmul.bf16 1061961548, %v947_v61  ;;  %v1345_v59 = vunpack.c.l.bf16 %v7118_v0  ;;  %v7293_v20 = vadd.f32 %v9831_v17, %v6290_v23 }
 0x239   : > { %v5338_v10 = vpop.eup %5337  ;;  %v1721_v33 = vadd.f32 1.0, %v5336_v5  ;;  %5345 = vtanh.f32 %v9830_v31  ;;  %v7284_v15 = vmul.bf16 %v1202_v45, %v1010_v41  ;;  %v1139_v1 = vmul.bf16 %v1075_v37, %v947_v61  ;;  %v9832_v41 = vld [vmem:[#allocation41_spill] sm:$0xff]  ;;  %3864 = vmatpush1.bf16.msra.mxu0 %v5194_v44 }
 0x23a   : > { %v5340_v2 = vpop.eup %5339  ;;  %v1735_v38 = vadd.f32 1.0, %v5338_v10  ;;  %5347 = vtanh.f32 %v1371_v62  ;;  %v7297_v56 = vadd.f32 %v9832_v41, %v6293_v25  ;;  %v7300_v0 = vmul.f32 0.5, %v7137_v19  ;;  %v9833_v62 = vld [vmem:[#allocation42_spill] sm:$0xff]  ;;  %v9834_v10 = vld [vmem:[#allocation43_spill] sm:$0xff] }
 0x23b   : > { %v1849_v35 = vmul.f32 %v1721_v33, %v6996_v12  ;;  %v1720_v42 = vadd.f32 1.0, %v5340_v2  ;;  %v1374_v11 = vunpack.c.h.bf16 %v7284_v15  ;;  %v1203_v24 = vadd.bf16 1065369472, %v1139_v1 }
 0x23c   : > { %v7288_v55 = vmul.f32 %v1735_v38, %v1607_v22  ;;  %v5342_v5 = vpop.eup %5341  ;;  %v7305_v22 = vmul.f32 0.5, %v7141_v7  ;;  %v7309_v45 = vadd.f32 %v9833_v62, %v6290_v23  ;;  %v7313_v33 = vadd.f32 %v9834_v10, %v6293_v25  ;;  %v5197_v62 = vld [vmem:[#allocation8 + $0xc0] ss:$8 sps:$4 sm:$0xff]   ;;  %v5199_v10 = vld [vmem:[#allocation8 + $0xc4] ss:$8 sps:$4 sm:$0xff]  }
 0x23d   : > { %v1953_v12 = vpack.c.bf16 %v7023_v57, %v1849_v35  ;;  %v1848_v61 = vmul.f32 %v1720_v42, %v6974_v16  ;;  %5349 = vtanh.f32 %v1374_v11  ;;  %v9835_v57 = vld [vmem:[#allocation22_spill] sm:$0xff]  ;;  %v7316_v16 = vmul.bf16 %v1203_v24, %v1011_v63  ;;  %3865 = vmatprep.subr.bf16.mxu0 %v5199_v10 }
 0x23e   : > { %v1725_v37 = vadd.f32 1.0, %v5342_v5  ;;  %5351 = vtanh.f32 %v1345_v59  ;;  %v1349_v7 = vunpack.c.l.bf16 %v7214_v40  ;;  %v1626_v31 = vmul.f32 0.5, %v7199_v34  ;;  %v9836_v34 = vld [vmem:[#allocation44_spill] sm:$0xff]  ;;  %3866 = vmatpush1.bf16.msra.mxu0 %v5197_v62 }
 0x23f   : > { %2348 = vmatprep.mubr.bf16.mxu1 %v1953_v12  ;;  %v1952_v19 = vpack.c.bf16 %v9835_v57, %v1848_v61  ;;  %v948_v2 = vpack.c.bf16 %v7309_v45, %v7293_v20  ;;  %v949_v38 = vpack.c.bf16 %v7313_v33, %v7297_v56  ;;  %v1627_v42 = vmul.f32 0.5, %v7223_v29 }
 0x240   : > { %v5344_v35 = vpop.eup %5343  ;;  %v1375_v1 = vunpack.c.h.bf16 %v7316_v16  ;;  %v1853_v63 = vmul.f32 %v1725_v37, %v7096_v39  ;;  %5353 = vtanh.f32 %v1344_v53  ;;  %v7329_v26 = vadd.f32 %v9836_v34, %v6290_v23  ;;  %v9838_v39 = vld [vmem:[#allocation45_spill] sm:$0xff]  ;;  %v9839_v37 = vld [vmem:[#allocation46_spill] sm:$0xff] }
 0x241   : > { %2349 = vmatmul.mubr.bf16.gmra.mrb[112].mxu1 %v1952_v19  ;;  %v1754_v59 = vadd.f32 1.0, %v5344_v35  ;;  %v1012_v44 = vmul.bf16 1061961548, %v948_v2  ;;  %v1076_v40 = vmul.bf16 1027030327, %v948_v2  ;;  %v7336_v53 = vadd.f32 %v9838_v39, %v6293_v25 }
 0x242   : > { %5355 = vtanh.f32 %v1375_v1  ;;  %v1955_v17 = vpack.c.bf16 %v7125_v48, %v1853_v63  ;;  %v1013_v41 = vmul.bf16 1061961548, %v949_v38  ;;  %v1077_v12 = vmul.bf16 1027030327, %v949_v38  ;;  %v9840_v48 = vld [vmem:[#allocation47_spill] sm:$0xff] }
 0x243   : > { %v5346_v11 = vpop.eup %5345  ;;  %v7332_v61 = vmul.f32 %v1754_v59, %v1626_v31  ;;  %v1140_v5 = vmul.bf16 %v1076_v40, %v948_v2  ;;  %v7340_v35 = vadd.f32 %v9839_v37, %v6290_v23  ;;  %v7344_v1 = vadd.f32 %v9840_v48, %v6293_v25  ;;  %v5200_v48 = vld [vmem:[#allocation8 + $0xd0] ss:$8 sps:$4 sm:$0xff]  }
 0x244   : > { %v5348_v29 = vpop.eup %5347  ;;  %v1724_v24 = vadd.f32 1.0, %v5346_v11  ;;  %2358 = vmatprep.mubr.bf16.mxu1 %v1955_v17  ;;  %v1141_v19 = vmul.bf16 %v1077_v12, %v949_v38  ;;  %5357 = vtanh.f32 %v1349_v7  ;;  %v1630_v40 = vmul.f32 0.5, %v7243_v52 }
 0x245   : > { %9837 = vst [vmem:[#allocation38_spill] sm:$0xff] %v7332_v61  ;;  %v1755_v57 = vadd.f32 1.0, %v5348_v29  ;;  %v1204_v63 = vadd.bf16 1065369472, %v1140_v5  ;;  %v950_v34 = vpack.c.bf16 %v7340_v35, %v7329_v26  ;;  %v1348_v39 = vunpack.c.l.bf16 %v7191_v3 }
 0x246   : > { %v1852_v2 = vmul.f32 %v1724_v24, %v7069_v51  ;;  %v1205_v38 = vadd.bf16 1065369472, %v1141_v19  ;;  %v951_v51 = vpack.c.bf16 %v7344_v1, %v7336_v53  ;;  %v1631_v62 = vmul.f32 0.5, %v7265_v21 }
 0x247   : > { %v7348_v59 = vmul.f32 %v1755_v57, %v1627_v42  ;;  %v5350_v11 = vpop.eup %5349  ;;  %v7355_v29 = vmul.bf16 %v1204_v63, %v1012_v44  ;;  %v7360_v42 = vmul.f32 0.5, %v7178_v18  ;;  %v1078_v5 = vmul.bf16 1027030327, %v950_v34 }
 0x248   : > { %v1954_v12 = vpack.c.bf16 %v7102_v13, %v1852_v2  ;;  %v5352_v7 = vpop.eup %5351  ;;  %v1758_v52 = vadd.f32 1.0, %v5350_v11  ;;  %v7362_v24 = vmul.bf16 %v1205_v38, %v1013_v41  ;;  %v1014_v37 = vmul.bf16 1061961548, %v950_v34  ;;  %v5202_v2 = vld [vmem:[#allocation8 + $0xd4] ss:$8 sps:$4 sm:$0xff]  }
 0x249   : > { %v1378_v13 = vunpack.c.h.bf16 %v7355_v29  ;;  %v1729_v44 = vadd.f32 1.0, %v5352_v7  ;;  %v1142_v18 = vmul.bf16 %v1078_v5, %v950_v34  ;;  %v1079_v3 = vmul.bf16 1027030327, %v951_v51  ;;  %3867 = vmatprep.subr.bf16.mxu0 %v5202_v2  ;;  %v9848_v2 = vld [vmem:[#allocation50_spill] sm:$0xff] }
 0x24a   : > { %2359 = vmatmul.mubr.bf16.gmra.mrb[116].mxu1 %v1954_v12  ;;  %v5354_v10 = vpop.eup %5353  ;;  %v7367_v57 = vmul.f32 %v1758_v52, %v1630_v40  ;;  %v1379_v19 = vunpack.c.h.bf16 %v7362_v24  ;;  %v7372_v21 = vmul.f32 0.5, %v7206_v58  ;;  %v1015_v12 = vmul.bf16 1061961548, %v951_v51  ;;  %3868 = vmatpush1.bf16.msra.mxu0 %v5200_v48  ;;  %v9843_v58 = vld [vmem:[#allocation49_spill] sm:$0xff] }
 0x24b   : > { %5359 = vtanh.f32 %v1378_v13  ;;  %v1857_v41 = vmul.f32 %v1729_v44, %v7212_v27  ;;  %v1728_v63 = vadd.f32 1.0, %v5354_v10  ;;  %v1206_v11 = vadd.bf16 1065369472, %v1142_v18  ;;  %v9842_v27 = vld [vmem:[#allocation48_spill] sm:$0xff] }
 0x24c   : > { %9841 = vst [vmem:[#allocation37_spill] sm:$0xff] %v7367_v57  ;;  %v5356_v38 = vpop.eup %5355  ;;  %5361 = vtanh.f32 %v1379_v19  ;;  %v1143_v52 = vmul.bf16 %v1079_v3, %v951_v51  ;;  %v7380_v13 = vadd.f32 %v9842_v27, %v6290_v23  ;;  %v7384_v44 = vadd.f32 %v9843_v58, %v6293_v25  ;;  %v9845_v51 = vld [vmem:[#allocation27_spill] sm:$0xff] }
 0x24d   : > { %v1759_v40 = vadd.f32 1.0, %v5356_v38  ;;  %v1957_v7 = vpack.c.bf16 %v7219_v4, %v1857_v41  ;;  %v1856_v34 = vmul.f32 %v1728_v63, %v7162_v36  ;;  %v7376_v5 = vmul.bf16 %v1206_v11, %v1014_v37  ;;  %v9851_v38 = vld [vmem:[#allocation26_spill] sm:$0xff] }
 0x24e   : > { %5363 = vtanh.f32 %v1348_v39  ;;  %v5358_v10 = vpop.eup %5357  ;;  %v1207_v36 = vadd.bf16 1065369472, %v1143_v52  ;;  %v9846_v18 = vunpack.c.l.bf16 %v9845_v51  ;;  %v7392_v39 = vmul.f32 0.5, %v7231_v14  ;;  %v5208_v57 = vld [vmem:[#allocation8 + $0xf4] ss:$8 sps:$4 sm:$0xff]  }
 0x24f   : > { %v7386_v19 = vmul.f32 %v1759_v40, %v1631_v62  ;;  %2368 = vmatprep.mubr.bf16.mxu1 %v1957_v7  ;;  %v1956_v4 = vpack.c.bf16 %v7195_v30, %v1856_v34  ;;  %v1382_v37 = vunpack.c.h.bf16 %v7376_v5  ;;  %v1733_v48 = vadd.f32 1.0, %v5358_v10  ;;  %v9850_v30 = vld [vmem:[#allocation51_spill] sm:$0xff]  ;;  %v5205_v34 = vld [vmem:[#allocation8 + $0xe4] ss:$8 sps:$4 sm:$0xff]  }
 0x250   : > { %5365 = vtanh.f32 %v9846_v18  ;;  %9847 = vst [vmem:[#allocation40_spill] sm:$0xff] %v7392_v39  ;;  %v7397_v41 = vadd.f32 %v9848_v2, %v6290_v23  ;;  %v7400_v62 = vmul.f32 0.5, %v7252_v46  ;;  %v7402_v63 = vmul.bf16 %v1207_v36, %v1015_v12  ;;  %v5203_v46 = vld [vmem:[#allocation8 + $0xe0] ss:$8 sps:$4 sm:$0xff]   ;;  %3869 = vmatprep.subr.bf16.mxu0 %v5205_v34  ;;  %v9858_v12 = vld [vmem:[#allocation55_spill] sm:$0xff] }
 0x251   : > { %9844 = vst [vmem:[#allocation39_spill] sm:$0xff] %v7386_v19  ;;  %v7406_v3 = vadd.f32 %v9850_v30, %v6293_v25  ;;  %v9852_v14 = vunpack.c.l.bf16 %v9851_v38  ;;  %v1861_v40 = vmul.f32 %v1733_v48, %v7305_v22  ;;  %v1634_v52 = vmul.f32 0.5, %v7309_v45  ;;  %v9853_v22 = vld [vmem:[#allocation52_spill] sm:$0xff]  ;;  %v9854_v45 = vld [vmem:[#allocation53_spill] sm:$0xff]  ;;  %3870 = vmatpush1.bf16.msra.mxu0 %v5203_v46 }
 0x252   : > { %9849 = vst [vmem:[#allocation41_spill] sm:$0xff] %v7400_v62  ;;  %2369 = vmatmul.mubr.bf16.gmra.mrb[120].mxu1 %v1956_v4  ;;  %v952_v7 = vpack.c.bf16 %v7397_v41, %v7380_v13  ;;  %v1383_v27 = vunpack.c.h.bf16 %v7402_v63  ;;  %v1635_v10 = vmul.f32 0.5, %v7313_v33  ;;  %v7423_v51 = vadd.f32 %v9853_v22, %v6290_v23  ;;  %3871 = vmatprep.subr.bf16.mxu0 %v5208_v57  ;;  %v9866_v62 = vld [vmem:[#allocation60_spill] sm:$0xff] }
 0x253   : > { %5367 = vtanh.f32 %v9852_v14  ;;  %v953_v58 = vpack.c.bf16 %v7406_v3, %v7384_v44  ;;  %v1959_v4 = vpack.c.bf16 %v7288_v55, %v1861_v40  ;;  %v7427_v2 = vadd.f32 %v9854_v45, %v6293_v25  ;;  %v9855_v55 = vld [vmem:[#allocation64_spill] sm:$0xff]  ;;  %v9857_v40 = vld [vmem:[#allocation54_spill] sm:$0xff] }
 0x254   : > { %5369 = vtanh.f32 %v1382_v37  ;;  %v1080_v36 = vmul.bf16 1027030327, %v952_v7  ;;  %v1016_v37 = vmul.bf16 1061961548, %v952_v7  ;;  %v9856_v14 = vunpack.c.l.bf16 %v9855_v55 }
 0x255   : > { %v5360_v18 = vpop.eup %5359  ;;  %5371 = vtanh.f32 %v1383_v27  ;;  %v1081_v48 = vmul.bf16 1027030327, %v953_v58  ;;  %2378 = vmatprep.mubr.bf16.mxu1 %v1959_v4  ;;  %v7433_v22 = vadd.f32 %v9857_v40, %v6290_v23  ;;  %v1017_v27 = vmul.bf16 1061961548, %v953_v58 }
 0x256   : > { %v5362_v30 = vpop.eup %5361  ;;  %v1762_v38 = vadd.f32 1.0, %v5360_v18  ;;  %v1144_v33 = vmul.bf16 %v1080_v36, %v952_v7  ;;  %5373 = vtanh.f32 %v9856_v14  ;;  %v7437_v31 = vadd.f32 %v9858_v12, %v6293_v25 }
 0x257   : > { %v1763_v34 = vadd.f32 1.0, %v5362_v30  ;;  %v1145_v11 = vmul.bf16 %v1081_v48, %v953_v58  ;;  %v954_v4 = vpack.c.bf16 %v7433_v22, %v7423_v51  ;;  %v7449_v12 = vmul.f32 0.5, %v7293_v20 }
 0x258   : > { %v5364_v45 = vpop.eup %5363  ;;  %v7440_v18 = vmul.f32 %v1762_v38, %v1634_v52  ;;  %v1208_v7 = vadd.bf16 1065369472, %v1144_v33  ;;  %v955_v58 = vpack.c.bf16 %v7437_v31, %v7427_v2  ;;  %v1638_v33 = vmul.f32 0.5, %v7340_v35  ;;  %v5206_v35 = vld [vmem:[#allocation8 + $0xf0] ss:$8 sps:$4 sm:$0xff]  }
 0x259   : > { %v7444_v55 = vmul.f32 %v1763_v34, %v1635_v10  ;;  %v1732_v14 = vadd.f32 1.0, %v5364_v45  ;;  %v1209_v30 = vadd.bf16 1065369472, %v1145_v11  ;;  %9861 = vst [vmem:[#allocation22_spill] sm:$0xff] %v7449_v12  ;;  %v1082_v52 = vmul.bf16 1027030327, %v954_v4  ;;  %3872 = vmatpush1.bf16.msra.mxu0 %v5206_v35 }
 0x25a   : > { %9859 = vst [vmem:[#allocation42_spill] sm:$0xff] %v7440_v18  ;;  %v5366_v36 = vpop.eup %5365  ;;  %v7451_v40 = vmul.bf16 %v1208_v7, %v1016_v37  ;;  %v1083_v10 = vmul.bf16 1027030327, %v955_v58  ;;  %v9862_v11 = vld [vmem:[#allocation19_spill] sm:$0xff]  ;;  %v1018_v20 = vmul.bf16 1061961548, %v954_v4 }
 0x25b   : > { %9860 = vst [vmem:[#allocation43_spill] sm:$0xff] %v7444_v55  ;;  %v1737_v48 = vadd.f32 1.0, %v5366_v36  ;;  %v1860_v46 = vmul.f32 %v1732_v14, %v7300_v0  ;;  %v7455_v17 = vmul.bf16 %v1209_v30, %v1017_v27  ;;  %v1639_v37 = vmul.f32 0.5, %v7344_v1  ;;  %v9863_v0 = vld [vmem:[#allocation21_spill] sm:$0xff]  ;;  %v9864_v14 = vld [vmem:[#allocation18_spill] sm:$0xff] }
 0x25c   : > { %v1386_v18 = vunpack.c.h.bf16 %v7451_v40  ;;  %v1146_v39 = vmul.bf16 %v1082_v52, %v954_v4  ;;  %v9869_v52 = vunpack.c.l.bf16 %v7063_v9  ;;  %v9873_v9 = vld [vmem:[#allocation59_spill] sm:$0xff] }
 0x25d   : > { %v5368_v38 = vpop.eup %5367  ;;  %v1865_v45 = vmul.f32 %v1737_v48, %v9862_v11  ;;  %v1958_v7 = vpack.c.bf16 %v7280_v8, %v1860_v46  ;;  %v1387_v36 = vunpack.c.h.bf16 %v7455_v17  ;;  %v9865_v46 = vld [vmem:[#allocation20_spill] sm:$0xff] }
 0x25e   : > { %v5370_v34 = vpop.eup %5369  ;;  %v1736_v55 = vadd.f32 1.0, %v5368_v38  ;;  %5375 = vtanh.f32 %v1386_v18  ;;  %v1019_v38 = vmul.bf16 1061961548, %v955_v58  ;;  %v1210_v61 = vadd.bf16 1065369472, %v1146_v39 }
 0x25f   : > { %v1766_v12 = vadd.f32 1.0, %v5370_v34  ;;  %v1961_v27 = vpack.c.bf16 %v9863_v0, %v1865_v45  ;;  %v5372_v48 = vpop.eup %5371  ;;  %2379 = vmatmul.mubr.bf16.gmra.mrb[124].mxu1 %v1958_v7  ;;  %5377 = vtanh.f32 %v1387_v36  ;;  %v1147_v34 = vmul.bf16 %v1083_v10, %v955_v58  ;;  %v9872_v36 = vld [vmem:[#allocation68_spill] sm:$0xff] }
 0x260   : > { %v1864_v30 = vmul.f32 %v1736_v55, %v9864_v14  ;;  %v5374_v1 = vpop.eup %5373  ;;  %v1767_v8 = vadd.f32 1.0, %v5372_v48  ;;  %v9867_v45 = vunpack.c.l.bf16 %v9866_v62  ;;  %v9868_v55 = vld [vmem:[#allocation56_spill] sm:$0xff]  ;;  %v7477_v58 = vmul.bf16 %v1210_v61, %v1018_v20  ;;  %v9871_v62 = vld [vmem:[#allocation58_spill] sm:$0xff] }
 0x261   : > { %v7464_v11 = vmul.f32 %v1766_v12, %v1638_v33  ;;  %2388 = vmatprep.mubr.bf16.mxu1 %v1961_v27  ;;  %v1741_v18 = vadd.f32 1.0, %v5374_v1  ;;  %v1211_v4 = vadd.bf16 1065369472, %v1147_v34  ;;  %v7471_v12 = vadd.f32 %v9868_v55, %v6290_v23  ;;  %v9870_v33 = vld [vmem:[#allocation57_spill] sm:$0xff]  ;;  %v9874_v48 = vld [vmem:[#allocation70_spill] sm:$0xff] }
 0x262   : > { %v1960_v19 = vpack.c.bf16 %v9865_v46, %v1864_v30  ;;  %5379 = vtanh.f32 %v9867_v45  ;;  %v7475_v57 = vmul.f32 %v1767_v8, %v1639_v37  ;;  %v7481_v39 = vadd.f32 %v9870_v33, %v6293_v25  ;;  %v9876_v33 = vld [vmem:[#allocation61_spill] sm:$0xff] }
 0x263   : > { %5381 = vtanh.f32 %v9869_v52  ;;  %v7485_v10 = vadd.f32 %v9871_v62, %v6290_v23  ;;  %v7488_v7 = vmul.f32 0.5, %v7297_v56  ;;  %v1869_v35 = vmul.f32 %v1741_v18, %v9872_v36 }
 0x264   : > { %v7491_v0 = vmul.bf16 %v1211_v4, %v1019_v38  ;;  %v7495_v37 = vadd.f32 %v9873_v9, %v6293_v25  ;;  %v7499_v20 = vmul.f32 0.5, %v7329_v26  ;;  %v1390_v27 = vunpack.c.h.bf16 %v7477_v58 }
 0x265   : > { %v956_v14 = vpack.c.bf16 %v7485_v10, %v7471_v12  ;;  %v7506_v30 = vmul.f32 0.5, %v7336_v53  ;;  %v1963_v38 = vpack.c.bf16 %v9874_v48, %v1869_v35  ;;  %v1642_v46 = vmul.f32 0.5, %v7397_v41 }
 0x266   : > { %v1391_v34 = vunpack.c.h.bf16 %v7491_v0  ;;  %5383 = vtanh.f32 %v1390_v27  ;;  %v957_v26 = vpack.c.bf16 %v7495_v37, %v7481_v39  ;;  %v1643_v45 = vmul.f32 0.5, %v7406_v3 }
 0x267   : > { %v1084_v8 = vmul.bf16 1027030327, %v956_v14  ;;  %2389 = vmatmul.mubr.bf16.gmra.mrb[128].mxu1 %v1960_v19  ;;  %v1020_v18 = vmul.bf16 1061961548, %v956_v14  ;;  %v9875_v52 = vunpack.c.l.bf16 %v7056_v32  ;;  %v7519_v62 = vadd.f32 %v9876_v33, %v6290_v23  ;;  %v9878_v19 = vld [vmem:[#allocation62_spill] sm:$0xff]  ;;  %v9879_v32 = vld [vmem:[#allocation63_spill] sm:$0xff] }
 0x268   : > { %5385 = vtanh.f32 %v1391_v34  ;;  %v5376_v53 = vpop.eup %5375  ;;  %2398 = vmatprep.mubr.bf16.mxu1 %v1963_v38  ;;  %v1085_v55 = vmul.bf16 1027030327, %v957_v26  ;;  %v1021_v9 = vmul.bf16 1061961548, %v957_v26  ;;  %v9877_v41 = vunpack.c.l.bf16 %v7181_v49  ;;  %v9881_v33 = vld [vmem:[#allocation23_spill] sm:$0xff] }
 0x269   : > { %v1148_v4 = vmul.bf16 %v1084_v8, %v956_v14  ;;  %5387 = vtanh.f32 %v9875_v52  ;;  %v5378_v36 = vpop.eup %5377  ;;  %v1770_v35 = vadd.f32 1.0, %v5376_v53  ;;  %v7525_v3 = vadd.f32 %v9878_v19, %v6293_v25 }
 0x26a   : > { %5389 = vtanh.f32 %v9877_v41  ;;  %v1771_v14 = vadd.f32 1.0, %v5378_v36  ;;  %v1149_v38 = vmul.bf16 %v1085_v55, %v957_v26  ;;  %v7529_v34 = vadd.f32 %v9879_v32, %v6290_v23  ;;  %v9883_v32 = vld [vmem:[#allocation24_spill] sm:$0xff] }
 0x26b   : > { %v1212_v48 = vadd.bf16 1065369472, %v1148_v4  ;;  %v7531_v52 = vmul.f32 %v1770_v35, %v1642_v46  ;;  %v7535_v49 = vadd.f32 %v9881_v33, %v6293_v25  ;;  %v9882_v41 = vunpack.c.l.bf16 %v7164_v43 }
 0x26c   : > { %v5380_v27 = vpop.eup %5379  ;;  %v7539_v19 = vmul.f32 %v1771_v14, %v1643_v45  ;;  %v1213_v26 = vadd.bf16 1065369472, %v1149_v38  ;;  %v7544_v55 = vmul.f32 0.5, %v7380_v13  ;;  %v958_v35 = vpack.c.bf16 %v7529_v34, %v7519_v62  ;;  %v9884_v45 = vld [vmem:[#allocation75_spill] sm:$0xff] }
 0x26d   : > { %v5382_v8 = vpop.eup %5381  ;;  %9880 = vst [vmem:[#allocation44_spill] sm:$0xff] %v7531_v52  ;;  %v1740_v53 = vadd.f32 1.0, %v5380_v27  ;;  %5391 = vtanh.f32 %v9882_v41  ;;  %v7541_v4 = vmul.bf16 %v1212_v48, %v1020_v18  ;;  %v959_v27 = vpack.c.bf16 %v7535_v49, %v7525_v3 }
 0x26e   : > { %v1745_v36 = vadd.f32 1.0, %v5382_v8  ;;  %v7552_v43 = vmul.f32 0.5, %v7384_v44  ;;  %v7556_v48 = vmul.bf16 %v1213_v26, %v1021_v9  ;;  %v1646_v38 = vmul.f32 0.5, %v7433_v22  ;;  %v9885_v8 = vld [vmem:[#allocation67_spill] sm:$0xff] }
 0x26f   : > { %v1868_v46 = vmul.f32 %v1740_v53, %v9883_v32  ;;  %v1394_v18 = vunpack.c.h.bf16 %v7541_v4  ;;  %v1086_v33 = vmul.bf16 1027030327, %v958_v35  ;;  %v1647_v32 = vmul.f32 0.5, %v7437_v31 }
 0x270   : > { %v1873_v14 = vmul.f32 %v1745_v36, %v9884_v45  ;;  %v5384_v41 = vpop.eup %5383  ;;  %v1395_v44 = vunpack.c.h.bf16 %v7556_v48  ;;  %v1022_v9 = vmul.bf16 1061961548, %v958_v35  ;;  %v1087_v1 = vmul.bf16 1027030327, %v959_v27 }
 0x271   : > { %v1962_v53 = vpack.c.bf16 %v9885_v8, %v1868_v46  ;;  %5393 = vtanh.f32 %v1394_v18  ;;  %v1774_v45 = vadd.f32 1.0, %v5384_v41  ;;  %v1150_v26 = vmul.bf16 %v1086_v33, %v958_v35 }
 0x272   : > { %v1965_v56 = vpack.c.bf16 %v7168_v28, %v1873_v14  ;;  %v5386_v36 = vpop.eup %5385  ;;  %5395 = vtanh.f32 %v1395_v44  ;;  %v1023_v46 = vmul.bf16 1061961548, %v959_v27  ;;  %v1151_v18 = vmul.bf16 %v1087_v1, %v959_v27  ;;  %v9892_v27 = vld [vmem:[#allocation66_spill] sm:$0xff] }
 0x273   : > { %2399 = vmatmul.mubr.bf16.gmra.mrb[132].mxu1 %v1962_v53  ;;  %v5388_v13 = vpop.eup %5387  ;;  %v1775_v61 = vadd.f32 1.0, %v5386_v36  ;;  %v7565_v31 = vmul.f32 %v1774_v45, %v1646_v38  ;;  %v1214_v14 = vadd.bf16 1065369472, %v1150_v26  ;;  %v9886_v53 = vld [vmem:[#allocation25_spill] sm:$0xff]  ;;  %v9888_v33 = vunpack.c.l.bf16 %v7270_v54 }
 0x274   : > { %2408 = vmatprep.mubr.bf16.mxu1 %v1965_v56  ;;  %v5390_v8 = vpop.eup %5389  ;;  %v1744_v28 = vadd.f32 1.0, %v5388_v13  ;;  %v7571_v35 = vadd.f32 %v9886_v53, %v6290_v23  ;;  %v9889_v56 = vld [vmem:[#allocation29_spill] sm:$0xff]  ;;  %v1215_v38 = vadd.bf16 1065369472, %v1151_v18  ;;  %v9895_v53 = vld [vmem:[#allocation36_spill] sm:$0xff] }
 0x275   : > { %v7567_v52 = vmul.f32 %v1775_v61, %v1647_v32  ;;  %v1749_v41 = vadd.f32 1.0, %v5390_v8  ;;  %5397 = vtanh.f32 %v9888_v33  ;;  %v7576_v22 = vmul.bf16 %v1214_v14, %v1022_v9  ;;  %v9890_v13 = vld [vmem:[#allocation65_spill] sm:$0xff]  ;;  %v9894_v9 = vld [vmem:[#allocation76_spill] sm:$0xff] }
 0x276   : > { %9887 = vst [vmem:[#allocation45_spill] sm:$0xff] %v7571_v35  ;;  %v1872_v44 = vmul.f32 %v1744_v28, %v9889_v56  ;;  %v7580_v45 = vadd.f32 %v9890_v13, %v6293_v25  ;;  %v7585_v32 = vadd.f32 %v9892_v27, %v6290_v23  ;;  %v9893_v54 = vld [vmem:[#allocation69_spill] sm:$0xff]  ;;  %v7592_v8 = vmul.f32 0.5, %v7423_v51 }
 0x277   : > { %v5392_v36 = vpop.eup %5391  ;;  %v1877_v61 = vmul.f32 %v1749_v41, %v7246_v60  ;;  %v7589_v26 = vadd.f32 %v9893_v54, %v6293_v25  ;;  %v1398_v14 = vunpack.c.h.bf16 %v7576_v22  ;;  %v7596_v18 = vmul.bf16 %v1215_v38, %v1023_v46 }
 0x278   : > { %9891 = vst [vmem:[#allocation46_spill] sm:$0xff] %v7580_v45  ;;  %v1748_v1 = vadd.f32 1.0, %v5392_v36  ;;  %v1964_v28 = vpack.c.bf16 %v9894_v9, %v1872_v44  ;;  %v7599_v60 = vmul.f32 0.5, %v7427_v2  ;;  %v960_v36 = vpack.c.bf16 %v7585_v32, %v7571_v35  ;;  %v9910_v35 = vld [vmem:[#allocation74_spill] sm:$0xff] }
 0x279   : > { %v1967_v41 = vpack.c.bf16 %v7274_v50, %v1877_v61  ;;  %v1650_v56 = vmul.f32 0.5, %v7485_v10  ;;  %5399 = vtanh.f32 %v1398_v14  ;;  %v1399_v51 = vunpack.c.h.bf16 %v7596_v18 }
 0x27a   : > { %v1876_v33 = vmul.f32 %v1748_v1, %v9895_v53  ;;  %v961_v46 = vpack.c.bf16 %v7589_v26, %v7580_v45  ;;  %v1651_v2 = vmul.f32 0.5, %v7495_v37  ;;  %v1024_v38 = vmul.bf16 1061961548, %v960_v36  ;;  %v9899_v37 = vld [vmem:[#allocation72_spill] sm:$0xff] }
 0x27b   : > { %2409 = vmatmul.mubr.bf16.gmra.mrb[136].mxu1 %v1964_v28  ;;  %v5394_v44 = vpop.eup %5393  ;;  %v1088_v13 = vmul.bf16 1027030327, %v960_v36  ;;  %5401 = vtanh.f32 %v1399_v51  ;;  %v9896_v9 = vunpack.c.l.bf16 %v7260_v47  ;;  %v9897_v28 = vld [vmem:[#allocation71_spill] sm:$0xff]  ;;  %v9902_v51 = vunpack.c.l.bf16 %v7316_v16 }
 0x27c   : > { %2418 = vmatprep.mubr.bf16.mxu1 %v1967_v41  ;;  %v1966_v50 = vpack.c.bf16 %v7256_v6, %v1876_v33  ;;  %v1778_v61 = vadd.f32 1.0, %v5394_v44  ;;  %v1025_v1 = vmul.bf16 1061961548, %v961_v46  ;;  %v1089_v27 = vmul.bf16 1027030327, %v961_v46  ;;  %v5396_v10 = vpop.eup %5395 }
 0x27d   : > { %v1152_v54 = vmul.bf16 %v1088_v13, %v960_v36  ;;  %5403 = vtanh.f32 %v9896_v9  ;;  %v7615_v14 = vadd.f32 %v9897_v28, %v6290_v23  ;;  %v7619_v41 = vadd.f32 %v9899_v37, %v6293_v25  ;;  %v9903_v9 = vld [vmem:[#allocation28_spill] sm:$0xff] }
 0x27e   : > { %v7621_v6 = vmul.f32 %v1778_v61, %v1650_v56  ;;  %v1779_v53 = vadd.f32 1.0, %v5396_v10  ;;  %v1153_v33 = vmul.bf16 %v1089_v27, %v961_v46  ;;  %5405 = vtanh.f32 %v9902_v51  ;;  %v9905_v61 = vld [vmem:[#allocation30_spill] sm:$0xff] }
 0x27f   : > { %9898 = vst [vmem:[#allocation47_spill] sm:$0xff] %v7615_v14  ;;  %9900 = vst [vmem:[#allocation48_spill] sm:$0xff] %v7619_v41  ;;  %v5398_v44 = vpop.eup %5397  ;;  %v1216_v13 = vadd.bf16 1065369472, %v1152_v54  ;;  %v7629_v28 = vadd.f32 %v9903_v9, %v6290_v23  ;;  %v7635_v46 = vadd.f32 %v9905_v61, %v6293_v25  ;;  %v7640_v27 = vmul.f32 0.5, %v7471_v12 }
 0x280   : > { %9901 = vst [vmem:[#allocation49_spill] sm:$0xff] %v7621_v6  ;;  %v7631_v45 = vmul.f32 %v1779_v53, %v1651_v2  ;;  %v1753_v37 = vadd.f32 1.0, %v5398_v44  ;;  %v1217_v56 = vadd.bf16 1065369472, %v1153_v33  ;;  %v7637_v16 = vpop.f32.mrb[64].mxu1  ;;  %v9907_v51 = vunpack.c.l.bf16 %v7284_v15 }
 0x281   : > { %9906 = vst [vmem:[#allocation50_spill] sm:$0xff] %v7640_v27  ;;  %v7642_v10 = vmul.bf16 %v1216_v13, %v1024_v38  ;;  %v962_v54 = vpack.c.bf16 %v7629_v28, %v7615_v14  ;;  %v7648_v2 = vpop.f32.mrb[65].mxu1  ;;  %v963_v12 = vpack.c.bf16 %v7635_v46, %v7619_v41  ;;  %v7659_v13 = vmul.f32 0.5, %v7481_v39  ;;  %v9908_v41 = vld [vmem:[#allocation31_spill] sm:$0xff] }
 0x282   : > { %9904 = vst [vmem:[#allocation27_spill] sm:$0xff] %v7631_v45  ;;  %5407 = vtanh.f32 %v9907_v51  ;;  %v1881_v33 = vmul.f32 %v1753_v37, %v7372_v21  ;;  %v7652_v44 = vmul.bf16 %v1217_v56, %v1025_v1  ;;  %v7656_v38 = vpop.f32.mrb[66].mxu1  ;;  %v1654_v15 = vmul.f32 0.5, %v7529_v34 }
 0x283   : > { %2419 = vmatmul.mubr.bf16.gmra.mrb[140].mxu1 %v1966_v50  ;;  %v1402_v9 = vunpack.c.h.bf16 %v7642_v10  ;;  %v1090_v61 = vmul.bf16 1027030327, %v962_v54  ;;  %v7663_v51 = vpop.f32.mrb[67].mxu1  ;;  %v5400_v50 = vpop.eup %5399  ;;  %v1655_v21 = vmul.f32 0.5, %v7535_v49  ;;  %v1026_v56 = vmul.bf16 1061961548, %v962_v54 }
 0x284   : > { %v1969_v1 = vpack.c.bf16 %v7348_v59, %v1881_v33  ;;  %v1403_v37 = vunpack.c.h.bf16 %v7652_v44  ;;  %v1782_v53 = vadd.f32 1.0, %v5400_v50  ;;  %v1091_v39 = vmul.bf16 1027030327, %v963_v12 }
 0x285   : > { %5409 = vtanh.f32 %v1402_v9  ;;  %v1154_v36 = vmul.bf16 %v1090_v61, %v962_v54  ;;  %v5402_v47 = vpop.eup %5401  ;;  %v1027_v34 = vmul.bf16 1061961548, %v963_v12  ;;  %v7670_v14 = vadd.f32 %v9908_v41, %v6290_v23 }
 0x286   : > { %2428 = vmatprep.mubr.bf16.mxu1 %v1969_v1  ;;  %5411 = vtanh.f32 %v1403_v37  ;;  %v7674_v49 = vadd.f32 %v9910_v35, %v6290_v23  ;;  %v7676_v33 = vmul.f32 %v1782_v53, %v1654_v15  ;;  %v1783_v6 = vadd.f32 1.0, %v5402_v47  ;;  %v9915_v15 = vld [vmem:[#allocation77_spill] sm:$0xff] }
 0x287   : > { %9909 = vst [vmem:[#allocation51_spill] sm:$0xff] %v7670_v14  ;;  %v5404_v59 = vpop.eup %5403  ;;  %v1218_v50 = vadd.bf16 1065369472, %v1154_v36  ;;  %v1155_v9 = vmul.bf16 %v1091_v39, %v963_v12  ;;  %v7680_v1 = vmul.f32 0.5, %v7519_v62  ;;  %v9912_v41 = vunpack.c.l.bf16 %v7362_v24  ;;  %v9913_v36 = vld [vmem:[#allocation73_spill] sm:$0xff] }
 0x288   : > { %9911 = vst [vmem:[#allocation26_spill] sm:$0xff] %v7676_v33  ;;  %v5406_v54 = vpop.eup %5405  ;;  %v1752_v37 = vadd.f32 1.0, %v5404_v59  ;;  %v7684_v45 = vmul.f32 %v1783_v6, %v1655_v21  ;;  %v7691_v12 = vadd.f32 %v9913_v36, %v6293_v25  ;;  %v964_v62 = vpack.c.bf16 %v7674_v49, %v7670_v14  ;;  %v9916_v21 = vld [vmem:[#allocation41_spill] sm:$0xff]  ;;  %v9919_v33 = vld [vmem:[#allocation40_spill] sm:$0xff] }
 0x289   : > { %5413 = vtanh.f32 %v9912_v41  ;;  %v1757_v35 = vadd.f32 1.0, %v5406_v54  ;;  %v7686_v27 = vmul.bf16 %v1218_v50, %v1026_v56  ;;  %v1219_v53 = vadd.bf16 1065369472, %v1155_v9  ;;  %v9917_v9 = vld [vmem:[#allocation38_spill] sm:$0xff] }
 0x28a   : > { %v1880_v47 = vmul.f32 %v1752_v37, %v7360_v42  ;;  %9914 = vst [vmem:[#allocation52_spill] sm:$0xff] %v7691_v12  ;;  %v7697_v39 = vadd.f32 %v9915_v15, %v6293_v25  ;;  %v7700_v6 = vmul.f32 0.5, %v7525_v3  ;;  %v1092_v41 = vmul.bf16 1027030327, %v964_v62  ;;  %v9918_v15 = vld [vmem:[#allocation39_spill] sm:$0xff] }
 0x28b   : > { %v1885_v56 = vmul.f32 %v1757_v35, %v9916_v21  ;;  %v1406_v59 = vunpack.c.h.bf16 %v7686_v27  ;;  %v7704_v42 = vmul.bf16 %v1219_v53, %v1027_v34  ;;  %v1658_v36 = vmul.f32 0.5, %v7585_v32  ;;  %v9920_v32 = vld [vmem:[#allocation32_spill] sm:$0xff] }
 0x28c   : > { %v5408_v24 = vpop.eup %5407  ;;  %v1968_v54 = vpack.c.bf16 %v9917_v9, %v1880_v47  ;;  %v1028_v21 = vmul.bf16 1061961548, %v964_v62  ;;  %v1156_v14 = vmul.bf16 %v1092_v41, %v964_v62  ;;  %v965_v34 = vpack.c.bf16 %v7697_v39, %v7691_v12 }
 0x28d   : > { %v1756_v37 = vadd.f32 1.0, %v5408_v24  ;;  %v1971_v61 = vpack.c.bf16 %v9918_v15, %v1885_v56  ;;  %5415 = vtanh.f32 %v1406_v59  ;;  %v1407_v3 = vunpack.c.h.bf16 %v7704_v42  ;;  %v9921_v56 = vld [vmem:[#allocation33_spill] sm:$0xff] }
 0x28e   : > { %2429 = vmatmul.mubr.bf16.gmra.mrb[144].mxu1 %v1968_v54  ;;  %v1659_v47 = vmul.f32 0.5, %v7589_v26  ;;  %v7717_v24 = vadd.f32 %v9920_v32, %v6290_v23  ;;  %v7721_v59 = vadd.f32 %v9921_v56, %v6290_v23  ;;  %v9922_v54 = vld [vmem:[#allocation37_spill] sm:$0xff]  ;;  %v1220_v41 = vadd.bf16 1065369472, %v1156_v14 }
 0x28f   : > { %v1884_v35 = vmul.f32 %v1756_v37, %v9919_v33  ;;  %v5410_v53 = vpop.eup %5409  ;;  %2438 = vmatprep.mubr.bf16.mxu1 %v1971_v61  ;;  %5417 = vtanh.f32 %v1407_v3  ;;  %v1093_v50 = vmul.bf16 1027030327, %v965_v34  ;;  %v9923_v26 = vunpack.c.l.bf16 %v7355_v29  ;;  %v9924_v61 = vld [vmem:[#allocation34_spill] sm:$0xff] }
 0x290   : > { %v5412_v9 = vpop.eup %5411  ;;  %v1786_v62 = vadd.f32 1.0, %v5410_v53  ;;  %v7729_v3 = vadd.f32 %v9924_v61, %v6293_v25  ;;  %v7733_v23 = vmul.bf16 %v1220_v41, %v1028_v21  ;;  %v1029_v56 = vmul.bf16 1061961548, %v965_v34  ;;  %v9928_v21 = vld [vmem:[#allocation35_spill] sm:$0xff] }
 0x291   : > { %v1970_v37 = vpack.c.bf16 %v9922_v54, %v1884_v35  ;;  %v1787_v15 = vadd.f32 1.0, %v5412_v9  ;;  %5419 = vtanh.f32 %v9923_v26  ;;  %v9927_v53 = vunpack.c.l.bf16 %v7402_v63  ;;  %v9929_v54 = vld [vmem:[#allocation43_spill] sm:$0xff]  ;;  %v2024_v26 = vld [vmem:[%s9672_s4] sm:$0x3] }
 0x292   : > { %9925 = vst [vmem:[#allocation53_spill] sm:$0xff] %v7729_v3  ;;  %v7731_v12 = vmul.f32 %v1786_v62, %v1658_v36  ;;  %v1157_v9 = vmul.bf16 %v1093_v50, %v965_v34  ;;  %v966_v29 = vpack.c.bf16 %v7721_v59, %v7717_v24  ;;  %v1410_v36 = vunpack.c.h.bf16 %v7733_v23 }
 0x293   : > { %v5414_v32 = vpop.eup %5413  ;;  %5421 = vtanh.f32 %v9927_v53  ;;  %v7737_v35 = vmul.f32 %v1787_v15, %v1659_v47  ;;  %v7746_v62 = vadd.f32 %v9928_v21, %v6293_v25  ;;  %v1662_v63 = vmul.f32 0.5, %v7629_v28 }
 0x294   : > { %9926 = vst [vmem:[#allocation64_spill] sm:$0xff] %v7731_v12  ;;  %v1761_v14 = vadd.f32 1.0, %v5414_v32  ;;  %v1221_v41 = vadd.bf16 1065369472, %v1157_v9  ;;  %v1094_v15 = vmul.bf16 1027030327, %v966_v29  ;;  %5423 = vtanh.f32 %v1410_v36 }
 0x295   : > { %v1663_v50 = vmul.f32 0.5, %v7635_v46  ;;  %v1030_v34 = vmul.bf16 1061961548, %v966_v29  ;;  %v967_v61 = vpack.c.bf16 %v7746_v62, %v7729_v3  ;;  %v7753_v32 = vpop.f32.mrb[68].mxu1  ;;  %v9931_v36 = vunpack.c.l.bf16 %v7455_v17 }
 0x296   : > { %v1889_v47 = vmul.f32 %v1761_v14, %v7488_v7  ;;  %2439 = vmatmul.mubr.bf16.gmra.mrb[148].mxu1 %v1970_v37  ;;  %v7756_v21 = vmul.bf16 %v1221_v41, %v1029_v56  ;;  %v1158_v28 = vmul.bf16 %v1094_v15, %v966_v29  ;;  %v9930_v7 = vunpack.c.l.bf16 %v7376_v5  ;;  %v7760_v14 = vpop.f32.mrb[69].mxu1 }
 0x297   : > { %v5416_v53 = vpop.eup %5415  ;;  %v1095_v9 = vmul.bf16 1027030327, %v967_v61  ;;  %v9932_v41 = vunpack.c.l.bf16 %v7451_v40 }
 0x298   : > { %v1973_v25 = vpack.c.bf16 %v9929_v54, %v1889_v47  ;;  %5425 = vtanh.f32 %v9930_v7  ;;  %v1790_v37 = vadd.f32 1.0, %v5416_v53  ;;  %v7768_v54 = vpop.f32.mrb[70].mxu1  ;;  %v1411_v5 = vunpack.c.h.bf16 %v7756_v21 }
 0x299   : > { %5427 = vtanh.f32 %v9931_v36  ;;  %v5418_v56 = vpop.eup %5417  ;;  %v1222_v29 = vadd.bf16 1065369472, %v1158_v28  ;;  %v1031_v47 = vmul.bf16 1061961548, %v967_v61  ;;  %v7773_v15 = vpop.f32.mrb[71].mxu1  ;;  %v1159_v7 = vmul.bf16 %v1095_v9, %v967_v61  ;;  %v9934_v28 = vld [vmem:[#allocation16_spill] sm:$0xff] }
 0x29a   : > { %2448 = vmatprep.mubr.bf16.mxu1 %v1973_v25  ;;  %5429 = vtanh.f32 %v9932_v41  ;;  %v7775_v53 = vmul.f32 %v1790_v37, %v1662_v63  ;;  %v1791_v17 = vadd.f32 1.0, %v5418_v56  ;;  %v9933_v36 = vunpack.c.l.bf16 %v7491_v0 }
 0x29b   : > { %v5420_v46 = vpop.eup %5419  ;;  %v7780_v25 = vmul.bf16 %v1222_v29, %v1030_v34  ;;  %v7783_v3 = vrot.slane %v2024_v26, %v9934_v28  ;;  %v1223_v63 = vadd.bf16 1065369472, %v1159_v7  ;;  %v9935_v37 = vunpack.c.l.bf16 %v7477_v58 }
 0x29c   : > { %5431 = vtanh.f32 %v9933_v36  ;;  %v7785_v41 = vmul.f32 %v1791_v17, %v1663_v50  ;;  %v1760_v12 = vadd.f32 1.0, %v5420_v46  ;;  %v1666_v0 = vmul.f32 0.5, %v7674_v49  ;;  %v7793_v34 = vpop.f32.mrb[72].mxu1  ;;  %v9939_v46 = vld [vmem:[#allocation17_spill] sm:$0xff] }
 0x29d   : > { %5433 = vtanh.f32 %v1411_v5  ;;  %v5422_v40 = vpop.eup %5421  ;;  %v1414_v9 = vunpack.c.h.bf16 %v7780_v25  ;;  %v9936_v56 = vunpack.c.l.bf16 %v7556_v48  ;;  %v9937_v5 = vld [vmem:[#allocation22_spill] sm:$0xff]  ;;  %v7796_v36 = vmul.bf16 %v1223_v63, %v1031_v47  ;;  %v7803_v17 = vpop.f32.mrb[73].mxu1 }
 0x29e   : > { %5435 = vtanh.f32 %v9935_v37  ;;  %v1765_v61 = vadd.f32 1.0, %v5422_v40  ;;  %v1888_v29 = vmul.f32 %v1760_v12, %v9937_v5  ;;  %v9938_v50 = vunpack.c.l.bf16 %v7541_v4  ;;  %v7814_v47 = vpop.f32.mrb[74].mxu1  ;;  %v5424_v4 = vpop.eup %5423 }
 0x29f   : > { %5437 = vtanh.f32 %v9936_v56  ;;  %v7801_v58 = vrot.slane %v2024_v26, %v9939_v46  ;;  %v7808_v48 = vadd.f32 %v7637_v16, %v7783_v3  ;;  %v7812_v12 = vadd.f32 %v7656_v38, %v7783_v3  ;;  %v9940_v26 = vld [vmem:[#allocation42_spill] sm:$0xff]  ;;  %v7821_v37 = vpop.f32.mrb[75].mxu1 }
 0x2a0   : > { %5439 = vtanh.f32 %v9938_v50  ;;  %v1893_v49 = vmul.f32 %v1765_v61, %v7506_v30  ;;  %v1667_v7 = vmul.f32 0.5, %v7697_v39  ;;  %v1972_v40 = vpack.c.bf16 %v9940_v26, %v1888_v29 }
 0x2a1   : > { %5441 = vtanh.f32 %v1414_v9  ;;  %v1415_v63 = vunpack.c.h.bf16 %v7796_v36  ;;  %v9941_v30 = vunpack.c.l.bf16 %v7596_v18  ;;  %v1794_v61 = vadd.f32 1.0, %v5424_v4 }
 0x2a2   : > { %v5426_v16 = vpop.eup %5425  ;;  %v1975_v9 = vpack.c.bf16 %v7475_v57, %v1893_v49  ;;  %v1670_v38 = vmul.f32 0.5, %v7721_v59  ;;  %v2549_v56 = vpack.c.bf16 %v7812_v12, %v7808_v48  ;;  %2449 = vmatmul.mubr.bf16.gmra.mrb[152].mxu1 %v1972_v40  ;;  %v7829_v29 = vadd.f32 %v7648_v2, %v7801_v58 }
 0x2a3   : > { %5443 = vtanh.f32 %v9941_v30  ;;  %v5428_v5 = vpop.eup %5427  ;;  %v1764_v39 = vadd.f32 1.0, %v5426_v16  ;;  %v7833_v18 = vadd.f32 %v7663_v51, %v7801_v58  ;;  %v7835_v4 = vmul.f32 %v1794_v61, %v1666_v0 }
 0x2a4   : > { %5445 = vtanh.f32 %v1415_v63  ;;  %v5430_v50 = vpop.eup %5429  ;;  %2458 = vmatprep.mubr.bf16.mxu1 %v1975_v9  ;;  %v1671_v57 = vmul.f32 0.5, %v7746_v62  ;;  %v1769_v59 = vadd.f32 1.0, %v5428_v5  ;;  %v2677_v49 = vmul.bf16 1027030327, %v2549_v56 }
 0x2a5   : > { %9942 = vst [vmem:[#allocation54_spill] sm:$0xff] %v7835_v4  ;;  %v1892_v40 = vmul.f32 %v1764_v39, %v7499_v20  ;;  %v1768_v63 = vadd.f32 1.0, %v5430_v50  ;;  %v2613_v30 = vmul.bf16 1061961548, %v2549_v56  ;;  %v2550_v2 = vpack.c.bf16 %v7833_v18, %v7829_v29 }
 0x2a6   : > { %v5432_v26 = vpop.eup %5431  ;;  %v1897_v51 = vmul.f32 %v1769_v59, %v7552_v43  ;;  %v2741_v46 = vmul.bf16 %v2677_v49, %v2549_v56  ;;  %v9943_v0 = vunpack.c.l.bf16 %v7576_v22  ;;  %v7850_v59 = vpop.f32.mrb[76].mxu1  ;;  %v9944_v49 = vld [vmem:[#allocation44_spill] sm:$0xff] }
 0x2a7   : > { %v5434_v16 = vpop.eup %5433  ;;  %v1773_v33 = vadd.f32 1.0, %v5432_v26  ;;  %v1974_v9 = vpack.c.bf16 %v7464_v11, %v1892_v40  ;;  %v1896_v5 = vmul.f32 %v1768_v63, %v7544_v55  ;;  %v2614_v20 = vmul.bf16 1061961548, %v2550_v2  ;;  %v7855_v40 = vpop.f32.mrb[77].mxu1 }
 0x2a8   : > { %5447 = vtanh.f32 %v9943_v0  ;;  %v5436_v61 = vpop.eup %5435  ;;  %v1795_v62 = vadd.f32 1.0, %v5434_v16  ;;  %v1977_v50 = vpack.c.bf16 %v7539_v19, %v1897_v51  ;;  %v2805_v43 = vadd.bf16 1065369472, %v2741_v46  ;;  %v7862_v63 = vpop.f32.mrb[78].mxu1 }
 0x2a9   : > { %v5438_v39 = vpop.eup %5437  ;;  %v7848_v28 = vmul.f32 %v1773_v33, %v7599_v60  ;;  %v1772_v4 = vadd.f32 1.0, %v5436_v61  ;;  %v1976_v26 = vpack.c.bf16 %v9944_v49, %v1896_v5  ;;  %v2678_v11 = vmul.bf16 1027030327, %v2550_v2  ;;  %v7869_v5 = vpop.f32.mrb[79].mxu1  ;;  %v9949_v49 = vld [vmem:[#allocation49_spill] sm:$0xff] }
 0x2aa   : > { %v5440_v56 = vpop.eup %5439  ;;  %v7852_v22 = vmul.f32 %v1795_v62, %v1667_v7  ;;  %v1777_v16 = vadd.f32 1.0, %v5438_v39  ;;  %v2869_v46 = vmul.bf16 %v2805_v43, %v2613_v30  ;;  %2459 = vmatmul.mubr.bf16.gmra.mrb[156].mxu1 %v1974_v9  ;;  %v9945_v62 = vunpack.c.l.bf16 %v7652_v44 }
 0x2ab   : > { %v5442_v55 = vpop.eup %5441  ;;  %v1979_v19 = vpack.c.bf16 %v7567_v52, %v7848_v28  ;;  %v7860_v60 = vmul.f32 %v1772_v4, %v7592_v8  ;;  %v1776_v33 = vadd.f32 1.0, %v5440_v56  ;;  %v2742_v61 = vmul.bf16 %v2678_v11, %v2550_v2  ;;  %2468 = vmatprep.mubr.bf16.mxu1 %v1977_v50  ;;  %v9946_v8 = vld [vmem:[#allocation50_spill] sm:$0xff] }
 0x2ac   : > { %v1798_v7 = vadd.f32 1.0, %v5442_v55  ;;  %v7865_v0 = vmul.f32 %v1777_v16, %v7659_v13  ;;  %5449 = vtanh.f32 %v9945_v62  ;;  %v2933_v30 = vunpack.c.l.bf16 %v2869_v46  ;;  %v9948_v13 = vld [vmem:[#allocation27_spill] sm:$0xff] }
 0x2ad   : > { %v5444_v51 = vpop.eup %5443  ;;  %v7874_v28 = vmul.f32 %v1776_v33, %v9946_v8  ;;  %v2935_v43 = vunpack.c.h.bf16 %v2869_v46  ;;  %v2806_v44 = vadd.bf16 1065369472, %v2742_v61  ;;  %v7893_v55 = vadd.f32 %v7760_v14, %v7801_v58  ;;  %v9953_v8 = vld [vmem:[#allocation46_spill] sm:$0xff] }
 0x2ae   : > { %v1781_v4 = vadd.f32 1.0, %v5444_v51  ;;  %v5446_v39 = vpop.eup %5445  ;;  %v7876_v9 = vmul.f32 %v1798_v7, %v1670_v38  ;;  %5451 = vtanh.f32 %v2933_v30  ;;  %v7889_v38 = vadd.f32 %v7753_v32, %v7783_v3  ;;  %v9952_v32 = vld [vmem:[#allocation45_spill] sm:$0xff]  ;;  %v7912_v62 = vpop.f32.mrb[80].mxu1  ;;  %v9954_v30 = vld [vmem:[#allocation47_spill] sm:$0xff]  ;;  %v9958_v51 = vld [vmem:[#allocation52_spill] sm:$0xff] }
 0x2af   : > { %v1799_v56 = vadd.f32 1.0, %v5446_v39  ;;  %5453 = vtanh.f32 %v2935_v43  ;;  %v7885_v11 = vmul.bf16 %v2806_v44, %v2614_v20  ;;  %9950 = vst [vmem:[#allocation19_spill] sm:$0xff] %v7893_v55  ;;  %v7905_v20 = vadd.f32 %v7773_v15, %v7801_v58  ;;  %v7922_v43 = vpop.f32.mrb[81].mxu1  ;;  %v9955_v44 = vld [vmem:[#allocation48_spill] sm:$0xff] }
 0x2b0   : > { %9947 = vst [vmem:[#allocation55_spill] sm:$0xff] %v7876_v9  ;;  %v7883_v16 = vmul.f32 %v1781_v4, %v7700_v6  ;;  %v7901_v6 = vadd.f32 %v7768_v54, %v7783_v3  ;;  %v7908_v7 = vmul.f32 0.5, %v9952_v32  ;;  %v1405_v14 = vunpack.c.l.bf16 %v7704_v42  ;;  %v7931_v32 = vpop.f32.mrb[82].mxu1 }
 0x2b1   : > { %v7895_v46 = vmul.f32 %v1799_v56, %v1671_v57  ;;  %v2936_v61 = vunpack.c.h.bf16 %v7885_v11  ;;  %v1657_v4 = vmul.f32 0.5, %v9953_v8  ;;  %v7916_v39 = vmul.f32 0.5, %v9954_v30  ;;  %v9956_v8 = vld [vmem:[#allocation51_spill] sm:$0xff] }
 0x2b2   : > { %v5448_v33 = vpop.eup %5447  ;;  %v2551_v54 = vpack.c.bf16 %v7901_v6, %v7889_v38  ;;  %v2552_v15 = vpack.c.bf16 %v7905_v20, %v7893_v55  ;;  %v7925_v42 = vmul.f32 0.5, %v9955_v44  ;;  %v1404_v56 = vunpack.c.l.bf16 %v7686_v27  ;;  %2469 = vmatmul.mubr.bf16.gmra.mrb[160].mxu1 %v1976_v26  ;;  %v9960_v26 = vld [vmem:[#allocation26_spill] sm:$0xff] }
 0x2b3   : > { %9951 = vst [vmem:[#allocation21_spill] sm:$0xff] %v7895_v46  ;;  %v1780_v57 = vadd.f32 1.0, %v5448_v33  ;;  %5455 = vtanh.f32 %v2936_v61  ;;  %v7934_v30 = vmul.f32 0.5, %v9956_v8  ;;  %v7937_v50 = vmul.f32 0.5, %v9958_v51  ;;  %2478 = vmatprep.mubr.bf16.mxu1 %v1979_v19 }
 0x2b4   : > { %v2679_v2 = vmul.bf16 1027030327, %v2551_v54  ;;  %v9959_v44 = vunpack.c.l.bf16 %v7642_v10  ;;  %v3189_v27 = vmul.f32 0.5, %v7808_v48  ;;  %v2680_v61 = vmul.bf16 1027030327, %v2552_v15 }
 0x2b5   : > { %v7929_v33 = vmul.f32 %v1780_v57, %v7680_v1  ;;  %9957 = vst [vmem:[#allocation18_spill] sm:$0xff] %v7934_v30  ;;  %v7944_v57 = vpop.f32.mrb[83].mxu1  ;;  %v7948_v51 = vadd.f32 %v7793_v34, %v7783_v3  ;;  %v7952_v10 = vadd.f32 %v7814_v47, %v7783_v3  ;;  %v7956_v48 = vadd.f32 %v7803_v17, %v7801_v58 }
 0x2b6   : > { %5457 = vtanh.f32 %v9959_v44  ;;  %v5450_v52 = vpop.eup %5449  ;;  %v2743_v9 = vmul.bf16 %v2679_v2, %v2551_v54  ;;  %v2744_v19 = vmul.bf16 %v2680_v61, %v2552_v15  ;;  %v2615_v44 = vmul.bf16 1061961548, %v2551_v54  ;;  %v7968_v55 = vpop.f32.mrb[84].mxu1 }
 0x2b7   : > { %5459 = vtanh.f32 %v1405_v14  ;;  %v1785_v8 = vadd.f32 1.0, %v5450_v52  ;;  %9961 = vst [vmem:[#allocation20_spill] sm:$0xff] %v7956_v48  ;;  %v7960_v14 = vadd.f32 %v7821_v37, %v7801_v58  ;;  %v2553_v1 = vpack.c.bf16 %v7952_v10, %v7948_v51 }
 0x2b8   : > { %5461 = vtanh.f32 %v1404_v56  ;;  %v5452_v52 = vpop.eup %5451  ;;  %v2807_v34 = vadd.bf16 1065369472, %v2743_v9  ;;  %v2616_v61 = vmul.bf16 1061961548, %v2552_v15  ;;  %v2808_v30 = vadd.bf16 1065369472, %v2744_v19 }
 0x2b9   : > { %v7962_v2 = vmul.f32 %v1785_v8, %v1657_v4  ;;  %v5454_v47 = vpop.eup %5453  ;;  %v3317_v46 = vadd.f32 1.0, %v5452_v52  ;;  %v2554_v17 = vpack.c.bf16 %v7960_v14, %v7956_v48  ;;  %v3191_v37 = vmul.f32 0.5, %v7812_v12  ;;  %v7975_v9 = vpop.f32.mrb[85].mxu1 }
 0x2ba   : > { %v3319_v56 = vadd.f32 1.0, %v5454_v47  ;;  %v7973_v54 = vmul.bf16 %v2807_v34, %v2615_v44  ;;  %9962 = vst [vmem:[#allocation60_spill] sm:$0xff] %v7975_v9  ;;  %v7978_v8 = vmul.f32 0.5, %v7717_v24  ;;  %v9964_v15 = vpack.c.bf16 %v7565_v31, %v7860_v60  ;;  %v7987_v47 = vpop.f32.mrb[86].mxu1 }
 0x2bb   : > { %v7983_v19 = vmul.f32 %v3317_v46, %v3189_v27  ;;  %v7985_v52 = vmul.bf16 %v2808_v30, %v2616_v61  ;;  %v2681_v12 = vmul.bf16 1027030327, %v2553_v1  ;;  %9965 = vst [vmem:[#allocation57_spill] sm:$0xff] %v7987_v47  ;;  %v1409_v4 = vunpack.c.l.bf16 %v7756_v21  ;;  %v7996_v31 = vpop.f32.mrb[87].mxu1 }
 0x2bc   : > { %9963 = vst [vmem:[#allocation56_spill] sm:$0xff] %v7978_v8  ;;  %2479 = vmatmul.mubr.bf16.gmra.mrb[164].mxu1 %v9964_v15  ;;  %v9966_v44 = vpack.c.bf16 %v9948_v13, %v7865_v0  ;;  %v7993_v34 = vmul.f32 %v3319_v56, %v3191_v37  ;;  %v2939_v24 = vunpack.c.h.bf16 %v7973_v54  ;;  %v2682_v8 = vmul.bf16 1027030327, %v2554_v17  ;;  %9967 = vst [vmem:[#allocation58_spill] sm:$0xff] %v7996_v31 }
 0x2bd   : > { %v5456_v60 = vpop.eup %5455  ;;  %v3192_v46 = vmul.f32 0.5, %v7833_v18  ;;  %v2940_v30 = vunpack.c.h.bf16 %v7985_v52  ;;  %v2617_v27 = vmul.bf16 1061961548, %v2553_v1  ;;  %v2745_v61 = vmul.bf16 %v2681_v12, %v2553_v1 }
 0x2be   : > { %2488 = vmatprep.mubr.bf16.mxu1 %v9966_v44  ;;  %v3320_v0 = vadd.f32 1.0, %v5456_v60  ;;  %5463 = vtanh.f32 %v2939_v24  ;;  %v2746_v13 = vmul.bf16 %v2682_v8, %v2554_v17  ;;  %v2618_v9 = vmul.bf16 1061961548, %v2554_v17 }
 0x2bf   : > { %5465 = vtanh.f32 %v2940_v30  ;;  %v2809_v44 = vadd.bf16 1065369472, %v2745_v61  ;;  %v1408_v1 = vunpack.c.l.bf16 %v7733_v23  ;;  %v8012_v8 = vadd.f32 %v7862_v63, %v7783_v3 }
 0x2c0   : > { %v5458_v15 = vpop.eup %5457  ;;  %v8002_v31 = vmul.f32 %v3320_v0, %v3192_v46  ;;  %v2810_v18 = vadd.bf16 1065369472, %v2746_v13  ;;  %5467 = vtanh.f32 %v1409_v4  ;;  %v8021_v4 = vadd.f32 %v7869_v5, %v7801_v58 }
 0x2c1   : > { %v5460_v37 = vpop.eup %5459  ;;  %v1784_v56 = vadd.f32 1.0, %v5458_v15  ;;  %v8008_v21 = vmul.bf16 %v2809_v44, %v2617_v27  ;;  %v9968_v23 = vpack.c.bf16 %v9949_v49, %v7874_v28  ;;  %v1413_v5 = vunpack.c.l.bf16 %v7796_v36 }
 0x2c2   : > { %v1789_v48 = vadd.f32 1.0, %v5460_v37  ;;  %v5462_v47 = vpop.eup %5461  ;;  %v8017_v17 = vmul.bf16 %v2810_v18, %v2618_v9  ;;  %v9970_v9 = vpack.c.bf16 %v7684_v45, %v7883_v16  ;;  %v8054_v45 = vpop.f32.mrb[88].mxu1  ;;  %v2934_v27 = vunpack.c.l.bf16 %v7885_v11 }
 0x2c3   : > { %v8006_v12 = vmul.f32 %v1784_v56, %v7908_v7  ;;  %v1788_v60 = vadd.f32 1.0, %v5462_v47  ;;  %v9969_v7 = vld [vmem:[#allocation64_spill] sm:$0xff]  ;;  %v2943_v63 = vunpack.c.h.bf16 %v8008_v21  ;;  %v8060_v61 = vpop.f32.mrb[89].mxu1  ;;  %v3195_v15 = vmul.f32 0.5, %v7901_v6 }
 0x2c4   : > { %v8015_v24 = vmul.f32 %v1789_v48, %v7925_v42  ;;  %2489 = vmatmul.mubr.bf16.gmra.mrb[168].mxu1 %v9968_v23  ;;  %v8031_v42 = vadd.f32 %v7850_v59, %v7783_v3  ;;  %v8035_v48 = vadd.f32 %v7855_v40, %v7801_v58  ;;  %v2944_v49 = vunpack.c.h.bf16 %v8017_v17  ;;  %v9971_v59 = vld [vmem:[#allocation53_spill] sm:$0xff]  ;;  %v8068_v11 = vpop.f32.mrb[90].mxu1 }
 0x2c5   : > { %2498 = vmatprep.mubr.bf16.mxu1 %v9970_v9  ;;  %v8045_v47 = vmul.f32 %v1788_v60, %v7916_v39  ;;  %v8048_v30 = vmul.f32 0.5, %v9971_v59  ;;  %5469 = vtanh.f32 %v2943_v63  ;;  %v3196_v0 = vmul.f32 0.5, %v7905_v20 }
 0x2c6   : > { %v2555_v40 = vpack.c.bf16 %v8012_v8, %v8031_v42  ;;  %v2556_v36 = vpack.c.bf16 %v8021_v4, %v8035_v48  ;;  %5471 = vtanh.f32 %v2944_v49  ;;  %v8066_v18 = vadd.f32 %v7912_v62, %v7783_v3 }
 0x2c7   : > { %5473 = vtanh.f32 %v1408_v1  ;;  %v8072_v6 = vadd.f32 %v7931_v32, %v7783_v3  ;;  %v8076_v20 = vadd.f32 %v7944_v57, %v7801_v58  ;;  %v8078_v1 = vpop.f32.mrb[91].mxu1  ;;  %v8082_v62 = vadd.f32 %v7922_v43, %v7801_v58 }
 0x2c8   : > { %v2683_v13 = vmul.bf16 1027030327, %v2555_v40  ;;  %v5464_v37 = vpop.eup %5463  ;;  %v2619_v56 = vmul.bf16 1061961548, %v2555_v40  ;;  %v2684_v44 = vmul.bf16 1027030327, %v2556_v36  ;;  %5475 = vtanh.f32 %v1413_v5 }
 0x2c9   : > { %v5466_v60 = vpop.eup %5465  ;;  %v3323_v23 = vadd.f32 1.0, %v5464_v37  ;;  %9972 = vst [vmem:[#allocation68_spill] sm:$0xff] %v8082_v62  ;;  %5477 = vtanh.f32 %v2934_v27  ;;  %v9973_v59 = vpack.c.bf16 %v9960_v26, %v7929_v33  ;;  %v2557_v57 = vpack.c.bf16 %v8072_v6, %v8066_v18 }
 0x2ca   : > { %v2747_v63 = vmul.bf16 %v2683_v13, %v2555_v40  ;;  %v5468_v5 = vpop.eup %5467  ;;  %v3324_v9 = vadd.f32 1.0, %v5466_v60  ;;  %v2748_v49 = vmul.bf16 %v2684_v44, %v2556_v36  ;;  %v9974_v37 = vpack.c.bf16 %v7737_v35, %v7962_v2 }
 0x2cb   : > { %v8087_v32 = vmul.f32 %v3323_v23, %v3195_v15  ;;  %v1793_v40 = vadd.f32 1.0, %v5468_v5  ;;  %v2620_v43 = vmul.bf16 1061961548, %v2556_v36  ;;  %v2558_v27 = vpack.c.bf16 %v8076_v20, %v8082_v62 }
 0x2cc   : > { %2499 = vmatmul.mubr.bf16.gmra.mrb[172].mxu1 %v9973_v59  ;;  %v2811_v13 = vadd.bf16 1065369472, %v2747_v63  ;;  %v8094_v44 = vmul.f32 %v3324_v9, %v3196_v0  ;;  %v2812_v60 = vadd.bf16 1065369472, %v2748_v49  ;;  %v3190_v33 = vmul.f32 0.5, %v7829_v29  ;;  %v8104_v63 = vpop.f32.mrb[92].mxu1 }
 0x2cd   : > { %2508 = vmatprep.mubr.bf16.mxu1 %v9974_v37  ;;  %v8100_v26 = vmul.f32 %v1793_v40, %v7937_v50  ;;  %v2685_v23 = vmul.bf16 1027030327, %v2557_v57  ;;  %v8107_v35 = vmul.f32 0.5, %v7889_v38  ;;  %v3199_v2 = vmul.f32 0.5, %v7952_v10  ;;  %v8112_v5 = vpop.f32.mrb[93].mxu1 }
 0x2ce   : > { %v8102_v15 = vmul.bf16 %v2811_v13, %v2619_v56  ;;  %v8110_v36 = vmul.bf16 %v2812_v60, %v2620_v43  ;;  %v2686_v0 = vmul.bf16 1027030327, %v2558_v27  ;;  %v3200_v29 = vmul.f32 0.5, %v7960_v14  ;;  %v8118_v59 = vpop.f32.mrb[94].mxu1 }
 0x2cf   : > { %v5470_v9 = vpop.eup %5469  ;;  %v2749_v49 = vmul.bf16 %v2685_v23, %v2557_v57  ;;  %v2621_v13 = vmul.bf16 1061961548, %v2557_v57  ;;  %v8121_v43 = vpop.f32.mrb[95].mxu1  ;;  %v2622_v28 = vmul.bf16 1061961548, %v2558_v27 }
 0x2d0   : > { %v2947_v56 = vunpack.c.h.bf16 %v8102_v15  ;;  %v5472_v38 = vpop.eup %5471  ;;  %v3327_v40 = vadd.f32 1.0, %v5470_v9  ;;  %v2948_v10 = vunpack.c.h.bf16 %v8110_v36  ;;  %v2750_v37 = vmul.bf16 %v2686_v0, %v2558_v27  ;;  %v9977_v27 = vld [vmem:[#allocation19_spill] sm:$0xff] }
 0x2d1   : > { %v5474_v60 = vpop.eup %5473  ;;  %v3328_v39 = vadd.f32 1.0, %v5472_v38  ;;  %v2813_v14 = vadd.bf16 1065369472, %v2749_v49  ;;  %v9975_v9 = vpack.c.bf16 %v9969_v7, %v8006_v12  ;;  %v9976_v38 = vunpack.c.l.bf16 %v7780_v25  ;;  %v9979_v12 = vld [vmem:[#allocation18_spill] sm:$0xff] }
 0x2d2   : > { %5479 = vtanh.f32 %v2947_v56  ;;  %v5476_v16 = vpop.eup %5475  ;;  %v8123_v50 = vmul.f32 %v3327_v40, %v3199_v2  ;;  %v1792_v23 = vadd.f32 1.0, %v5474_v60  ;;  %v2814_v46 = vadd.bf16 1065369472, %v2750_v37 }
 0x2d3   : > { %5481 = vtanh.f32 %v2948_v10  ;;  %v8128_v62 = vmul.f32 %v3328_v39, %v3200_v29  ;;  %v1797_v57 = vadd.f32 1.0, %v5476_v16  ;;  %v8130_v0 = vmul.bf16 %v2813_v14, %v2621_v13  ;;  %v5478_v56 = vpop.eup %5477  ;;  %v9983_v14 = vld [vmem:[#allocation20_spill] sm:$0xff] }
 0x2d4   : > { %2509 = vmatmul.mubr.bf16.gmra.mrb[176].mxu1 %v9975_v9  ;;  %5483 = vtanh.f32 %v9976_v38  ;;  %v8135_v49 = vmul.f32 0.5, %v9977_v27  ;;  %v9978_v2 = vpack.c.bf16 %v7785_v41, %v8015_v24  ;;  %v8141_v40 = vmul.f32 0.5, %v7948_v51  ;;  %v9980_v41 = vld [vmem:[#allocation54_spill] sm:$0xff] }
 0x2d5   : > { %v8144_v7 = vmul.f32 %v1792_v23, %v9979_v12  ;;  %v8146_v16 = vmul.bf16 %v2814_v46, %v2622_v28  ;;  %v2938_v39 = vunpack.c.l.bf16 %v7985_v52  ;;  %v8150_v25 = vmul.f32 %v1797_v57, %v8048_v30  ;;  %v9981_v46 = vld [vmem:[#allocation21_spill] sm:$0xff]  ;;  %v9984_v23 = vld [vmem:[#allocation60_spill] sm:$0xff] }
 0x2d6   : > { %2518 = vmatprep.mubr.bf16.mxu1 %v9978_v2  ;;  %v2951_v29 = vunpack.c.h.bf16 %v8130_v0  ;;  %v3318_v10 = vadd.f32 1.0, %v5478_v56  ;;  %v2937_v13 = vunpack.c.l.bf16 %v7973_v54  ;;  %v8159_v37 = vadd.f32 %v7968_v55, %v7783_v3  ;;  %v9982_v30 = vld [vmem:[#allocation57_spill] sm:$0xff]  ;;  %v9986_v55 = vld [vmem:[#allocation58_spill] sm:$0xff]  ;;  %v8182_v27 = vpop.f32.mrb[96].mxu1  ;;  %v9992_v52 = vld [vmem:[#allocation56_spill] sm:$0xff] }
 0x2d7   : > { %v2952_v51 = vunpack.c.h.bf16 %v8146_v16  ;;  %v8165_v60 = vadd.f32 %v9982_v30, %v7783_v3  ;;  %v8168_v54 = vmul.f32 0.5, %v9983_v14  ;;  %v8172_v9 = vadd.f32 %v9984_v23, %v7801_v58 }
 0x2d8   : > { %5485 = vtanh.f32 %v2951_v29  ;;  %v3446_v28 = vmul.f32 %v3318_v10, %v3190_v33  ;;  %v8176_v57 = vadd.f32 %v9986_v55, %v7801_v58  ;;  %v2942_v2 = vunpack.c.l.bf16 %v8017_v17  ;;  %v8188_v10 = vpop.f32.mrb[97].mxu1 }
 0x2d9   : > { %5487 = vtanh.f32 %v2952_v51  ;;  %9985 = vst [vmem:[#allocation59_spill] sm:$0xff] %v8172_v9  ;;  %v2559_v56 = vpack.c.bf16 %v8165_v60, %v8159_v37  ;;  %v3203_v12 = vmul.f32 0.5, %v8012_v8  ;;  %v8196_v17 = vadd.f32 %v8054_v45, %v7783_v3 }
 0x2da   : > { %v3574_v33 = vpack.c.bf16 %v8002_v31, %v3446_v28  ;;  %5489 = vtanh.f32 %v2938_v39  ;;  %v2560_v29 = vpack.c.bf16 %v8176_v57, %v8172_v9  ;;  %v9987_v31 = vpack.c.bf16 %v7775_v53, %v8045_v47 }
 0x2db   : > { %5491 = vtanh.f32 %v2937_v13  ;;  %v3204_v28 = vmul.f32 0.5, %v8021_v4  ;;  %v2687_v39 = vmul.bf16 1027030327, %v2559_v56  ;;  %9988 = vst [vmem:[#allocation70_spill] sm:$0xff] %v8196_v17  ;;  %v8200_v8 = vadd.f32 %v8068_v11, %v7783_v3  ;;  %v8202_v13 = vpop.f32.mrb[98].mxu1 }
 0x2dc   : > { %v5480_v51 = vpop.eup %5479  ;;  %2519 = vmatmul.mubr.bf16.gmra.mrb[180].mxu1 %v9987_v31  ;;  %3873 = vmatprep.mubr.bf16.mxu0 %v3574_v33  ;;  %v9989_v14 = vpack.c.bf16 %v7852_v22, %v8100_v26  ;;  %v9990_v4 = vpack.c.bf16 %v7993_v34, %v7983_v19  ;;  %v2688_v47 = vmul.bf16 1027030327, %v2560_v29  ;;  %v8212_v45 = vadd.f32 %v8060_v61, %v7801_v58  ;;  %v8218_v23 = vpop.f32.mrb[99].mxu1 }
 0x2dd   : > { %v5482_v30 = vpop.eup %5481  ;;  %v3331_v53 = vadd.f32 1.0, %v5480_v51  ;;  %v8216_v11 = vadd.f32 %v8078_v1, %v7801_v58  ;;  %v3207_v22 = vmul.f32 0.5, %v8072_v6  ;;  %v2751_v26 = vmul.bf16 %v2687_v39, %v2559_v56 }
 0x2de   : > { %2528 = vmatprep.mubr.bf16.mxu1 %v9989_v14  ;;  %3874 = vmatmul.mubr.bf16.vlgmr.msra.gmra.mrb[64].mxu0 %v9990_v4  ;;  %9991 = vst [vmem:[#allocation61_spill] sm:$0xff] %v8212_v45  ;;  %v5484_v55 = vpop.eup %5483  ;;  %v3332_v33 = vadd.f32 1.0, %v5482_v30  ;;  %v2561_v19 = vpack.c.bf16 %v8200_v8, %v8196_v17  ;;  %v2752_v31 = vmul.bf16 %v2688_v47, %v2560_v29  ;;  %v2623_v1 = vmul.bf16 1061961548, %v2559_v56 }
 0x2df   : > { %v8223_v34 = vmul.f32 %v3331_v53, %v3203_v12  ;;  %v1796_v51 = vadd.f32 1.0, %v5484_v55  ;;  %v2562_v61 = vpack.c.bf16 %v8216_v11, %v8212_v45  ;;  %v2815_v4 = vadd.bf16 1065369472, %v2751_v26  ;;  %v9993_v45 = vld [vmem:[#allocation55_spill] sm:$0xff] }
 0x2e0   : > { %v8227_v14 = vmul.f32 %v3332_v33, %v3204_v28  ;;  %v2689_v38 = vmul.bf16 1027030327, %v2561_v19  ;;  %v2624_v24 = vmul.bf16 1061961548, %v2560_v29  ;;  %v2816_v6 = vadd.bf16 1065369472, %v2752_v31 }
 0x2e1   : > { %v1924_v30 = vmul.f32 %v1796_v51, %v9992_v52  ;;  %v2690_v39 = vmul.bf16 1027030327, %v2562_v61  ;;  %v3208_v17 = vmul.f32 0.5, %v8076_v20  ;;  %v8231_v12 = vmul.bf16 %v2815_v4, %v2623_v1 }
 0x2e2   : > { %v5486_v9 = vpop.eup %5485  ;;  %v2753_v53 = vmul.bf16 %v2689_v38, %v2561_v19  ;;  %5493 = vtanh.f32 %v2942_v2  ;;  %v8234_v33 = vmul.bf16 %v2816_v6, %v2624_v24  ;;  %v9994_v52 = vpack.c.bf16 %v9980_v41, %v8144_v7 }
 0x2e3   : > { %v5488_v47 = vpop.eup %5487  ;;  %v3335_v55 = vadd.f32 1.0, %v5486_v9  ;;  %v1990_v28 = vpack.c.bf16 %v9993_v45, %v1924_v30  ;;  %v2754_v56 = vmul.bf16 %v2690_v39, %v2562_v61  ;;  %v2955_v51 = vunpack.c.h.bf16 %v8231_v12 }
 0x2e4   : > { %v5490_v26 = vpop.eup %5489  ;;  %2529 = vmatmul.mubr.bf16.gmra.mrb[184].mxu1 %v9994_v52  ;;  %v3336_v29 = vadd.f32 1.0, %v5488_v47  ;;  %v2625_v20 = vmul.bf16 1061961548, %v2561_v19  ;;  %v2817_v31 = vadd.bf16 1065369472, %v2753_v53  ;;  %v2946_v38 = vunpack.c.l.bf16 %v8110_v36 }
 0x2e5   : > { %v5492_v1 = vpop.eup %5491  ;;  %v9995_v9 = vpack.c.bf16 %v9981_v46, %v8150_v25  ;;  %v8244_v24 = vmul.f32 %v3335_v55, %v3207_v22  ;;  %v2956_v2 = vunpack.c.h.bf16 %v8234_v33  ;;  %v3322_v45 = vadd.f32 1.0, %v5490_v26 }
 0x2e6   : > { %v8247_v4 = vmul.f32 %v3336_v29, %v3208_v17  ;;  %5495 = vtanh.f32 %v2955_v51  ;;  %v3321_v7 = vadd.f32 1.0, %v5492_v1  ;;  %v8249_v41 = vmul.bf16 %v2817_v31, %v2625_v20 }
 0x2e7   : > { %2538 = vmatprep.mubr.bf16.mxu1 %v9995_v9  ;;  %5497 = vtanh.f32 %v2956_v2  ;;  %v3450_v19 = vmul.f32 %v3322_v45, %v8135_v49  ;;  %v2626_v30 = vmul.bf16 1061961548, %v2562_v61  ;;  %v2818_v36 = vadd.bf16 1065369472, %v2754_v56 }
 0x2e8   : > { %v2945_v6 = vunpack.c.l.bf16 %v8102_v15  ;;  %v3449_v25 = vmul.f32 %v3321_v7, %v8107_v35  ;;  %v2959_v46 = vunpack.c.h.bf16 %v8249_v41  ;;  %v9996_v22 = vunpack.c.l.bf16 %v8008_v21 }
 0x2e9   : > { %v3576_v17 = vpack.c.bf16 %v8094_v44, %v3450_v19  ;;  %v8258_v39 = vmul.bf16 %v2818_v36, %v2626_v30  ;;  %v8262_v53 = vadd.f32 %v8104_v63, %v7783_v3  ;;  %v8266_v49 = vadd.f32 %v8112_v5, %v7801_v58 }
 0x2ea   : > { %5499 = vtanh.f32 %v9996_v22  ;;  %v3575_v15 = vpack.c.bf16 %v8087_v32, %v3449_v25  ;;  %v8271_v35 = vadd.f32 %v8118_v59, %v7783_v3  ;;  %v8275_v21 = vadd.f32 %v8121_v43, %v7801_v58 }
 0x2eb   : > { %5501 = vtanh.f32 %v2959_v46  ;;  %v8278_v44 = vmul.f32 0.5, %v8031_v42  ;;  %v8281_v63 = vmul.f32 0.5, %v8035_v48  ;;  %3883 = vmatprep.mubr.bf16.mxu0 %v3576_v17  ;;  %v2960_v5 = vunpack.c.h.bf16 %v8258_v39  ;;  %v8292_v48 = vpop.f32.mrb[100].mxu1  ;;  %v9997_v46 = vld [vmem:[#allocation68_spill] sm:$0xff] }
 0x2ec   : > { %5503 = vtanh.f32 %v2946_v38  ;;  %v5494_v32 = vpop.eup %5493  ;;  %v8285_v61 = vmul.f32 0.5, %v8066_v18  ;;  %v2950_v59 = vunpack.c.l.bf16 %v8146_v16  ;;  %2539 = vmatmul.mubr.bf16.gmra.mrb[188].mxu1 %v1990_v28  ;;  %3884 = vmatmul.mubr.bf16.gmra.mrb[68].mxu0 %v3575_v15  ;;  %v2563_v43 = vpack.c.bf16 %v8271_v35, %v8262_v53  ;;  %v8296_v18 = vpop.f32.mrb[101].mxu1 }
 0x2ed   : > { %v2564_v42 = vpack.c.bf16 %v8275_v21, %v8266_v49  ;;  %v2949_v47 = vunpack.c.l.bf16 %v8130_v0  ;;  %v3211_v55 = vmul.f32 0.5, %v8165_v60  ;;  %5505 = vtanh.f32 %v2960_v5  ;;  %v8308_v60 = vpop.f32.mrb[102].mxu1 }
 0x2ee   : > { %v3326_v56 = vadd.f32 1.0, %v5494_v32  ;;  %v3212_v16 = vmul.f32 0.5, %v8176_v57  ;;  %v2691_v28 = vmul.bf16 1027030327, %v2563_v43  ;;  %5507 = vtanh.f32 %v2945_v6 }
 0x2ef   : > { %v8301_v26 = vadd.f32 %v8182_v27, %v7783_v3  ;;  %v2627_v29 = vmul.bf16 1061961548, %v2563_v43  ;;  %v2692_v51 = vmul.bf16 1027030327, %v2564_v42  ;;  %v8306_v0 = vadd.f32 %v8188_v10, %v7801_v58 }
 0x2f0   : > { %v3454_v52 = vmul.f32 %v3326_v56, %v8168_v54  ;;  %v5496_v20 = vpop.eup %5495  ;;  %v2755_v31 = vmul.bf16 %v2691_v28, %v2563_v43  ;;  %v8312_v57 = vadd.f32 %v8202_v13, %v7783_v3  ;;  %v8316_v27 = vadd.f32 %v8218_v23, %v7801_v58  ;;  %v8318_v54 = vpop.f32.mrb[103].mxu1 }
 0x2f1   : > { %5509 = vtanh.f32 %v2950_v59  ;;  %v5498_v1 = vpop.eup %5497  ;;  %v3339_v38 = vadd.f32 1.0, %v5496_v20  ;;  %v2756_v9 = vmul.bf16 %v2692_v51, %v2564_v42  ;;  %v2628_v19 = vmul.bf16 1061961548, %v2564_v42 }
 0x2f2   : > { %v3578_v10 = vpack.c.bf16 %v8128_v62, %v3454_v52  ;;  %5511 = vtanh.f32 %v2949_v47  ;;  %v3340_v45 = vadd.f32 1.0, %v5498_v1  ;;  %v2819_v7 = vadd.bf16 1065369472, %v2755_v31 }
 0x2f3   : > { %v2565_v13 = vpack.c.bf16 %v8312_v57, %v8301_v26  ;;  %v8323_v30 = vmul.f32 %v3339_v38, %v3211_v55  ;;  %v2820_v36 = vadd.bf16 1065369472, %v2756_v9  ;;  %v2566_v6 = vpack.c.bf16 %v8316_v27, %v8306_v0 }
 0x2f4   : > { %v5500_v2 = vpop.eup %5499  ;;  %3893 = vmatprep.mubr.bf16.mxu0 %v3578_v10  ;;  %v3206_v62 = vmul.f32 0.5, %v9997_v46  ;;  %v8328_v22 = vmul.f32 %v3340_v45, %v3212_v16  ;;  %v8330_v17 = vmul.bf16 %v2819_v7, %v2627_v29  ;;  %v3215_v32 = vmul.f32 0.5, %v8200_v8 }
 0x2f5   : > { %v3325_v23 = vadd.f32 1.0, %v5500_v2  ;;  %v5502_v25 = vpop.eup %5501  ;;  %v2693_v15 = vmul.bf16 1027030327, %v2565_v13  ;;  %v8334_v42 = vmul.bf16 %v2820_v36, %v2628_v19  ;;  %v3216_v47 = vmul.f32 0.5, %v8216_v11 }
 0x2f6   : > { %v5504_v5 = vpop.eup %5503  ;;  %v3343_v59 = vadd.f32 1.0, %v5502_v25  ;;  %v2963_v55 = vunpack.c.h.bf16 %v8330_v17  ;;  %v2629_v20 = vmul.bf16 1061961548, %v2565_v13  ;;  %v8344_v11 = vmul.f32 0.5, %v8159_v37 }
 0x2f7   : > { %v3453_v43 = vmul.f32 %v3325_v23, %v8141_v40  ;;  %v3330_v56 = vadd.f32 1.0, %v5504_v5  ;;  %v2757_v28 = vmul.bf16 %v2693_v15, %v2565_v13  ;;  %v5506_v52 = vpop.eup %5505  ;;  %v2964_v51 = vunpack.c.h.bf16 %v8334_v42 }
 0x2f8   : > { %v8338_v16 = vmul.f32 %v3343_v59, %v3215_v32  ;;  %v5508_v8 = vpop.eup %5507  ;;  %v3344_v31 = vadd.f32 1.0, %v5506_v52  ;;  %5513 = vtanh.f32 %v2963_v55  ;;  %v2694_v10 = vmul.bf16 1027030327, %v2566_v6  ;;  %v9998_v59 = vld [vmem:[#allocation59_spill] sm:$0xff] }
 0x2f9   : > { %v3577_v29 = vpack.c.bf16 %v8123_v50, %v3453_v43  ;;  %v3458_v40 = vmul.f32 %v3330_v56, %v8281_v63  ;;  %v2821_v1 = vadd.bf16 1065369472, %v2757_v28  ;;  %5515 = vtanh.f32 %v2964_v51 }
 0x2fa   : > { %v3329_v38 = vadd.f32 1.0, %v5508_v8  ;;  %v2953_v2 = vunpack.c.l.bf16 %v8231_v12  ;;  %v8347_v50 = vmul.f32 %v3344_v31, %v3216_v47  ;;  %v2954_v63 = vunpack.c.l.bf16 %v8234_v33  ;;  %v9999_v47 = vld [vmem:[#allocation70_spill] sm:$0xff] }
 0x2fb   : > { %3894 = vmatmul.mubr.bf16.gmra.mrb[72].mxu0 %v3577_v29  ;;  %v5510_v9 = vpop.eup %5509  ;;  %v3580_v45 = vpack.c.bf16 %v8227_v14, %v3458_v40  ;;  %v8350_v7 = vmul.bf16 %v2821_v1, %v2629_v20  ;;  %v2758_v37 = vmul.bf16 %v2694_v10, %v2566_v6  ;;  %v2630_v25 = vmul.bf16 1061961548, %v2566_v6 }
 0x2fc   : > { %v5512_v19 = vpop.eup %5511  ;;  %v3457_v13 = vmul.f32 %v3329_v38, %v8278_v44  ;;  %v3334_v23 = vadd.f32 1.0, %v5510_v9  ;;  %v8357_v12 = vadd.f32 %v8292_v48, %v7783_v3  ;;  %v8362_v33 = vadd.f32 %v8296_v18, %v7801_v58  ;;  %v2330_v48 = vpop.f32.mrb[104].mxu1 }
 0x2fd   : > { %3903 = vmatprep.mubr.bf16.mxu0 %v3580_v45  ;;  %v2967_v36 = vunpack.c.h.bf16 %v8350_v7  ;;  %v3333_v46 = vadd.f32 1.0, %v5512_v19  ;;  %v2822_v15 = vadd.bf16 1065369472, %v2758_v37  ;;  %v8367_v32 = vadd.f32 %v8308_v60, %v7783_v3  ;;  %v2332_v43 = vpop.f32.mrb[105].mxu1 }
 0x2fe   : > { %v3579_v14 = vpack.c.bf16 %v8223_v34, %v3457_v13  ;;  %v3462_v5 = vmul.f32 %v3334_v23, %v3206_v62  ;;  %v8371_v6 = vadd.f32 %v8318_v54, %v7801_v58  ;;  %v8374_v34 = vmul.f32 0.5, %v9998_v59  ;;  %v2334_v56 = vpop.f32.mrb[106].mxu1 }
 0x2ff   : > { %5517 = vtanh.f32 %v2967_v36  ;;  %v3461_v44 = vmul.f32 %v3333_v46, %v8285_v61  ;;  %v8376_v62 = vmul.bf16 %v2822_v15, %v2630_v25  ;;  %v8380_v61 = vmul.f32 0.5, %v9999_v47  ;;  %v2336_v29 = vpop.f32.mrb[107].mxu1  ;;  %v10000_v46 = vld [vmem:[#allocation61_spill] sm:$0xff] }
 0x300   : > { %v3582_v18 = vpack.c.bf16 %v8247_v4, %v3462_v5  ;;  %5519 = vtanh.f32 %v2954_v63  ;;  %v2567_v55 = vpack.c.bf16 %v8367_v32, %v8357_v12  ;;  %v2568_v54 = vpack.c.bf16 %v8371_v6, %v8362_v33 }
 0x301   : > { %v3581_v60 = vpack.c.bf16 %v8244_v24, %v3461_v44  ;;  %v2957_v28 = vunpack.c.l.bf16 %v8249_v41  ;;  %v2958_v52 = vunpack.c.l.bf16 %v8258_v39  ;;  %v2968_v4 = vunpack.c.h.bf16 %v8376_v62 }
 0x302   : > { %5521 = vtanh.f32 %v2953_v2  ;;  %v5514_v51 = vpop.eup %5513  ;;  %v3219_v20 = vmul.f32 0.5, %v8271_v35  ;;  %v2962_v24 = vunpack.c.l.bf16 %v8334_v42  ;;  %v3220_v8 = vmul.f32 0.5, %v8275_v21 }
 0x303   : > { %3904 = vmatmul.mubr.bf16.gmra.mrb[76].mxu0 %v3579_v14  ;;  %v2695_v31 = vmul.bf16 1027030327, %v2567_v55  ;;  %v5516_v40 = vpop.eup %5515  ;;  %v3347_v1 = vadd.f32 1.0, %v5514_v51  ;;  %5523 = vtanh.f32 %v2968_v4  ;;  %v2696_v41 = vmul.bf16 1027030327, %v2568_v54 }
 0x304   : > { %3913 = vmatprep.mubr.bf16.mxu0 %v3582_v18  ;;  %v8394_v39 = vadd.f32 %v2330_v48, %v7783_v3  ;;  %v3348_v38 = vadd.f32 1.0, %v5516_v40  ;;  %v8397_v9 = vadd.f32 %v2332_v43, %v7801_v58  ;;  %v8400_v35 = vadd.f32 %v2334_v56, %v7783_v3 }
 0x305   : > { %v2759_v10 = vmul.bf16 %v2695_v31, %v2567_v55  ;;  %v8402_v42 = vmul.f32 %v3347_v1, %v3219_v20  ;;  %v2760_v21 = vmul.bf16 %v2696_v41, %v2568_v54  ;;  %v8405_v2 = vadd.f32 %v2336_v29, %v7801_v58 }
 0x306   : > { %5525 = vtanh.f32 %v2958_v52  ;;  %v8407_v45 = vmul.f32 %v3348_v38, %v3220_v8  ;;  %v2631_v19 = vmul.bf16 1061961548, %v2567_v55  ;;  %v2569_v13 = vpack.c.bf16 %v8400_v35, %v8394_v39 }
 0x307   : > { %v2823_v63 = vadd.bf16 1065369472, %v2759_v10  ;;  %v2632_v37 = vmul.bf16 1061961548, %v2568_v54  ;;  %v2824_v23 = vadd.bf16 1065369472, %v2760_v21  ;;  %v2570_v36 = vpack.c.bf16 %v8405_v2, %v8397_v9 }
 0x308   : > { %5527 = vtanh.f32 %v2957_v28  ;;  %v3214_v14 = vmul.f32 0.5, %v10000_v46  ;;  %v2697_v5 = vmul.bf16 1027030327, %v2569_v13  ;;  %v3223_v48 = vmul.f32 0.5, %v8312_v57 }
 0x309   : > { %v5518_v25 = vpop.eup %5517  ;;  %v8414_v15 = vmul.bf16 %v2823_v63, %v2631_v19  ;;  %5529 = vtanh.f32 %v2962_v24  ;;  %v8417_v18 = vmul.bf16 %v2824_v23, %v2632_v37  ;;  %v2698_v43 = vmul.bf16 1027030327, %v2570_v36 }
 0x30a   : > { %v5520_v44 = vpop.eup %5519  ;;  %v3351_v59 = vadd.f32 1.0, %v5518_v25  ;;  %v2961_v47 = vunpack.c.l.bf16 %v8330_v17  ;;  %v2761_v56 = vmul.bf16 %v2697_v5, %v2569_v13  ;;  %v2633_v29 = vmul.bf16 1061961548, %v2569_v13 }
 0x30b   : > { %3914 = vmatmul.mubr.bf16.gmra.mrb[80].mxu0 %v3581_v60  ;;  %v2971_v55 = vunpack.c.h.bf16 %v8414_v15  ;;  %v3338_v54 = vadd.f32 1.0, %v5520_v44  ;;  %v2972_v4 = vunpack.c.h.bf16 %v8417_v18  ;;  %v2762_v51 = vmul.bf16 %v2698_v43, %v2570_v36  ;;  %v2340_v40 = vpop.f32.mrb[108].mxu1 }
 0x30c   : > { %v5522_v28 = vpop.eup %5521  ;;  %v8421_v52 = vmul.f32 %v3351_v59, %v3223_v48  ;;  %v2825_v20 = vadd.bf16 1065369472, %v2761_v56  ;;  %v3224_v8 = vmul.f32 0.5, %v8316_v27  ;;  %v2634_v17 = vmul.bf16 1061961548, %v2570_v36  ;;  %v2342_v21 = vpop.f32.mrb[109].mxu1 }
 0x30d   : > { %5531 = vtanh.f32 %v2971_v55  ;;  %v3466_v57 = vmul.f32 %v3338_v54, %v8374_v34  ;;  %v3337_v60 = vadd.f32 1.0, %v5522_v28  ;;  %v5524_v24 = vpop.eup %5523  ;;  %v2826_v31 = vadd.bf16 1065369472, %v2762_v51  ;;  %v2344_v27 = vpop.f32.mrb[110].mxu1 }
 0x30e   : > { %5533 = vtanh.f32 %v2972_v4  ;;  %v3352_v1 = vadd.f32 1.0, %v5524_v24  ;;  %v8428_v10 = vmul.bf16 %v2825_v20, %v2633_v29  ;;  %v8431_v34 = vmul.f32 0.5, %v8262_v53  ;;  %v2346_v36 = vpop.f32.mrb[111].mxu1 }
 0x30f   : > { %v3584_v41 = vpack.c.bf16 %v8328_v22, %v3466_v57  ;;  %v3465_v38 = vmul.f32 %v3337_v60, %v8344_v11  ;;  %v3218_v63 = vmul.f32 0.5, %v8266_v49  ;;  %v8434_v13 = vmul.bf16 %v2826_v31, %v2634_v17 }
 0x310   : > { %v5526_v19 = vpop.eup %5525  ;;  %5535 = vtanh.f32 %v2961_v47  ;;  %v2966_v37 = vunpack.c.l.bf16 %v8376_v62  ;;  %v8437_v23 = vmul.f32 %v3352_v1, %v3224_v8  ;;  %v2975_v11 = vunpack.c.h.bf16 %v8428_v10 }
 0x311   : > { %3923 = vmatprep.mubr.bf16.mxu0 %v3584_v41  ;;  %v3583_v22 = vpack.c.bf16 %v8323_v30, %v3465_v38  ;;  %v2965_v53 = vunpack.c.l.bf16 %v8350_v7  ;;  %v2976_v46 = vunpack.c.h.bf16 %v8434_v13  ;;  %v3342_v49 = vadd.f32 1.0, %v5526_v19 }
 0x312   : > { %v5528_v25 = vpop.eup %5527  ;;  %v8444_v5 = vadd.f32 %v2340_v40, %v7783_v3  ;;  %5537 = vtanh.f32 %v2975_v11  ;;  %v8447_v48 = vadd.f32 %v2342_v21, %v7801_v58  ;;  %v8450_v30 = vadd.f32 %v2344_v27, %v7783_v3 }
 0x313   : > { %v5530_v44 = vpop.eup %5529  ;;  %3924 = vmatmul.mubr.bf16.gmra.mrb[84].mxu0 %v3583_v22  ;;  %v3341_v62 = vadd.f32 1.0, %v5528_v25  ;;  %5539 = vtanh.f32 %v2976_v46  ;;  %v3470_v59 = vmul.f32 %v3342_v49, %v3214_v14  ;;  %v8453_v7 = vadd.f32 %v2346_v36, %v7801_v58 }
 0x314   : > { %v3346_v43 = vadd.f32 1.0, %v5530_v44  ;;  %v8456_v47 = vmul.f32 0.5, %v8301_v26  ;;  %v2571_v54 = vpack.c.bf16 %v8450_v30, %v8444_v5  ;;  %5541 = vtanh.f32 %v2966_v37  ;;  %v2350_v60 = vpop.f32.mrb[112].mxu1 }
 0x315   : > { %v3469_v55 = vmul.f32 %v3341_v62, %v8380_v61  ;;  %v3227_v56 = vmul.f32 0.5, %v8367_v32  ;;  %v3586_v28 = vpack.c.bf16 %v8347_v50, %v3470_v59  ;;  %v2572_v14 = vpack.c.bf16 %v8453_v7, %v8447_v48  ;;  %v2352_v8 = vpop.f32.mrb[113].mxu1 }
 0x316   : > { %v3474_v4 = vmul.f32 %v3346_v43, %v3218_v63  ;;  %v2970_v51 = vunpack.c.l.bf16 %v8417_v18  ;;  %v2699_v57 = vmul.bf16 1027030327, %v2571_v54  ;;  %5543 = vtanh.f32 %v2965_v53  ;;  %v2354_v18 = vpop.f32.mrb[114].mxu1 }
 0x317   : > { %v5532_v29 = vpop.eup %5531  ;;  %v3585_v26 = vpack.c.bf16 %v8338_v16, %v3469_v55  ;;  %v3228_v24 = vmul.f32 0.5, %v8371_v6  ;;  %3933 = vmatprep.mubr.bf16.mxu0 %v3586_v28  ;;  %v2700_v32 = vmul.bf16 1027030327, %v2572_v14  ;;  %v2969_v17 = vunpack.c.l.bf16 %v8414_v15  ;;  %v2356_v19 = vpop.f32.mrb[115].mxu1 }
 0x318   : > { %v5534_v61 = vpop.eup %5533  ;;  %v3355_v20 = vadd.f32 1.0, %v5532_v29  ;;  %v3588_v50 = vpack.c.bf16 %v8407_v45, %v3474_v4  ;;  %v2635_v40 = vmul.bf16 1061961548, %v2571_v54  ;;  %v2763_v1 = vmul.bf16 %v2699_v57, %v2571_v54 }
 0x319   : > { %v3356_v31 = vadd.f32 1.0, %v5534_v61  ;;  %v2764_v38 = vmul.bf16 %v2700_v32, %v2572_v14  ;;  %v8473_v21 = vadd.f32 %v2350_v60, %v7783_v3  ;;  %v8476_v6 = vadd.f32 %v2354_v18, %v7783_v3 }
 0x31a   : > { %v5536_v41 = vpop.eup %5535  ;;  %v8470_v16 = vmul.f32 %v3355_v20, %v3227_v56  ;;  %v2827_v45 = vadd.bf16 1065369472, %v2763_v1  ;;  %5545 = vtanh.f32 %v2970_v51  ;;  %v3231_v27 = vmul.f32 0.5, %v8400_v35 }
 0x31b   : > { %v8478_v63 = vmul.f32 %v3356_v31, %v3228_v24  ;;  %3934 = vmatmul.mubr.bf16.gmra.mrb[88].mxu0 %v3585_v26  ;;  %v3345_v15 = vadd.f32 1.0, %v5536_v41  ;;  %v2636_v37 = vmul.bf16 1061961548, %v2572_v14  ;;  %v2828_v22 = vadd.bf16 1065369472, %v2764_v38 }
 0x31c   : > { %3943 = vmatprep.mubr.bf16.mxu0 %v3588_v50  ;;  %v2573_v11 = vpack.c.bf16 %v8476_v6, %v8473_v21  ;;  %v5538_v36 = vpop.eup %5537  ;;  %v8483_v25 = vmul.bf16 %v2827_v45, %v2635_v40  ;;  %v8487_v46 = vadd.f32 %v2356_v19, %v7801_v58  ;;  %5547 = vtanh.f32 %v2969_v17 }
 0x31d   : > { %v3473_v53 = vmul.f32 %v3345_v15, %v8431_v34  ;;  %v5540_v49 = vpop.eup %5539  ;;  %v3359_v44 = vadd.f32 1.0, %v5538_v36  ;;  %v3232_v62 = vmul.f32 0.5, %v8405_v2  ;;  %v8490_v35 = vmul.bf16 %v2828_v22, %v2636_v37  ;;  %v2360_v2 = vpop.f32.mrb[116].mxu1 }
 0x31e   : > { %v2701_v59 = vmul.bf16 1027030327, %v2573_v11  ;;  %v5542_v43 = vpop.eup %5541  ;;  %v3360_v55 = vadd.f32 1.0, %v5540_v49  ;;  %v2979_v54 = vunpack.c.h.bf16 %v8483_v25  ;;  %v8495_v28 = vadd.f32 %v2352_v8, %v7801_v58 }
 0x31f   : > { %v3587_v56 = vpack.c.bf16 %v8402_v42, %v3473_v53  ;;  %v3222_v34 = vmul.f32 0.5, %v8306_v0  ;;  %v8498_v14 = vmul.f32 %v3359_v44, %v3231_v27  ;;  %v2980_v4 = vunpack.c.h.bf16 %v8490_v35  ;;  %v2362_v42 = vpop.f32.mrb[117].mxu1 }
 0x320   : > { %v2765_v29 = vmul.bf16 %v2701_v59, %v2573_v11  ;;  %v5544_v51 = vpop.eup %5543  ;;  %v8501_v26 = vmul.f32 %v3360_v55, %v3232_v62  ;;  %5549 = vtanh.f32 %v2979_v54  ;;  %v2637_v57 = vmul.bf16 1061961548, %v2573_v11  ;;  %v2364_v0 = vpop.f32.mrb[118].mxu1 }
 0x321   : > { %v2574_v60 = vpack.c.bf16 %v8487_v46, %v8495_v28  ;;  %5551 = vtanh.f32 %v2980_v4  ;;  %v3350_v20 = vadd.f32 1.0, %v5542_v43  ;;  %v3349_v24 = vadd.f32 1.0, %v5544_v51  ;;  %v2366_v8 = vpop.f32.mrb[119].mxu1 }
 0x322   : > { %v2829_v61 = vadd.bf16 1065369472, %v2765_v29  ;;  %v3225_v32 = vmul.f32 0.5, %v8357_v12  ;;  %v8510_v1 = vadd.f32 %v2364_v0, %v7783_v3  ;;  %v8513_v38 = vadd.f32 %v2360_v2, %v7783_v3 }
 0x323   : > { %3944 = vmatmul.mubr.bf16.gmra.mrb[92].mxu0 %v3587_v56  ;;  %v2702_v50 = vmul.bf16 1027030327, %v2574_v60  ;;  %v3478_v31 = vmul.f32 %v3350_v20, %v3222_v34  ;;  %v3477_v40 = vmul.f32 %v3349_v24, %v8456_v47  ;;  %v8516_v19 = vadd.f32 %v2362_v42, %v7801_v58 }
 0x324   : > { %v8506_v17 = vmul.bf16 %v2829_v61, %v2637_v57  ;;  %v5546_v18 = vpop.eup %5545  ;;  %v8519_v12 = vadd.f32 %v2366_v8, %v7801_v58  ;;  %v3226_v45 = vmul.f32 0.5, %v8362_v33  ;;  %v2638_v22 = vmul.bf16 1061961548, %v2574_v60 }
 0x325   : > { %v2766_v41 = vmul.bf16 %v2702_v50, %v2574_v60  ;;  %v3590_v47 = vpack.c.bf16 %v8437_v23, %v3478_v31  ;;  %v3589_v27 = vpack.c.bf16 %v8421_v52, %v3477_v40  ;;  %v2575_v36 = vpack.c.bf16 %v8510_v1, %v8513_v38  ;;  %v2370_v62 = vpop.f32.mrb[120].mxu1 }
 0x326   : > { %v2983_v15 = vunpack.c.h.bf16 %v8506_v17  ;;  %v5548_v37 = vpop.eup %5547  ;;  %v2576_v53 = vpack.c.bf16 %v8519_v12, %v8516_v19  ;;  %v2973_v49 = vunpack.c.l.bf16 %v8428_v10  ;;  %v3354_v33 = vadd.f32 1.0, %v5546_v18  ;;  %v2372_v4 = vpop.f32.mrb[121].mxu1 }
 0x327   : > { %v2830_v11 = vadd.bf16 1065369472, %v2766_v41  ;;  %3953 = vmatprep.mubr.bf16.mxu0 %v3590_v47  ;;  %v3353_v44 = vadd.f32 1.0, %v5548_v37  ;;  %v2974_v23 = vunpack.c.l.bf16 %v8434_v13  ;;  %v3235_v52 = vmul.f32 0.5, %v8450_v30  ;;  %v2374_v60 = vpop.f32.mrb[122].mxu1 }
 0x328   : > { %5553 = vtanh.f32 %v2983_v15  ;;  %v2703_v43 = vmul.bf16 1027030327, %v2575_v36  ;;  %v3236_v55 = vmul.f32 0.5, %v8453_v7  ;;  %v2704_v54 = vmul.bf16 1027030327, %v2576_v53  ;;  %v2376_v7 = vpop.f32.mrb[123].mxu1 }
 0x329   : > { %v8532_v59 = vmul.bf16 %v2830_v11, %v2638_v22  ;;  %v3482_v56 = vmul.f32 %v3354_v33, %v3226_v45  ;;  %v3481_v34 = vmul.f32 %v3353_v44, %v3225_v32  ;;  %v2639_v2 = vmul.bf16 1061961548, %v2575_v36 }
 0x32a   : > { %v5550_v29 = vpop.eup %5549  ;;  %v2767_v51 = vmul.bf16 %v2703_v43, %v2575_v36  ;;  %v2640_v57 = vmul.bf16 1061961548, %v2576_v53  ;;  %v2768_v30 = vmul.bf16 %v2704_v54, %v2576_v53  ;;  %v8539_v32 = vadd.f32 %v2370_v62, %v7783_v3 }
 0x32b   : > { %v2984_v10 = vunpack.c.h.bf16 %v8532_v59  ;;  %3954 = vmatmul.mubr.bf16.gmra.mrb[96].mxu0 %v3589_v27  ;;  %v5552_v13 = vpop.eup %5551  ;;  %v3363_v42 = vadd.f32 1.0, %v5550_v29  ;;  %v3592_v61 = vpack.c.bf16 %v8478_v63, %v3482_v56  ;;  %v3591_v20 = vpack.c.bf16 %v8470_v16, %v3481_v34 }
 0x32c   : > { %v3364_v24 = vadd.f32 1.0, %v5552_v13  ;;  %v2831_v0 = vadd.bf16 1065369472, %v2767_v51  ;;  %v2832_v8 = vadd.bf16 1065369472, %v2768_v30  ;;  %v8544_v31 = vadd.f32 %v2372_v4, %v7801_v58 }
 0x32d   : > { %5555 = vtanh.f32 %v2984_v10  ;;  %v8541_v50 = vmul.f32 %v3363_v42, %v3235_v52  ;;  %3963 = vmatprep.mubr.bf16.mxu0 %v3592_v61  ;;  %v8547_v40 = vadd.f32 %v2374_v60, %v7783_v3  ;;  %v8554_v18 = vadd.f32 %v2376_v7, %v7801_v58 }
 0x32e   : > { %v8549_v63 = vmul.f32 %v3364_v24, %v3236_v55  ;;  %v8551_v16 = vmul.bf16 %v2831_v0, %v2639_v2  ;;  %5557 = vtanh.f32 %v2974_v23  ;;  %v8556_v41 = vmul.bf16 %v2832_v8, %v2640_v57 }
 0x32f   : > { %v2577_v45 = vpack.c.bf16 %v8547_v40, %v8539_v32  ;;  %5559 = vtanh.f32 %v2973_v49  ;;  %v3229_v15 = vmul.f32 0.5, %v8394_v39  ;;  %v2978_v47 = vunpack.c.l.bf16 %v8490_v35 }
 0x330   : > { %v2987_v27 = vunpack.c.h.bf16 %v8551_v16  ;;  %v2578_v37 = vpack.c.bf16 %v8554_v18, %v8544_v31  ;;  %v3230_v11 = vmul.f32 0.5, %v8397_v9  ;;  %v2977_v36 = vunpack.c.l.bf16 %v8483_v25 }
 0x331   : > { %v2988_v53 = vunpack.c.h.bf16 %v8556_v41  ;;  %v2705_v33 = vmul.bf16 1027030327, %v2577_v45  ;;  %v3239_v44 = vmul.f32 0.5, %v8476_v6  ;;  %v8570_v35 = vmul.f32 0.5, %v8444_v5 }
 0x332   : > { %v5554_v22 = vpop.eup %5553  ;;  %5561 = vtanh.f32 %v2987_v27  ;;  %v2706_v39 = vmul.bf16 1027030327, %v2578_v37  ;;  %v8573_v62 = vmul.f32 0.5, %v8447_v48  ;;  %v2982_v25 = vunpack.c.l.bf16 %v8532_v59  ;;  %v2380_v54 = vpop.f32.mrb[124].mxu1 }
 0x333   : > { %v3367_v49 = vadd.f32 1.0, %v5554_v22  ;;  %3964 = vmatmul.mubr.bf16.gmra.mrb[100].mxu0 %v3591_v20  ;;  %5563 = vtanh.f32 %v2988_v53  ;;  %v2769_v23 = vmul.bf16 %v2705_v33, %v2577_v45  ;;  %v8579_v6 = vmul.f32 0.5, %v8473_v21  ;;  %v2382_v29 = vpop.f32.mrb[125].mxu1 }
 0x334   : > { %v2770_v52 = vmul.bf16 %v2706_v39, %v2578_v37  ;;  %5565 = vtanh.f32 %v2978_v47  ;;  %v2641_v43 = vmul.bf16 1061961548, %v2577_v45  ;;  %v8582_v56 = vmul.f32 0.5, %v8495_v28  ;;  %v2384_v51 = vpop.f32.mrb[126].mxu1 }
 0x335   : > { %v8575_v9 = vmul.f32 %v3367_v49, %v3239_v44  ;;  %v2833_v55 = vadd.bf16 1065369472, %v2769_v23  ;;  %5567 = vtanh.f32 %v2977_v36  ;;  %v2981_v48 = vunpack.c.l.bf16 %v8506_v17  ;;  %v2386_v13 = vpop.f32.mrb[127].mxu1 }
 0x336   : > { %v2642_v34 = vmul.bf16 1061961548, %v2578_v37  ;;  %v2834_v4 = vadd.bf16 1065369472, %v2770_v52  ;;  %v3240_v59 = vmul.f32 0.5, %v8487_v46  ;;  %v8587_v2 = vmul.f32 0.5, %v8513_v38 }
 0x337   : > { %v5556_v5 = vpop.eup %5555  ;;  %v8589_v21 = vmul.bf16 %v2833_v55, %v2641_v43  ;;  %v8592_v60 = vmul.f32 0.5, %v8516_v19  ;;  %v8597_v17 = vadd.f32 %v2384_v51, %v7783_v3  ;;  %5569 = vtanh.f32 %v2982_v25 }
 0x338   : > { %v3368_v10 = vadd.f32 1.0, %v5556_v5  ;;  %v5558_v57 = vpop.eup %5557  ;;  %v8594_v28 = vmul.bf16 %v2834_v4, %v2642_v34  ;;  %v8603_v61 = vadd.f32 %v2380_v54, %v7783_v3  ;;  %v3243_v20 = vmul.f32 0.5, %v8510_v1 }
 0x339   : > { %v5560_v42 = vpop.eup %5559  ;;  %v2991_v38 = vunpack.c.h.bf16 %v8589_v21  ;;  %v3358_v30 = vadd.f32 1.0, %v5558_v57  ;;  %5571 = vtanh.f32 %v2981_v48  ;;  %v3244_v24 = vmul.f32 0.5, %v8519_v12 }
 0x33a   : > { %v8599_v46 = vmul.f32 %v3368_v10, %v3240_v59  ;;  %v2992_v19 = vunpack.c.h.bf16 %v8594_v28  ;;  %v3357_v7 = vadd.f32 1.0, %v5560_v42  ;;  %v2579_v8 = vpack.c.bf16 %v8597_v17, %v8603_v61  ;;  %v2390_v53 = vpop.f32.mrb[128].mxu1 }
 0x33b   : > { %5573 = vtanh.f32 %v2991_v38  ;;  %v3486_v0 = vmul.f32 %v3358_v30, %v3230_v11  ;;  %v8611_v27 = vadd.f32 %v2382_v29, %v7801_v58  ;;  %v8614_v37 = vadd.f32 %v2386_v13, %v7801_v58  ;;  %v2392_v23 = vpop.f32.mrb[129].mxu1 }
 0x33c   : > { %v5562_v45 = vpop.eup %5561  ;;  %5575 = vtanh.f32 %v2992_v19  ;;  %v3485_v47 = vmul.f32 %v3357_v7, %v3229_v15  ;;  %v8617_v36 = vmul.f32 0.5, %v8539_v32  ;;  %v2707_v11 = vmul.bf16 1027030327, %v2579_v8  ;;  %v2394_v55 = vpop.f32.mrb[130].mxu1 }
 0x33d   : > { %v5564_v1 = vpop.eup %5563  ;;  %v3371_v22 = vadd.f32 1.0, %v5562_v45  ;;  %v3594_v12 = vpack.c.bf16 %v8501_v26, %v3486_v0  ;;  %v8621_v49 = vmul.f32 0.5, %v8544_v31  ;;  %v2580_v39 = vpack.c.bf16 %v8614_v37, %v8611_v27  ;;  %v2396_v48 = vpop.f32.mrb[131].mxu1 }
 0x33e   : > { %v5566_v33 = vpop.eup %5565  ;;  %v3372_v44 = vadd.f32 1.0, %v5564_v1  ;;  %v3593_v15 = vpack.c.bf16 %v8498_v14, %v3485_v47  ;;  %v2986_v32 = vunpack.c.l.bf16 %v8556_v41  ;;  %v2771_v26 = vmul.bf16 %v2707_v11, %v2579_v8 }
 0x33f   : > { %v5568_v25 = vpop.eup %5567  ;;  %v8626_v52 = vmul.f32 %v3371_v22, %v3243_v20  ;;  %3973 = vmatprep.mubr.bf16.mxu0 %v3594_v12  ;;  %v3362_v43 = vadd.f32 1.0, %v5566_v33  ;;  %v3247_v31 = vmul.f32 0.5, %v8547_v40  ;;  %v2708_v5 = vmul.bf16 1027030327, %v2580_v39 }
 0x340   : > { %v8629_v54 = vmul.f32 %v3372_v44, %v3244_v24  ;;  %3974 = vmatmul.mubr.bf16.gmra.mrb[104].mxu0 %v3593_v15  ;;  %v3361_v14 = vadd.f32 1.0, %v5568_v25  ;;  %v2643_v34 = vmul.bf16 1061961548, %v2579_v8  ;;  %v2835_v4 = vadd.bf16 1065369472, %v2771_v26 }
 0x341   : > { %v3490_v29 = vmul.f32 %v3362_v43, %v8573_v62  ;;  %v8634_v59 = vadd.f32 %v2390_v53, %v7783_v3  ;;  %v5570_v41 = vpop.eup %5569  ;;  %v2772_v10 = vmul.bf16 %v2708_v5, %v2580_v39  ;;  %v8638_v57 = vadd.f32 %v2394_v55, %v7783_v3 }
 0x342   : > { %v3489_v51 = vmul.f32 %v3361_v14, %v8570_v35  ;;  %v8641_v40 = vadd.f32 %v2396_v48, %v7801_v58  ;;  %v8643_v13 = vmul.bf16 %v2835_v4, %v2643_v34  ;;  %v2393_v38 = vadd.f32 %v2392_v23, %v7801_v58 }
 0x343   : > { %v3596_v42 = vpack.c.bf16 %v8549_v63, %v3490_v29  ;;  %5577 = vtanh.f32 %v2986_v32  ;;  %v5572_v62 = vpop.eup %5571  ;;  %v2644_v30 = vmul.bf16 1061961548, %v2580_v39  ;;  %v2836_v20 = vadd.bf16 1065369472, %v2772_v10 }
 0x344   : > { %v3595_v19 = vpack.c.bf16 %v8541_v50, %v3489_v51  ;;  %v2581_v35 = vpack.c.bf16 %v8638_v57, %v8634_v59  ;;  %v2985_v24 = vunpack.c.l.bf16 %v8551_v16  ;;  %v2995_v0 = vunpack.c.h.bf16 %v8643_v13 }
 0x345   : > { %v5574_v7 = vpop.eup %5573  ;;  %3983 = vmatprep.mubr.bf16.mxu0 %v3596_v42  ;;  %v2582_v8 = vpack.c.bf16 %v8641_v40, %v2393_v38  ;;  %v3366_v63 = vadd.f32 1.0, %v5570_v41  ;;  %v3248_v1 = vmul.f32 0.5, %v8554_v18  ;;  %v8654_v22 = vmul.bf16 %v2836_v20, %v2644_v30 }
 0x346   : > { %v5576_v45 = vpop.eup %5575  ;;  %v3375_v47 = vadd.f32 1.0, %v5574_v7  ;;  %v2709_v12 = vmul.bf16 1027030327, %v2581_v35  ;;  %v8657_v11 = vmul.f32 0.5, %v8603_v61  ;;  %5579 = vtanh.f32 %v2995_v0  ;;  %v2400_v33 = vpop.f32.mrb[132].mxu1 }
 0x347   : > { %v3376_v50 = vadd.f32 1.0, %v5576_v45  ;;  %v2710_v53 = vmul.bf16 1027030327, %v2582_v8  ;;  %v2996_v15 = vunpack.c.h.bf16 %v8654_v22  ;;  %v2645_v39 = vmul.bf16 1061961548, %v2581_v35  ;;  %v2402_v25 = vpop.f32.mrb[133].mxu1 }
 0x348   : > { %v8659_v44 = vmul.f32 %v3375_v47, %v3247_v31  ;;  %3984 = vmatmul.mubr.bf16.gmra.mrb[108].mxu0 %v3595_v19  ;;  %v2773_v23 = vmul.bf16 %v2709_v12, %v2581_v35  ;;  %v3494_v26 = vmul.f32 %v3366_v63, %v8582_v56  ;;  %v3365_v43 = vadd.f32 1.0, %v5572_v62  ;;  %v2404_v55 = vpop.f32.mrb[134].mxu1 }
 0x349   : > { %v8662_v32 = vmul.f32 %v3376_v50, %v3248_v1  ;;  %v2774_v18 = vmul.bf16 %v2710_v53, %v2582_v8  ;;  %5581 = vtanh.f32 %v2996_v15  ;;  %v2646_v5 = vmul.bf16 1061961548, %v2582_v8  ;;  %v2406_v31 = vpop.f32.mrb[135].mxu1 }
 0x34a   : > { %v2837_v61 = vadd.bf16 1065369472, %v2773_v23  ;;  %v8666_v14 = vadd.f32 %v2400_v33, %v7783_v3  ;;  %v3598_v34 = vpack.c.bf16 %v8599_v46, %v3494_v26  ;;  %v3493_v4 = vmul.f32 %v3365_v43, %v8579_v6 }
 0x34b   : > { %v2838_v48 = vadd.bf16 1065369472, %v2774_v18  ;;  %v8671_v29 = vadd.f32 %v2404_v55, %v7783_v3  ;;  %v2989_v41 = vunpack.c.l.bf16 %v8589_v21  ;;  %v2403_v10 = vadd.f32 %v2402_v25, %v7801_v58 }
 0x34c   : > { %v8674_v56 = vmul.bf16 %v2837_v61, %v2645_v39  ;;  %v8678_v51 = vadd.f32 %v2406_v31, %v7801_v58  ;;  %v2990_v62 = vunpack.c.l.bf16 %v8594_v28  ;;  %3993 = vmatprep.mubr.bf16.mxu0 %v3598_v34  ;;  %v3597_v6 = vpack.c.bf16 %v8575_v9, %v3493_v4 }
 0x34d   : > { %v5578_v42 = vpop.eup %5577  ;;  %v8681_v30 = vmul.bf16 %v2838_v48, %v2646_v5  ;;  %v2583_v46 = vpack.c.bf16 %v8671_v29, %v8666_v14  ;;  %v8687_v20 = vmul.f32 0.5, %v8611_v27  ;;  %v3251_v19 = vmul.f32 0.5, %v8597_v17 }
 0x34e   : > { %v2999_v35 = vunpack.c.h.bf16 %v8674_v56  ;;  %v2584_v7 = vpack.c.bf16 %v8678_v51, %v2403_v10  ;;  %v3252_v0 = vmul.f32 0.5, %v8614_v37  ;;  %v8694_v28 = vmul.f32 0.5, %v8634_v59  ;;  %v2410_v63 = vpop.f32.mrb[136].mxu1 }
 0x34f   : > { %v3000_v8 = vunpack.c.h.bf16 %v8681_v30  ;;  %v2711_v9 = vmul.bf16 1027030327, %v2583_v46  ;;  %v8697_v45 = vmul.f32 0.5, %v2393_v38  ;;  %v3370_v47 = vadd.f32 1.0, %v5578_v42  ;;  %v2412_v17 = vpop.f32.mrb[137].mxu1 }
 0x350   : > { %5583 = vtanh.f32 %v2999_v35  ;;  %3994 = vmatmul.mubr.bf16.gmra.mrb[112].mxu0 %v3597_v6  ;;  %v2712_v27 = vmul.bf16 1027030327, %v2584_v7  ;;  %v5580_v1 = vpop.eup %5579  ;;  %v2647_v12 = vmul.bf16 1061961548, %v2583_v46  ;;  %v2648_v53 = vmul.bf16 1061961548, %v2584_v7 }
 0x351   : > { %5585 = vtanh.f32 %v3000_v8  ;;  %v2775_v50 = vmul.bf16 %v2711_v9, %v2583_v46  ;;  %v2414_v37 = vpop.f32.mrb[138].mxu1  ;;  %v3379_v33 = vadd.f32 1.0, %v5580_v1  ;;  %v3498_v15 = vmul.f32 %v3370_v47, %v8592_v60 }
 0x352   : > { %v2776_v59 = vmul.bf16 %v2712_v27, %v2584_v7  ;;  %5587 = vtanh.f32 %v2985_v24  ;;  %v2416_v38 = vpop.f32.mrb[139].mxu1  ;;  %v8703_v23 = vadd.f32 %v2410_v63, %v7783_v3  ;;  %v8706_v25 = vadd.f32 %v2412_v17, %v7801_v58 }
 0x353   : > { %v2839_v39 = vadd.bf16 1065369472, %v2775_v50  ;;  %v8709_v18 = vadd.f32 %v2414_v37, %v7783_v3  ;;  %v5582_v26 = vpop.eup %5581  ;;  %v8711_v43 = vmul.f32 %v3379_v33, %v3251_v19  ;;  %v3600_v60 = vpack.c.bf16 %v8629_v54, %v3498_v15 }
 0x354   : > { %v2840_v55 = vadd.bf16 1065369472, %v2776_v59  ;;  %v8715_v16 = vadd.f32 %v2416_v38, %v7801_v58  ;;  %v3380_v24 = vadd.f32 1.0, %v5582_v26  ;;  %v3255_v61 = vmul.f32 0.5, %v8638_v57 }
 0x355   : > { %v8718_v5 = vmul.bf16 %v2839_v39, %v2647_v12  ;;  %v2585_v31 = vpack.c.bf16 %v8709_v18, %v8703_v23  ;;  %v2993_v48 = vunpack.c.l.bf16 %v8643_v13  ;;  %4003 = vmatprep.mubr.bf16.mxu0 %v3600_v60  ;;  %5589 = vtanh.f32 %v2990_v62 }
 0x356   : > { %v8723_v34 = vmul.bf16 %v2840_v55, %v2648_v53  ;;  %v2586_v4 = vpack.c.bf16 %v8715_v16, %v8706_v25  ;;  %v2994_v54 = vunpack.c.l.bf16 %v8654_v22  ;;  %v8728_v42 = vmul.f32 %v3380_v24, %v3252_v0  ;;  %v2420_v46 = vpop.f32.mrb[140].mxu1 }
 0x357   : > { %v3256_v57 = vmul.f32 0.5, %v8641_v40  ;;  %v3003_v6 = vunpack.c.h.bf16 %v8718_v5  ;;  %v8733_v19 = vmul.f32 0.5, %v8666_v14  ;;  %v8735_v13 = vmul.f32 0.5, %v2403_v10  ;;  %v2422_v8 = vpop.f32.mrb[141].mxu1 }
 0x358   : > { %v3004_v35 = vunpack.c.h.bf16 %v8723_v34  ;;  %v2713_v7 = vmul.bf16 1027030327, %v2585_v31  ;;  %v2997_v62 = vunpack.c.l.bf16 %v8674_v56  ;;  %v8740_v22 = vmul.f32 0.5, %v8671_v29  ;;  %v2424_v40 = vpop.f32.mrb[142].mxu1 }
 0x359   : > { %5591 = vtanh.f32 %v3003_v6  ;;  %v2714_v0 = vmul.bf16 1027030327, %v2586_v4  ;;  %v2421_v14 = vadd.f32 %v2420_v46, %v7783_v3  ;;  %v8744_v10 = vadd.f32 %v2424_v40, %v7783_v3  ;;  %v2426_v27 = vpop.f32.mrb[143].mxu1 }
 0x35a   : > { %v5584_v9 = vpop.eup %5583  ;;  %5593 = vtanh.f32 %v3004_v35  ;;  %v2777_v63 = vmul.bf16 %v2713_v7, %v2585_v31  ;;  %v3260_v1 = vmul.f32 0.5, %v8678_v51  ;;  %v2649_v53 = vmul.bf16 1061961548, %v2585_v31 }
 0x35b   : > { %v5586_v47 = vpop.eup %5585  ;;  %v3383_v17 = vadd.f32 1.0, %v5584_v9  ;;  %v2778_v12 = vmul.bf16 %v2714_v0, %v2586_v4  ;;  %5595 = vtanh.f32 %v2989_v41  ;;  %v2587_v33 = vpack.c.bf16 %v8744_v10, %v2421_v14 }
 0x35c   : > { %v5588_v29 = vpop.eup %5587  ;;  %v3384_v50 = vadd.f32 1.0, %v5586_v47  ;;  %v2841_v37 = vadd.bf16 1065369472, %v2777_v63  ;;  %v2650_v38 = vmul.bf16 1061961548, %v2586_v4  ;;  %v2998_v26 = vunpack.c.l.bf16 %v8681_v30 }
 0x35d   : > { %v8750_v59 = vmul.f32 %v3383_v17, %v3255_v61  ;;  %v3369_v15 = vadd.f32 1.0, %v5588_v29  ;;  %v2842_v39 = vadd.bf16 1065369472, %v2778_v12  ;;  %v2715_v60 = vmul.bf16 1027030327, %v2587_v33 }
 0x35e   : > { %v8753_v55 = vmul.f32 %v3384_v50, %v3256_v57  ;;  %v8755_v51 = vmul.bf16 %v2841_v37, %v2649_v53  ;;  %v8761_v24 = vadd.f32 %v2426_v27, %v7801_v58  ;;  %5597 = vtanh.f32 %v2994_v54 }
 0x35f   : > { %v3497_v21 = vmul.f32 %v3369_v15, %v8587_v2  ;;  %v8758_v41 = vmul.bf16 %v2842_v39, %v2650_v38  ;;  %v5590_v61 = vpop.eup %5589  ;;  %v2423_v4 = vadd.f32 %v2422_v8, %v7801_v58  ;;  %v2779_v6 = vmul.bf16 %v2715_v60, %v2587_v33 }
 0x360   : > { %v3007_v31 = vunpack.c.h.bf16 %v8755_v51  ;;  %5599 = vtanh.f32 %v2993_v48  ;;  %v8767_v57 = vmul.f32 0.5, %v8703_v23  ;;  %v3374_v46 = vadd.f32 1.0, %v5590_v61 }
 0x361   : > { %v3599_v30 = vpack.c.bf16 %v8626_v52, %v3497_v21  ;;  %v3008_v2 = vunpack.c.h.bf16 %v8758_v41  ;;  %v2651_v35 = vmul.bf16 1061961548, %v2587_v33  ;;  %v2843_v7 = vadd.bf16 1065369472, %v2779_v6  ;;  %v2430_v23 = vpop.f32.mrb[144].mxu1 }
 0x362   : > { %5601 = vtanh.f32 %v3007_v31  ;;  %v2588_v54 = vpack.c.bf16 %v8761_v24, %v2423_v4  ;;  %v8772_v40 = vmul.f32 0.5, %v8706_v25  ;;  %v8775_v48 = vmul.f32 0.5, %v8709_v18  ;;  %v2432_v17 = vpop.f32.mrb[145].mxu1 }
 0x363   : > { %v5592_v0 = vpop.eup %5591  ;;  %4004 = vmatmul.mubr.bf16.gmra.mrb[116].mxu0 %v3599_v30  ;;  %5603 = vtanh.f32 %v3008_v2  ;;  %v3502_v52 = vmul.f32 %v3374_v46, %v8621_v49  ;;  %v3264_v63 = vmul.f32 0.5, %v8715_v16  ;;  %v8779_v27 = vmul.bf16 %v2843_v7, %v2651_v35  ;;  %v2434_v53 = vpop.f32.mrb[146].mxu1 }
 0x364   : > { %v5594_v8 = vpop.eup %5593  ;;  %v3387_v9 = vadd.f32 1.0, %v5592_v0  ;;  %v2716_v47 = vmul.bf16 1027030327, %v2588_v54  ;;  %v3001_v29 = vunpack.c.l.bf16 %v8718_v5  ;;  %v3002_v25 = vunpack.c.l.bf16 %v8723_v34  ;;  %v2436_v15 = vpop.f32.mrb[147].mxu1 }
 0x365   : > { %v5596_v12 = vpop.eup %5595  ;;  %v3388_v50 = vadd.f32 1.0, %v5594_v8  ;;  %v3602_v18 = vpack.c.bf16 %v8662_v32, %v3502_v52  ;;  %v8787_v33 = vmul.f32 0.5, %v2421_v14  ;;  %v3011_v16 = vunpack.c.h.bf16 %v8779_v27 }
 0x366   : > { %v8785_v49 = vmul.f32 %v3387_v9, %v8740_v22  ;;  %v3373_v37 = vadd.f32 1.0, %v5596_v12  ;;  %v8792_v39 = vmul.f32 0.5, %v2423_v4  ;;  %v2780_v60 = vmul.bf16 %v2716_v47, %v2588_v54 }
 0x367   : > { %v8790_v38 = vmul.f32 %v3388_v50, %v3260_v1  ;;  %4013 = vmatprep.mubr.bf16.mxu0 %v3602_v18  ;;  %v8795_v21 = vadd.f32 %v2430_v23, %v7783_v3  ;;  %5605 = vtanh.f32 %v3011_v16  ;;  %v8799_v22 = vadd.f32 %v2434_v53, %v7783_v3 }
 0x368   : > { %v3501_v32 = vmul.f32 %v3373_v37, %v8617_v36  ;;  %v8802_v14 = vadd.f32 %v2436_v15, %v7801_v58  ;;  %v5598_v61 = vpop.eup %5597  ;;  %v2652_v31 = vmul.bf16 1061961548, %v2588_v54  ;;  %v2844_v1 = vadd.bf16 1065369472, %v2780_v60  ;;  %v10001_v60 = vld [vmem:[#allocation16_spill] sm:$0xff] }
 0x369   : > { %v8805_v6 = vadd.f32 %v2432_v17, %v7801_v58  ;;  %5607 = vtanh.f32 %v2998_v26  ;;  %v3267_v2 = vmul.f32 0.5, %v8744_v10  ;;  %v3378_v36 = vadd.f32 1.0, %v5598_v61  ;;  %v2440_v52 = vpop.f32.mrb[148].mxu1  ;;  %v3669_v26 = vld [vmem:[%s9674_s6] sm:$0x3] }
 0x36a   : > { %v5600_v4 = vpop.eup %5599  ;;  %v3601_v30 = vpack.c.bf16 %v8659_v44, %v3501_v32  ;;  %v2589_v46 = vpack.c.bf16 %v8799_v22, %v8795_v21  ;;  %v3005_v35 = vunpack.c.l.bf16 %v8755_v51  ;;  %v8812_v7 = vmul.bf16 %v2844_v1, %v2652_v31  ;;  %v2442_v9 = vpop.f32.mrb[149].mxu1 }
 0x36b   : > { %v3377_v0 = vadd.f32 1.0, %v5600_v4  ;;  %v2590_v54 = vpack.c.bf16 %v8802_v14, %v8805_v6  ;;  %v3006_v10 = vunpack.c.l.bf16 %v8758_v41  ;;  %v3506_v23 = vmul.f32 %v3378_v36, %v8687_v20  ;;  %v2444_v53 = vpop.f32.mrb[150].mxu1  ;;  %v10002_v36 = vld [vmem:[#allocation17_spill] sm:$0xff] }
 0x36c   : > { %v5602_v44 = vpop.eup %5601  ;;  %4014 = vmatmul.mubr.bf16.gmra.mrb[120].mxu0 %v3601_v30  ;;  %v2717_v8 = vmul.bf16 1027030327, %v2589_v46  ;;  %5609 = vtanh.f32 %v2997_v62  ;;  %v3012_v12 = vunpack.c.h.bf16 %v8812_v7  ;;  %v8825_v50 = vmul.f32 0.5, %v8761_v24  ;;  %v2446_v20 = vpop.f32.mrb[151].mxu1 }
 0x36d   : > { %v5604_v47 = vpop.eup %5603  ;;  %v3391_v17 = vadd.f32 1.0, %v5602_v44  ;;  %v3505_v18 = vmul.f32 %v3377_v0, %v8657_v11  ;;  %v3604_v16 = vpack.c.bf16 %v8728_v42, %v3506_v23  ;;  %v8830_v32 = vrot.slane %v3669_v26, %v10001_v60 }
 0x36e   : > { %v3392_v37 = vadd.f32 1.0, %v5604_v47  ;;  %v2781_v15 = vmul.bf16 %v2717_v8, %v2589_v46  ;;  %5611 = vtanh.f32 %v3012_v12  ;;  %v2718_v61 = vmul.bf16 1027030327, %v2590_v54 }
 0x36f   : > { %v8833_v56 = vmul.f32 %v3391_v17, %v8775_v48  ;;  %v3603_v62 = vpack.c.bf16 %v8711_v43, %v3505_v18  ;;  %4023 = vmatprep.mubr.bf16.mxu0 %v3604_v16  ;;  %v2653_v11 = vmul.bf16 1061961548, %v2589_v46  ;;  %v2441_v1 = vadd.f32 %v2440_v52, %v7783_v3 }
 0x370   : > { %v8836_v24 = vmul.f32 %v3392_v37, %v3264_v63  ;;  %v2845_v31 = vadd.bf16 1065369472, %v2781_v15  ;;  %v2782_v42 = vmul.bf16 %v2718_v61, %v2590_v54  ;;  %v8840_v4 = vadd.f32 %v2444_v53, %v7783_v3 }
 0x371   : > { %v8843_v30 = vadd.f32 %v2446_v20, %v7801_v58  ;;  %5613 = vtanh.f32 %v3002_v25  ;;  %v5606_v48 = vpop.eup %5605  ;;  %v2443_v63 = vadd.f32 %v2442_v9, %v7801_v58  ;;  %v8853_v46 = vrot.slane %v3669_v26, %v10002_v36 }
 0x372   : > { %v8847_v43 = vmul.bf16 %v2845_v31, %v2653_v11  ;;  %5615 = vtanh.f32 %v3001_v29  ;;  %v3395_v52 = vadd.f32 1.0, %v5606_v48  ;;  %v2654_v44 = vmul.bf16 1061961548, %v2590_v54 }
 0x373   : > { %v5608_v0 = vpop.eup %5607  ;;  %v2846_v23 = vadd.bf16 1065369472, %v2782_v42  ;;  %v2591_v8 = vpack.c.bf16 %v8840_v4, %v2441_v1  ;;  %v3009_v34 = vunpack.c.l.bf16 %v8779_v27  ;;  %v2592_v9 = vpack.c.bf16 %v8843_v30, %v2443_v63 }
 0x374   : > { %4024 = vmatmul.mubr.bf16.gmra.mrb[124].mxu0 %v3603_v62  ;;  %v3015_v25 = vunpack.c.h.bf16 %v8847_v43  ;;  %v3382_v47 = vadd.f32 1.0, %v5608_v0  ;;  %v8859_v17 = vmul.f32 %v3395_v52, %v3267_v2  ;;  %v8862_v5 = vmul.f32 0.5, %v8795_v21 }
 0x375   : > { %v8864_v29 = vmul.bf16 %v2846_v23, %v2654_v44  ;;  %v2719_v26 = vmul.bf16 1027030327, %v2591_v8  ;;  %v8867_v12 = vmul.f32 0.5, %v8805_v6  ;;  %v2720_v53 = vmul.bf16 1027030327, %v2592_v9  ;;  %v2450_v21 = vpop.f32.mrb[152].mxu1 }
 0x376   : > { %v5610_v54 = vpop.eup %5609  ;;  %5617 = vtanh.f32 %v3015_v25  ;;  %v3510_v18 = vmul.f32 %v3382_v47, %v8697_v45  ;;  %v8871_v37 = vmul.f32 0.5, %v8799_v22  ;;  %v8875_v20 = vmul.f32 0.5, %v8802_v14  ;;  %v2452_v61 = vpop.f32.mrb[153].mxu1 }
 0x377   : > { %v3016_v2 = vunpack.c.h.bf16 %v8864_v29  ;;  %v3381_v16 = vadd.f32 1.0, %v5610_v54  ;;  %v2783_v15 = vmul.bf16 %v2719_v26, %v2591_v8  ;;  %v2655_v62 = vmul.bf16 1061961548, %v2591_v8  ;;  %v2454_v42 = vpop.f32.mrb[154].mxu1 }
 0x378   : > { %v3606_v60 = vpack.c.bf16 %v8753_v55, %v3510_v18  ;;  %v2784_v6 = vmul.bf16 %v2720_v53, %v2592_v9  ;;  %v5612_v11 = vpop.eup %5611  ;;  %v2656_v22 = vmul.bf16 1061961548, %v2592_v9  ;;  %v2451_v0 = vadd.f32 %v2450_v21, %v7783_v3  ;;  %v2456_v52 = vpop.f32.mrb[155].mxu1 }
 0x379   : > { %5619 = vtanh.f32 %v3016_v2  ;;  %v3509_v45 = vmul.f32 %v3381_v16, %v8694_v28  ;;  %v2847_v31 = vadd.bf16 1065369472, %v2783_v15  ;;  %v3396_v48 = vadd.f32 1.0, %v5612_v11 }
 0x37a   : > { %4033 = vmatprep.mubr.bf16.mxu0 %v3606_v60  ;;  %v2848_v36 = vadd.bf16 1065369472, %v2784_v6  ;;  %v8881_v14 = vadd.f32 %v2454_v42, %v7783_v3  ;;  %v3010_v44 = vunpack.c.l.bf16 %v8812_v7  ;;  %v8888_v28 = vadd.f32 %v2456_v52, %v7801_v58 }
 0x37b   : > { %v5614_v55 = vpop.eup %5613  ;;  %v3605_v23 = vpack.c.bf16 %v8750_v59, %v3509_v45  ;;  %v8885_v8 = vmul.bf16 %v2847_v31, %v2655_v62  ;;  %v8891_v47 = vmul.f32 %v3396_v48, %v8825_v50  ;;  %v8896_v18 = vmul.f32 0.5, %v2441_v1 }
 0x37c   : > { %v5616_v25 = vpop.eup %5615  ;;  %v8893_v9 = vmul.bf16 %v2848_v36, %v2656_v22  ;;  %v3386_v26 = vadd.f32 1.0, %v5614_v55  ;;  %v2593_v54 = vpack.c.bf16 %v8881_v14, %v2451_v0  ;;  %v2453_v53 = vadd.f32 %v2452_v61, %v7801_v58 }
 0x37d   : > { %4034 = vmatmul.mubr.bf16.gmra.mrb[128].mxu0 %v3605_v23  ;;  %v3019_v7 = vunpack.c.h.bf16 %v8885_v8  ;;  %v3385_v59 = vadd.f32 1.0, %v5616_v25  ;;  %v8900_v2 = vmul.f32 0.5, %v2443_v63  ;;  %v8903_v16 = vmul.f32 0.5, %v8840_v4  ;;  %v2460_v62 = vpop.f32.mrb[156].mxu1 }
 0x37e   : > { %v3020_v50 = vunpack.c.h.bf16 %v8893_v9  ;;  %v3514_v15 = vmul.f32 %v3386_v26, %v8735_v13  ;;  %v2721_v60 = vmul.bf16 1027030327, %v2593_v54  ;;  %v2594_v1 = vpack.c.bf16 %v8888_v28, %v2453_v53  ;;  %v2462_v61 = vpop.f32.mrb[157].mxu1 }
 0x37f   : > { %5621 = vtanh.f32 %v3019_v7  ;;  %v3513_v21 = vmul.f32 %v3385_v59, %v8733_v19  ;;  %v3013_v11 = vunpack.c.l.bf16 %v8847_v43  ;;  %v3014_v63 = vunpack.c.l.bf16 %v8864_v29  ;;  %v2464_v19 = vpop.f32.mrb[158].mxu1 }
 0x380   : > { %v5618_v6 = vpop.eup %5617  ;;  %5623 = vtanh.f32 %v3020_v50  ;;  %v3608_v4 = vpack.c.bf16 %v8790_v38, %v3514_v15  ;;  %v3276_v31 = vmul.f32 0.5, %v8843_v30  ;;  %v2785_v22 = vmul.bf16 %v2721_v60, %v2593_v54  ;;  %v2466_v52 = vpop.f32.mrb[159].mxu1 }
 0x381   : > { %v3399_v45 = vadd.f32 1.0, %v5618_v6  ;;  %v3607_v13 = vpack.c.bf16 %v8785_v49, %v3513_v21  ;;  %v2657_v42 = vmul.bf16 1061961548, %v2593_v54  ;;  %v2722_v48 = vmul.bf16 1027030327, %v2594_v1 }
 0x382   : > { %4043 = vmatprep.mubr.bf16.mxu0 %v3608_v4  ;;  %5625 = vtanh.f32 %v3006_v10  ;;  %v2461_v36 = vadd.f32 %v2460_v62, %v7783_v3  ;;  %v2849_v23 = vadd.bf16 1065369472, %v2785_v22  ;;  %v8923_v49 = vadd.f32 %v2464_v19, %v7783_v3 }
 0x383   : > { %v5620_v55 = vpop.eup %5619  ;;  %v8918_v38 = vmul.f32 %v3399_v45, %v8871_v37  ;;  %5627 = vtanh.f32 %v3005_v35  ;;  %v2786_v25 = vmul.bf16 %v2722_v48, %v2594_v1  ;;  %v2463_v26 = vadd.f32 %v2462_v61, %v7801_v58 }
 0x384   : > { %v3400_v30 = vadd.f32 1.0, %v5620_v55  ;;  %v8927_v41 = vadd.f32 %v2466_v52, %v7801_v58  ;;  %v8929_v10 = vmul.f32 0.5, %v2451_v0  ;;  %v8931_v54 = vmul.bf16 %v2849_v23, %v2657_v42 }
 0x385   : > { %4044 = vmatmul.mubr.bf16.gmra.mrb[132].mxu0 %v3607_v13  ;;  %v2595_v37 = vpack.c.bf16 %v8923_v49, %v2461_v36  ;;  %5629 = vtanh.f32 %v3010_v44  ;;  %v2658_v35 = vmul.bf16 1061961548, %v2594_v1  ;;  %v2850_v7 = vadd.bf16 1065369472, %v2786_v25  ;;  %v2470_v60 = vpop.f32.mrb[160].mxu1 }
 0x386   : > { %v8935_v51 = vmul.f32 %v3400_v30, %v8875_v20  ;;  %v2596_v59 = vpack.c.bf16 %v8927_v41, %v2463_v26  ;;  %v3017_v50 = vunpack.c.l.bf16 %v8885_v8  ;;  %v8939_v15 = vmul.f32 0.5, %v2453_v53  ;;  %v2472_v20 = vpop.f32.mrb[161].mxu1 }
 0x387   : > { %v3023_v21 = vunpack.c.h.bf16 %v8931_v54  ;;  %v2723_v0 = vmul.bf16 1027030327, %v2595_v37  ;;  %v8943_v62 = vmul.f32 0.5, %v8881_v14  ;;  %v8945_v6 = vmul.bf16 %v2850_v7, %v2658_v35  ;;  %v2474_v45 = vpop.f32.mrb[162].mxu1 }
 0x388   : > { %v2724_v44 = vmul.bf16 1027030327, %v2596_v59  ;;  %5631 = vtanh.f32 %v3009_v34  ;;  %v3018_v4 = vunpack.c.l.bf16 %v8893_v9  ;;  %v2659_v53 = vmul.bf16 1061961548, %v2595_v37  ;;  %v2476_v48 = vpop.f32.mrb[163].mxu1 }
 0x389   : > { %v5622_v1 = vpop.eup %5621  ;;  %5633 = vtanh.f32 %v3023_v21  ;;  %v2787_v61 = vmul.bf16 %v2723_v0, %v2595_v37  ;;  %v3024_v19 = vunpack.c.h.bf16 %v8945_v6  ;;  %v2660_v14 = vmul.bf16 1061961548, %v2596_v59 }
 0x38a   : > { %v5624_v13 = vpop.eup %5623  ;;  %v3403_v22 = vadd.f32 1.0, %v5622_v1  ;;  %v2788_v42 = vmul.bf16 %v2724_v44, %v2596_v59  ;;  %v8952_v27 = vadd.f32 %v2470_v60, %v7783_v3  ;;  %v8955_v34 = vadd.f32 %v2472_v20, %v7801_v58 }
 0x38b   : > { %v3404_v52 = vadd.f32 1.0, %v5624_v13  ;;  %v2851_v55 = vadd.bf16 1065369472, %v2787_v61  ;;  %5635 = vtanh.f32 %v3024_v19  ;;  %v8961_v37 = vadd.f32 %v2474_v45, %v7783_v3 }
 0x38c   : > { %v5626_v23 = vpop.eup %5625  ;;  %v8958_v30 = vmul.f32 %v3403_v22, %v8903_v16  ;;  %v2852_v25 = vadd.bf16 1065369472, %v2788_v42  ;;  %v8968_v0 = vadd.f32 %v2476_v48, %v7801_v58  ;;  %v3280_v60 = vmul.f32 0.5, %v8888_v28 }
 0x38d   : > { %v5628_v35 = vpop.eup %5627  ;;  %v8963_v7 = vmul.f32 %v3404_v52, %v3276_v31  ;;  %v3390_v59 = vadd.f32 1.0, %v5626_v23  ;;  %v8965_v21 = vmul.bf16 %v2851_v55, %v2659_v53  ;;  %v2597_v16 = vpack.c.bf16 %v8961_v37, %v8952_v27 }
 0x38e   : > { %v3389_v44 = vadd.f32 1.0, %v5628_v35  ;;  %v8971_v20 = vmul.bf16 %v2852_v25, %v2660_v14  ;;  %v8976_v45 = vmul.f32 0.5, %v2461_v36  ;;  %v2598_v53 = vpack.c.bf16 %v8968_v0, %v8955_v34 }
 0x38f   : > { %v5630_v1 = vpop.eup %5629  ;;  %v3518_v61 = vmul.f32 %v3390_v59, %v8772_v40  ;;  %v3027_v31 = vunpack.c.h.bf16 %v8965_v21  ;;  %v2480_v13 = vpop.f32.mrb[164].mxu1  ;;  %v8982_v28 = vmul.f32 0.5, %v2463_v26  ;;  %v8987_v40 = vmul.f32 0.5, %v8923_v49 }
 0x390   : > { %v3517_v22 = vmul.f32 %v3389_v44, %v8767_v57  ;;  %v3028_v19 = vunpack.c.h.bf16 %v8971_v20  ;;  %v3394_v14 = vadd.f32 1.0, %v5630_v1  ;;  %v2482_v42 = vpop.f32.mrb[165].mxu1  ;;  %v2725_v36 = vmul.bf16 1027030327, %v2597_v16 }
 0x391   : > { %v3610_v48 = vpack.c.bf16 %v8836_v24, %v3518_v61  ;;  %5637 = vtanh.f32 %v3027_v31  ;;  %v2484_v52 = vpop.f32.mrb[166].mxu1  ;;  %v8991_v57 = vmul.f32 0.5, %v8927_v41  ;;  %v3021_v59 = vunpack.c.l.bf16 %v8931_v54 }
 0x392   : > { %v5632_v55 = vpop.eup %5631  ;;  %v3609_v23 = vpack.c.bf16 %v8833_v56, %v3517_v22  ;;  %5639 = vtanh.f32 %v3028_v19  ;;  %v3522_v26 = vmul.f32 %v3394_v14, %v8792_v39  ;;  %v2486_v25 = vpop.f32.mrb[167].mxu1  ;;  %v2789_v44 = vmul.bf16 %v2725_v36, %v2597_v16 }
 0x393   : > { %v5634_v35 = vpop.eup %5633  ;;  %4053 = vmatprep.mubr.bf16.mxu0 %v3610_v48  ;;  %v3393_v24 = vadd.f32 1.0, %v5632_v55  ;;  %v2726_v49 = vmul.bf16 1027030327, %v2598_v53  ;;  %v2661_v31 = vmul.bf16 1061961548, %v2597_v16  ;;  %5641 = vtanh.f32 %v3014_v63 }
 0x394   : > { %v3407_v1 = vadd.f32 1.0, %v5634_v35  ;;  %4054 = vmatmul.mubr.bf16.gmra.mrb[136].mxu0 %v3609_v23  ;;  %v3612_v61 = vpack.c.bf16 %v8891_v47, %v3522_v26  ;;  %v2853_v41 = vadd.bf16 1065369472, %v2789_v44  ;;  %5643 = vtanh.f32 %v3013_v11 }
 0x395   : > { %v3521_v56 = vmul.f32 %v3393_v24, %v8787_v33  ;;  %v2790_v39 = vmul.bf16 %v2726_v49, %v2598_v53  ;;  %v5636_v22 = vpop.eup %5635  ;;  %v2662_v14 = vmul.bf16 1061961548, %v2598_v53  ;;  %v2481_v48 = vadd.f32 %v2480_v13, %v7783_v3 }
 0x396   : > { %v9002_v19 = vmul.f32 %v3407_v1, %v8943_v62  ;;  %4063 = vmatprep.mubr.bf16.mxu0 %v3612_v61  ;;  %v9006_v47 = vadd.f32 %v2484_v52, %v7783_v3  ;;  %v3408_v29 = vadd.f32 1.0, %v5636_v22  ;;  %v9009_v33 = vmul.bf16 %v2853_v41, %v2661_v31 }
 0x397   : > { %v3611_v63 = vpack.c.bf16 %v8859_v17, %v3521_v56  ;;  %v2854_v16 = vadd.bf16 1065369472, %v2790_v39  ;;  %v2490_v36 = vpop.f32.mrb[168].mxu1  ;;  %v3022_v43 = vunpack.c.l.bf16 %v8945_v6  ;;  %v2483_v11 = vadd.f32 %v2482_v42, %v7801_v58 }
 0x398   : > { %v2599_v62 = vpack.c.bf16 %v9006_v47, %v2481_v48  ;;  %v9015_v53 = vadd.f32 %v2486_v25, %v7801_v58  ;;  %v2492_v13 = vpop.f32.mrb[169].mxu1  ;;  %v9017_v55 = vmul.f32 %v3408_v29, %v3280_v60  ;;  %v9020_v52 = vmul.f32 0.5, %v8952_v27 }
 0x399   : > { %v3031_v17 = vunpack.c.h.bf16 %v9009_v33  ;;  %v9023_v23 = vmul.bf16 %v2854_v16, %v2662_v14  ;;  %v2494_v26 = vpop.f32.mrb[170].mxu1  ;;  %v9026_v6 = vmul.f32 0.5, %v8955_v34  ;;  %v9029_v42 = vmul.f32 0.5, %v8961_v37 }
 0x39a   : > { %v2727_v35 = vmul.bf16 1027030327, %v2599_v62  ;;  %v2600_v25 = vpack.c.bf16 %v9015_v53, %v2483_v11  ;;  %v2496_v24 = vpop.f32.mrb[171].mxu1  ;;  %v3025_v44 = vunpack.c.l.bf16 %v8965_v21  ;;  %v3026_v27 = vunpack.c.l.bf16 %v8971_v20 }
 0x39b   : > { %v5638_v60 = vpop.eup %5637  ;;  %5645 = vtanh.f32 %v3031_v17  ;;  %v3032_v49 = vunpack.c.h.bf16 %v9023_v23  ;;  %v9036_v34 = vmul.f32 0.5, %v8968_v0  ;;  %v2663_v41 = vmul.bf16 1061961548, %v2599_v62 }
 0x39c   : > { %v5640_v1 = vpop.eup %5639  ;;  %v3411_v61 = vadd.f32 1.0, %v5638_v60  ;;  %4064 = vmatmul.mubr.bf16.gmra.mrb[140].mxu0 %v3611_v63  ;;  %v2791_v37 = vmul.bf16 %v2727_v35, %v2599_v62  ;;  %v2728_v31 = vmul.bf16 1027030327, %v2600_v25  ;;  %v9039_v39 = vadd.f32 %v2490_v36, %v7783_v3 }
 0x39d   : > { %v3412_v56 = vadd.f32 1.0, %v5640_v1  ;;  %5647 = vtanh.f32 %v3032_v49  ;;  %v5642_v22 = vpop.eup %5641  ;;  %v2664_v35 = vmul.bf16 1061961548, %v2600_v25  ;;  %v9054_v49 = vadd.f32 %v2494_v26, %v7783_v3 }
 0x39e   : > { %v9042_v14 = vmul.f32 %v3411_v61, %v8987_v40  ;;  %v2855_v29 = vadd.bf16 1065369472, %v2791_v37  ;;  %v2792_v16 = vmul.bf16 %v2728_v31, %v2600_v25  ;;  %5649 = vtanh.f32 %v3018_v4  ;;  %v5644_v63 = vpop.eup %5643 }
 0x39f   : > { %v9047_v0 = vmul.f32 %v3412_v56, %v8991_v57  ;;  %v3398_v17 = vadd.f32 1.0, %v5642_v22  ;;  %5651 = vtanh.f32 %v3017_v50  ;;  %v2500_v36 = vpop.f32.mrb[172].mxu1  ;;  %v3397_v62 = vadd.f32 1.0, %v5644_v63 }
 0x3a0   : > { %v9051_v60 = vmul.bf16 %v2855_v29, %v2663_v41  ;;  %v2856_v40 = vadd.bf16 1065369472, %v2792_v16  ;;  %v2502_v1 = vpop.f32.mrb[173].mxu1  ;;  %v2493_v4 = vadd.f32 %v2492_v13, %v7801_v58  ;;  %v9059_v57 = vadd.f32 %v2496_v24, %v7801_v58 }
 0x3a1   : > { %v3526_v9 = vmul.f32 %v3398_v17, %v8867_v12  ;;  %5653 = vtanh.f32 %v3022_v43  ;;  %v2504_v25 = vpop.f32.mrb[174].mxu1  ;;  %v3525_v8 = vmul.f32 %v3397_v62, %v8862_v5  ;;  %v9062_v50 = vmul.f32 0.5, %v2481_v48 }
 0x3a2   : > { %v3035_v61 = vunpack.c.h.bf16 %v9051_v60  ;;  %v9065_v37 = vmul.bf16 %v2856_v40, %v2664_v35  ;;  %v2506_v26 = vpop.f32.mrb[175].mxu1  ;;  %v9068_v56 = vmul.f32 0.5, %v2483_v11  ;;  %v2601_v12 = vpack.c.bf16 %v9054_v49, %v9039_v39 }
 0x3a3   : > { %v3614_v31 = vpack.c.bf16 %v8935_v51, %v3526_v9  ;;  %v2602_v13 = vpack.c.bf16 %v9059_v57, %v2493_v4  ;;  %v3613_v43 = vpack.c.bf16 %v8918_v38, %v3525_v8  ;;  %v9075_v5 = vmul.f32 0.5, %v9006_v47 }
 0x3a4   : > { %5655 = vtanh.f32 %v3035_v61  ;;  %v3036_v48 = vunpack.c.h.bf16 %v9065_v37  ;;  %v9080_v51 = vmul.f32 0.5, %v9015_v53  ;;  %v2729_v11 = vmul.bf16 1027030327, %v2601_v12 }
 0x3a5   : > { %v5646_v24 = vpop.eup %5645  ;;  %4073 = vmatprep.mubr.bf16.mxu0 %v3614_v31  ;;  %5657 = vtanh.f32 %v3021_v59  ;;  %v2730_v47 = vmul.bf16 1027030327, %v2602_v13  ;;  %v2665_v16 = vmul.bf16 1061961548, %v2601_v12  ;;  %v9086_v17 = vadd.f32 %v2500_v36, %v7783_v3 }
 0x3a6   : > { %v3415_v22 = vadd.f32 1.0, %v5646_v24  ;;  %4074 = vmatmul.mubr.bf16.gmra.mrb[144].mxu0 %v3613_v43  ;;  %5659 = vtanh.f32 %v3036_v48  ;;  %v2793_v63 = vmul.bf16 %v2729_v11, %v2601_v12  ;;  %v9089_v35 = vadd.f32 %v2504_v25, %v7783_v3 }
 0x3a7   : > { %v5648_v29 = vpop.eup %5647  ;;  %v9091_v53 = vpop.f32.mrb[176].mxu1  ;;  %v2794_v40 = vmul.bf16 %v2730_v47, %v2602_v13  ;;  %v9097_v9 = vadd.f32 %v2506_v26, %v7801_v58  ;;  %v2666_v12 = vmul.bf16 1061961548, %v2602_v13  ;;  %v2503_v11 = vadd.f32 %v2502_v1, %v7801_v58 }
 0x3a8   : > { %v5650_v62 = vpop.eup %5649  ;;  %v9094_v54 = vmul.f32 %v3415_v22, %v9029_v42  ;;  %v3416_v59 = vadd.f32 1.0, %v5648_v29  ;;  %v9099_v8 = vpop.f32.mrb[177].mxu1  ;;  %v2857_v36 = vadd.bf16 1065369472, %v2793_v63  ;;  %v2603_v25 = vpack.c.bf16 %v9089_v35, %v9086_v17 }
 0x3a9   : > { %v5652_v61 = vpop.eup %5651  ;;  %v3402_v31 = vadd.f32 1.0, %v5650_v62  ;;  %v9103_v43 = vpop.f32.mrb[178].mxu1  ;;  %v2858_v24 = vadd.bf16 1065369472, %v2794_v40  ;;  %v9111_v29 = vmul.f32 0.5, %v9039_v39  ;;  %v9120_v1 = vmul.f32 0.5, %v2493_v4 }
 0x3aa   : > { %v9106_v48 = vmul.f32 %v3416_v59, %v9036_v34  ;;  %v3401_v42 = vadd.f32 1.0, %v5652_v61  ;;  %v2516_v26 = vpop.f32.mrb[179].mxu1  ;;  %v9113_v13 = vmul.bf16 %v2857_v36, %v2665_v16  ;;  %v2731_v63 = vmul.bf16 1027030327, %v2603_v25 }
 0x3ab   : > { %v5654_v22 = vpop.eup %5653  ;;  %v3530_v47 = vmul.f32 %v3402_v31, %v8900_v2  ;;  %v9116_v41 = vmul.bf16 %v2858_v24, %v2666_v12  ;;  %v2604_v59 = vpack.c.bf16 %v9097_v9, %v2503_v11  ;;  %v2667_v24 = vmul.bf16 1061961548, %v2603_v25 }
 0x3ac   : > { %v3529_v62 = vmul.f32 %v3401_v42, %v8896_v18  ;;  %v3406_v34 = vadd.f32 1.0, %v5654_v22  ;;  %v3039_v61 = vunpack.c.h.bf16 %v9113_v13  ;;  %v2795_v2 = vmul.bf16 %v2731_v63, %v2603_v25 }
 0x3ad   : > { %v3616_v40 = vpack.c.bf16 %v8963_v7, %v3530_v47  ;;  %v3040_v36 = vunpack.c.h.bf16 %v9116_v41  ;;  %v2732_v39 = vmul.bf16 1027030327, %v2604_v59  ;;  %v9163_v21 = vadd.f32 %v2516_v26, %v7801_v58 }
 0x3ae   : > { %v5656_v31 = vpop.eup %5655  ;;  %v3615_v16 = vpack.c.bf16 %v8958_v30, %v3529_v62  ;;  %v3534_v18 = vmul.f32 %v3406_v34, %v8939_v15  ;;  %5661 = vtanh.f32 %v3039_v61  ;;  %v2859_v7 = vadd.bf16 1065369472, %v2795_v2 }
 0x3af   : > { %v5658_v12 = vpop.eup %5657  ;;  %v3419_v42 = vadd.f32 1.0, %v5656_v31  ;;  %4083 = vmatprep.mubr.bf16.mxu0 %v3616_v40  ;;  %v2520_v4 = vpop.f32.mrb[180].mxu1  ;;  %5663 = vtanh.f32 %v3040_v36  ;;  %v3295_v34 = vmul.f32 0.5, %v9054_v49  ;;  %v3034_v2 = vunpack.c.l.bf16 %v9065_v37 }
 0x3b0   : > { %v5660_v22 = vpop.eup %5659  ;;  %4084 = vmatmul.mubr.bf16.gmra.mrb[148].mxu0 %v3615_v16  ;;  %v3618_v47 = vpack.c.bf16 %v9017_v55, %v3534_v18  ;;  %v3405_v63 = vadd.f32 1.0, %v5658_v12  ;;  %v2522_v38 = vpop.f32.mrb[181].mxu1  ;;  %v9134_v40 = vmul.bf16 %v2859_v7, %v2667_v24  ;;  %v2796_v31 = vmul.bf16 %v2732_v39, %v2604_v59 }
 0x3b1   : > { %v9128_v30 = vpop.f32.mrb[64].mxu0  ;;  %v9131_v62 = vmul.f32 %v3419_v42, %v9075_v5  ;;  %v3420_v15 = vadd.f32 1.0, %v5660_v22  ;;  %v2524_v25 = vpop.f32.mrb[182].mxu1  ;;  %5665 = vtanh.f32 %v3026_v27  ;;  %v3296_v49 = vmul.f32 0.5, %v9059_v57 }
 0x3b2   : > { %v9136_v61 = vpop.f32.mrb[65].mxu0  ;;  %4093 = vmatprep.mubr.bf16.mxu0 %v3618_v47  ;;  %v3533_v55 = vmul.f32 %v3405_v63, %v8929_v10  ;;  %v2526_v16 = vpop.f32.mrb[183].mxu1  ;;  %v3043_v18 = vunpack.c.h.bf16 %v9134_v40  ;;  %5667 = vtanh.f32 %v3025_v44  ;;  %v2668_v39 = vmul.bf16 1061961548, %v2604_v59 }
 0x3b3   : > { %v9142_v5 = vpop.f32.mrb[66].mxu0  ;;  %v9145_v36 = vmul.f32 %v3420_v15, %v9080_v51  ;;  %v2860_v20 = vadd.bf16 1065369472, %v2796_v31  ;;  %v9156_v27 = vadd.f32 %v9091_v53, %v7783_v3  ;;  %v2513_v51 = vadd.f32 %v9099_v8, %v7801_v58 }
 0x3b4   : > { %v9151_v37 = vpop.f32.mrb[67].mxu0  ;;  %v3617_v10 = vpack.c.bf16 %v9002_v19, %v3533_v55  ;;  %5669 = vtanh.f32 %v3043_v18  ;;  %v2515_v57 = vadd.f32 %v9103_v43, %v7783_v3  ;;  %v9166_v44 = vmul.f32 0.5, %v9086_v17 }
 0x3b5   : > { %10003 = vst [vmem:[#allocation62_spill] sm:$0xff] %v9156_v27  ;;  %v9168_v19 = vmul.f32 0.5, %v2503_v11  ;;  %v9170_v59 = vmul.bf16 %v2860_v20, %v2668_v39  ;;  %v10005_v53 = vunpack.c.l.bf16 %v9023_v23  ;;  %v3299_v8 = vmul.f32 0.5, %v9089_v35 }
 0x3b6   : > { %10004 = vst [vmem:[#allocation63_spill] sm:$0xff] %v9166_v44  ;;  %v2605_v42 = vpack.c.bf16 %v2515_v57, %v9156_v27  ;;  %v2606_v43 = vpack.c.bf16 %v9163_v21, %v2513_v51  ;;  %v9183_v24 = vmul.f32 0.5, %v9097_v9  ;;  %v10006_v23 = vunpack.c.l.bf16 %v9009_v33 }
 0x3b7   : > { %5671 = vtanh.f32 %v10005_v53  ;;  %v9178_v26 = vpop.f32.mrb[184].mxu1  ;;  %v3044_v11 = vunpack.c.h.bf16 %v9170_v59  ;;  %v9191_v63 = vadd.f32 %v2520_v4, %v7783_v3  ;;  %v9194_v15 = vadd.f32 %v2524_v25, %v7783_v3 }
 0x3b8   : > { %4094 = vmatmul.mubr.bf16.gmra.mrb[152].mxu0 %v3617_v10  ;;  %5673 = vtanh.f32 %v10006_v23  ;;  %v9187_v7 = vpop.f32.mrb[185].mxu1  ;;  %v5662_v35 = vpop.eup %5661  ;;  %v2733_v47 = vmul.bf16 1027030327, %v2605_v42  ;;  %v2734_v9 = vmul.bf16 1027030327, %v2606_v43  ;;  %v9197_v18 = vadd.f32 %v2522_v38, %v7801_v58 }
 0x3b9   : > { %10007 = vst [vmem:[#allocation23_spill] sm:$0xff] %v9191_v63  ;;  %v5664_v55 = vpop.eup %5663  ;;  %v3423_v31 = vadd.f32 1.0, %v5662_v35  ;;  %5675 = vtanh.f32 %v3044_v11  ;;  %v9199_v33 = vpop.f32.mrb[186].mxu1  ;;  %v2669_v39 = vmul.bf16 1061961548, %v2605_v42  ;;  %v2607_v53 = vpack.c.bf16 %v9194_v15, %v9191_v63 }
 0x3ba   : > { %10008 = vst [vmem:[#allocation24_spill] sm:$0xff] %v9197_v18  ;;  %v3424_v10 = vadd.f32 1.0, %v5664_v55  ;;  %v2797_v20 = vmul.bf16 %v2733_v47, %v2605_v42  ;;  %v9203_v4 = vpop.f32.mrb[187].mxu1  ;;  %v2798_v22 = vmul.bf16 %v2734_v9, %v2606_v43  ;;  %v2527_v11 = vadd.f32 %v2526_v16, %v7801_v58 }
 0x3bb   : > { %v5666_v23 = vpop.eup %5665  ;;  %v9205_v25 = vmul.f32 %v3423_v31, %v3295_v34  ;;  %5677 = vtanh.f32 %v3034_v2  ;;  %v2670_v55 = vmul.bf16 1061961548, %v2606_v43  ;;  %v2735_v47 = vmul.bf16 1027030327, %v2607_v53 }
 0x3bc   : > { %v5668_v35 = vpop.eup %5667  ;;  %v9208_v38 = vmul.f32 %v3424_v10, %v3296_v49  ;;  %v3410_v12 = vadd.f32 1.0, %v5666_v23  ;;  %v2861_v17 = vadd.bf16 1065369472, %v2797_v20  ;;  %v2862_v42 = vadd.bf16 1065369472, %v2798_v22 }
 0x3bd   : > { %v3409_v27 = vadd.f32 1.0, %v5668_v35  ;;  %v9211_v63 = vpack.c.bf16 %v2527_v11, %v9197_v18  ;;  %v9214_v31 = vmul.f32 0.5, %v2513_v51  ;;  %v10010_v2 = vunpack.c.l.bf16 %v9051_v60 }
 0x3be   : > { %v5670_v44 = vpop.eup %5669  ;;  %v3538_v34 = vmul.f32 %v3410_v12, %v8982_v28  ;;  %v9216_v9 = vmul.bf16 %v2861_v17, %v2669_v39  ;;  %v9225_v20 = vmul.bf16 %v2862_v42, %v2670_v55  ;;  %v2799_v23 = vmul.bf16 %v2735_v47, %v2607_v53 }
 0x3bf   : > { %10009 = vst [vmem:[#allocation75_spill] sm:$0xff] %v9214_v31  ;;  %5679 = vtanh.f32 %v10010_v2  ;;  %v9220_v16 = vpop.f32.mrb[188].mxu1  ;;  %v9222_v49 = vpop.f32.mrb[68].mxu0  ;;  %v3427_v22 = vadd.f32 1.0, %v5670_v44  ;;  %v3537_v10 = vmul.f32 %v3409_v27, %v8976_v45  ;;  %v9233_v12 = vmul.f32 0.5, %v2515_v57 }
 0x3c0   : > { %v9227_v35 = vpop.f32.mrb[189].mxu1  ;;  %v9229_v28 = vpop.f32.mrb[69].mxu0  ;;  %v3620_v51 = vpack.c.bf16 %v9047_v0, %v3538_v34  ;;  %v3047_v60 = vunpack.c.h.bf16 %v9216_v9  ;;  %v3048_v55 = vunpack.c.h.bf16 %v9225_v20  ;;  %v2671_v42 = vmul.bf16 1061961548, %v2607_v53 }
 0x3c1   : > { %v5672_v43 = vpop.eup %5671  ;;  %v9235_v39 = vpop.f32.mrb[190].mxu1  ;;  %v9239_v45 = vmul.f32 %v3427_v22, %v3299_v8  ;;  %v3619_v27 = vpack.c.bf16 %v9042_v14, %v3537_v10  ;;  %v3042_v31 = vunpack.c.l.bf16 %v9170_v59  ;;  %v3304_v14 = vmul.f32 0.5, %v9163_v21 }
 0x3c2   : > { %v3414_v17 = vadd.f32 1.0, %v5672_v43  ;;  %v9237_v2 = vpop.f32.mrb[70].mxu0  ;;  %v5674_v44 = vpop.eup %5673  ;;  %4103 = vmatprep.mubr.bf16.mxu0 %v3620_v51  ;;  %5681 = vtanh.f32 %v3047_v60  ;;  %v2863_v43 = vadd.bf16 1065369472, %v2799_v23  ;;  %v2736_v8 = vmul.bf16 1027030327, %v9211_v63 }
 0x3c3   : > { %v9243_v47 = vpop.f32.mrb[191].mxu1  ;;  %v9245_v0 = vpop.f32.mrb[71].mxu0  ;;  %v3413_v34 = vadd.f32 1.0, %v5674_v44  ;;  %4104 = vmatmul.mubr.bf16.gmra.mrb[156].mxu0 %v3619_v27  ;;  %5683 = vtanh.f32 %v3048_v55  ;;  %v2535_v21 = vadd.f32 %v9199_v33, %v7783_v3  ;;  %v9270_v44 = vmul.f32 0.5, %v2527_v11 }
 0x3c4   : > { %v3542_v57 = vmul.f32 %v3414_v17, %v9026_v6  ;;  %v5676_v18 = vpop.eup %5675  ;;  %v9253_v51 = vmul.bf16 %v2863_v43, %v2671_v42  ;;  %v9256_v6 = vmul.f32 0.5, %v9194_v15  ;;  %v2800_v23 = vmul.bf16 %v2736_v8, %v9211_v63 }
 0x3c5   : > { %v3428_v53 = vadd.f32 1.0, %v5676_v18  ;;  %v3541_v10 = vmul.f32 %v3413_v34, %v9020_v52  ;;  %v5678_v60 = vpop.eup %5677  ;;  %v9261_v17 = vadd.f32 %v9178_v26, %v7783_v3  ;;  %v2672_v15 = vmul.bf16 1061961548, %v9211_v63 }
 0x3c6   : > { %v3622_v22 = vpack.c.bf16 %v9106_v48, %v3542_v57  ;;  %v3051_v48 = vunpack.c.h.bf16 %v9253_v51  ;;  %v2864_v27 = vadd.bf16 1065369472, %v2800_v23  ;;  %v3418_v55 = vadd.f32 1.0, %v5678_v60 }
 0x3c7   : > { %v9266_v18 = vmul.f32 %v3428_v53, %v9183_v24  ;;  %v3621_v52 = vpack.c.bf16 %v9094_v54, %v3541_v10  ;;  %v2609_v26 = vpack.c.bf16 %v2535_v21, %v9261_v17  ;;  %v3045_v57 = vunpack.c.l.bf16 %v9216_v9 }
 0x3c8   : > { %4113 = vmatprep.mubr.bf16.mxu0 %v3622_v22  ;;  %5685 = vtanh.f32 %v3051_v48  ;;  %v9277_v24 = vadd.f32 %v9187_v7, %v7801_v58  ;;  %v2537_v54 = vadd.f32 %v9203_v4, %v7801_v58  ;;  %v3046_v33 = vunpack.c.l.bf16 %v9225_v20 }
 0x3c9   : > { %v5680_v42 = vpop.eup %5679  ;;  %v9282_v11 = vmul.bf16 %v2864_v27, %v2672_v15  ;;  %v3546_v63 = vmul.f32 %v3418_v55, %v9068_v56  ;;  %v3049_v43 = vunpack.c.l.bf16 %v9253_v51  ;;  %v2737_v8 = vmul.bf16 1027030327, %v2609_v26 }
 0x3ca   : > { %v3417_v34 = vadd.f32 1.0, %v5680_v42  ;;  %v2610_v53 = vpack.c.bf16 %v2537_v54, %v9277_v24  ;;  %v10011_v22 = vunpack.c.l.bf16 %v9116_v41  ;;  %v9292_v60 = vmul.f32 0.5, %v2535_v21 }
 0x3cb   : > { %4114 = vmatmul.mubr.bf16.gmra.mrb[160].mxu0 %v3621_v52  ;;  %v3052_v7 = vunpack.c.h.bf16 %v9282_v11  ;;  %v3624_v4 = vpack.c.bf16 %v9145_v36, %v3546_v63  ;;  %v2801_v48 = vmul.bf16 %v2737_v8, %v2609_v26  ;;  %v10012_v27 = vunpack.c.l.bf16 %v9113_v13 }
 0x3cc   : > { %5687 = vtanh.f32 %v10011_v22  ;;  %v3545_v10 = vmul.f32 %v3417_v34, %v9062_v50  ;;  %v5682_v56 = vpop.eup %5681  ;;  %v2738_v15 = vmul.bf16 1027030327, %v2610_v53  ;;  %v3876_v41 = vadd.f32 %v9128_v30, %v8830_v32 }
 0x3cd   : > { %5689 = vtanh.f32 %v10012_v27  ;;  %v5684_v55 = vpop.eup %5683  ;;  %v3431_v42 = vadd.f32 1.0, %v5682_v56  ;;  %4123 = vmatprep.mubr.bf16.mxu0 %v3624_v4  ;;  %v2673_v36 = vmul.bf16 1061961548, %v2609_v26  ;;  %v2865_v34 = vadd.bf16 1065369472, %v2801_v48 }
 0x3ce   : > { %v9294_v23 = vpop.f32.mrb[72].mxu0  ;;  %5691 = vtanh.f32 %v3052_v7  ;;  %v3623_v50 = vpack.c.bf16 %v9131_v62, %v3545_v10  ;;  %v3432_v63 = vadd.f32 1.0, %v5684_v55  ;;  %v2802_v8 = vmul.bf16 %v2738_v15, %v2610_v53 }
 0x3cf   : > { %v9300_v52 = vpop.f32.mrb[73].mxu0  ;;  %v3878_v13 = vadd.f32 %v9136_v61, %v8853_v46  ;;  %v9310_v30 = vmul.f32 %v3431_v42, %v9233_v12  ;;  %v2674_v56 = vmul.bf16 1061961548, %v2610_v53  ;;  %v9312_v7 = vmul.f32 0.5, %v2537_v54 }
 0x3d0   : > { %v9303_v21 = vpop.f32.mrb[74].mxu0  ;;  %v3880_v62 = vadd.f32 %v9142_v5, %v8830_v32  ;;  %v9316_v26 = vmul.f32 %v3432_v63, %v3304_v14  ;;  %v9318_v4 = vmul.bf16 %v2865_v34, %v2673_v36  ;;  %v2866_v10 = vadd.bf16 1065369472, %v2802_v8 }
 0x3d1   : > { %v9307_v22 = vpop.f32.mrb[75].mxu0  ;;  %v4925_v48 = vpack.c.bf16 %v3878_v13, %v3876_v41  ;;  %v9322_v61 = vadd.f32 %v9220_v16, %v7783_v3  ;;  %v9326_v12 = vadd.f32 %v9235_v39, %v7783_v3  ;;  %v3882_v54 = vadd.f32 %v9151_v37, %v8853_v46 }
 0x3d2   : > { %v9332_v5 = vadd.f32 %v9243_v47, %v7801_v58  ;;  %v5686_v14 = vpop.eup %5685  ;;  %v3055_v53 = vunpack.c.h.bf16 %v9318_v4  ;;  %v9335_v15 = vmul.bf16 %v2866_v10, %v2674_v56  ;;  %v9344_v3 = vadd.f32 %v9227_v35, %v7801_v58 }
 0x3d3   : > { %4578 = vst [vmem:[%s9339_s12] sm:$0xff] %v4925_v48  ;;  %5693 = vtanh.f32 %v3042_v31  ;;  %v3435_v37 = vadd.f32 1.0, %v5686_v14  ;;  %v3050_v16 = vunpack.c.l.bf16 %v9282_v11  ;;  %4124 = vmatmul.mubr.bf16.gmra.mrb[164].mxu0 %v3623_v50  ;;  %v2611_v39 = vpack.c.bf16 %v9326_v12, %v9322_v61 }
 0x3d4   : > { %v4926_v47 = vpack.c.bf16 %v3882_v54, %v3880_v62  ;;  %5695 = vtanh.f32 %v3055_v53  ;;  %v3056_v58 = vunpack.c.h.bf16 %v9335_v15  ;;  %v2612_v59 = vpack.c.bf16 %v9332_v5, %v9344_v3 }
 0x3d5   : > { %v9360_v35 = vmul.f32 %v3435_v37, %v9256_v6  ;;  %v2675_v50 = vmul.bf16 1061961548, %v2611_v39  ;;  %v2739_v36 = vmul.bf16 1027030327, %v2611_v39  ;;  %v10013_v6 = vunpack.c.l.bf16 %v9134_v40 }
 0x3d6   : > { %v9351_v27 = vpop.f32.mrb[76].mxu0  ;;  %v5688_v41 = vpop.eup %5687  ;;  %4579 = vst [vmem:[%s9339_s12 + $0x8] sm:$0xff] %v4926_v47  ;;  %5697 = vtanh.f32 %v3056_v58  ;;  %v2676_v13 = vmul.bf16 1061961548, %v2612_v59  ;;  %v2740_v56 = vmul.bf16 1027030327, %v2612_v59  ;;  %v3886_v47 = vadd.f32 %v9222_v49, %v8830_v32 }
 0x3d7   : > { %v9357_v31 = vpop.f32.mrb[77].mxu0  ;;  %v3422_v42 = vadd.f32 1.0, %v5688_v41  ;;  %v5690_v34 = vpop.eup %5689  ;;  %v2803_v14 = vmul.bf16 %v2739_v36, %v2611_v39  ;;  %5699 = vtanh.f32 %v10013_v6  ;;  %v3888_v41 = vadd.f32 %v9229_v28, %v8853_v46 }
 0x3d8   : > { %v3909_v63 = vpop.f32.mrb[78].mxu0  ;;  %v5692_v10 = vpop.eup %5691  ;;  %v3421_v54 = vadd.f32 1.0, %v5690_v34  ;;  %v2804_v37 = vmul.bf16 %v2740_v56, %v2612_v59  ;;  %v3892_v49 = vadd.f32 %v9245_v0, %v8853_v46  ;;  %5701 = vtanh.f32 %v3046_v33 }
 0x3d9   : > { %v9364_v62 = vpop.f32.mrb[79].mxu0  ;;  %v3550_v48 = vmul.f32 %v3422_v42, %v9120_v1  ;;  %v3436_v53 = vadd.f32 1.0, %v5692_v10  ;;  %v2867_v8 = vadd.bf16 1065369472, %v2803_v14  ;;  %v3890_v1 = vadd.f32 %v9237_v2, %v8830_v32 }
 0x3da   : > { %v3549_v55 = vmul.f32 %v3421_v54, %v9111_v29  ;;  %v2868_v39 = vadd.bf16 1065369472, %v2804_v37  ;;  %v4927_v59 = vpack.c.bf16 %v3888_v41, %v3886_v47  ;;  %v3896_v29 = vadd.f32 %v9294_v23, %v8830_v32 }
 0x3db   : > { %v3626_v58 = vpack.c.bf16 %v9208_v38, %v3550_v48  ;;  %v9378_v40 = vmul.f32 %v3436_v53, %v9270_v44  ;;  %v9383_v42 = vmul.bf16 %v2867_v8, %v2675_v50  ;;  %v4928_v36 = vpack.c.bf16 %v3892_v49, %v3890_v1 }
 0x3dc   : > { %v3625_v28 = vpack.c.bf16 %v9205_v25, %v3549_v55  ;;  %v2932_v44 = vmul.bf16 %v2868_v39, %v2676_v13  ;;  %4580 = vst [vmem:[%s9339_s12 + $0x10] sm:$0xff] %v4927_v59  ;;  %5703 = vtanh.f32 %v3045_v57  ;;  %v3898_v25 = vadd.f32 %v9300_v52, %v8853_v46 }
 0x3dd   : > { %4133 = vmatprep.mubr.bf16.mxu0 %v3626_v58  ;;  %v5694_v2 = vpop.eup %5693  ;;  %v3057_v20 = vunpack.c.l.bf16 %v9383_v42  ;;  %v3059_v33 = vunpack.c.h.bf16 %v9383_v42  ;;  %v3900_v23 = vadd.f32 %v9303_v21, %v8830_v32  ;;  %4581 = vst [vmem:[%s9339_s12 + $0x18] sm:$0xff] %v4928_v36  ;;  %v3902_v57 = vadd.f32 %v9307_v22, %v8853_v46 }
 0x3de   : > { %v3915_v38 = vpop.f32.mrb[80].mxu0  ;;  %4134 = vmatmul.mubr.bf16.gmra.mrb[168].mxu0 %v3625_v28  ;;  %v3426_v55 = vadd.f32 1.0, %v5694_v2  ;;  %v5696_v34 = vpop.eup %5695  ;;  %v3058_v8 = vunpack.c.l.bf16 %v2932_v44  ;;  %v3060_v13 = vunpack.c.h.bf16 %v2932_v44  ;;  %v4929_v9 = vpack.c.bf16 %v3898_v25, %v3896_v29 }
 0x3df   : > { %v3917_v0 = vpop.f32.mrb[81].mxu0  ;;  %v3439_v56 = vadd.f32 1.0, %v5696_v34  ;;  %5705 = vtanh.f32 %v3059_v33  ;;  %v3906_v48 = vadd.f32 %v9351_v27, %v8830_v32  ;;  %v4930_v21 = vpack.c.bf16 %v3902_v57, %v3900_v23  ;;  %v10018_v33 = vld [vmem:[#allocation75_spill] sm:$0xff] }
 0x3e0   : > { %v3919_v50 = vpop.f32.mrb[82].mxu0  ;;  %v3554_v10 = vmul.f32 %v3426_v55, %v9168_v19  ;;  %v5698_v54 = vpop.eup %5697  ;;  %5707 = vtanh.f32 %v3060_v13  ;;  %4582 = vst [vmem:[%s9339_s12 + $0x20] sm:$0xff] %v4929_v9  ;;  %v3908_v14 = vadd.f32 %v9357_v31, %v8853_v46  ;;  %v3910_v6 = vadd.f32 %v3909_v63, %v8830_v32 }
 0x3e1   : > { %v3921_v52 = vpop.f32.mrb[83].mxu0  ;;  %v5700_v53 = vpop.eup %5699  ;;  %v9409_v22 = vmul.f32 %v3439_v56, %v9292_v60  ;;  %v3440_v37 = vadd.f32 1.0, %v5698_v54  ;;  %5709 = vtanh.f32 %v3050_v16  ;;  %4583 = vst [vmem:[%s9339_s12 + $0x28] sm:$0xff] %v4930_v21  ;;  %v3912_v31 = vadd.f32 %v9364_v62, %v8853_v46  ;;  %v10015_v16 = vld [vmem:[#allocation63_spill] sm:$0xff] }
 0x3e2   : > { %v3628_v19 = vpack.c.bf16 %v9266_v18, %v3554_v10  ;;  %v3425_v27 = vadd.f32 1.0, %v5700_v53  ;;  %5711 = vtanh.f32 %v3049_v43  ;;  %v4931_v47 = vpack.c.bf16 %v3908_v14, %v3906_v48  ;;  %v5702_v58 = vpop.eup %5701  ;;  %v10019_v56 = vld [vmem:[#allocation23_spill] sm:$0xff] }
 0x3e3   : > { %v9420_v63 = vmul.f32 %v3440_v37, %v9312_v7  ;;  %v10014_v60 = vunpack.c.l.bf16 %v9335_v15  ;;  %v3916_v18 = vadd.f32 %v3915_v38, %v8830_v32  ;;  %v3918_v11 = vadd.f32 %v3917_v0, %v8853_v46  ;;  %v10017_v38 = vld [vmem:[#allocation62_spill] sm:$0xff] }
 0x3e4   : > { %4143 = vmatprep.mubr.bf16.mxu0 %v3628_v19  ;;  %v3553_v41 = vmul.f32 %v3425_v27, %v10015_v16  ;;  %4584 = vst [vmem:[%s9339_s12 + $0x30] sm:$0xff] %v4931_v47  ;;  %v4932_v51 = vpack.c.bf16 %v3912_v31, %v3910_v6  ;;  %v10016_v43 = vunpack.c.l.bf16 %v9318_v4  ;;  %v3920_v62 = vadd.f32 %v3919_v50, %v8830_v32  ;;  %v10020_v6 = vld [vmem:[#allocation24_spill] sm:$0xff] }
 0x3e5   : > { %5713 = vtanh.f32 %v10014_v60  ;;  %v4933_v1 = vpack.c.bf16 %v3918_v11, %v3916_v18  ;;  %v3922_v15 = vadd.f32 %v3921_v52, %v8853_v46  ;;  %v3430_v42 = vadd.f32 1.0, %v5702_v58 }
 0x3e6   : > { %5715 = vtanh.f32 %v10016_v43  ;;  %v3925_v7 = vpop.f32.mrb[84].mxu0  ;;  %v5704_v49 = vpop.eup %5703  ;;  %v3627_v28 = vpack.c.bf16 %v9239_v45, %v3553_v41  ;;  %4585 = vst [vmem:[%s9339_s12 + $0x38] sm:$0xff] %v4932_v51  ;;  %v3301_v2 = vmul.f32 0.5, %v10017_v38  ;;  %v3305_v10 = vmul.f32 0.5, %v10019_v56 }
 0x3e7   : > { %5717 = vtanh.f32 %v3058_v8  ;;  %v3926_v39 = vadd.f32 %v3925_v7, %v8830_v32  ;;  %v3927_v59 = vpop.f32.mrb[85].mxu0  ;;  %v3429_v44 = vadd.f32 1.0, %v5704_v49  ;;  %4586 = vst [vmem:[%s9339_s12 + $0x40] sm:$0xff] %v4933_v1  ;;  %v4934_v36 = vpack.c.bf16 %v3922_v15, %v3920_v62 }
 0x3e8   : > { %5719 = vtanh.f32 %v3057_v20  ;;  %v3928_v4 = vadd.f32 %v3927_v59, %v8853_v46  ;;  %v3929_v29 = vpop.f32.mrb[86].mxu0  ;;  %4144 = vmatmul.mubr.bf16.gmra.mrb[172].mxu0 %v3627_v28  ;;  %v3558_v55 = vmul.f32 %v3430_v42, %v10018_v33  ;;  %v3315_v8 = vmul.f32 0.5, %v9326_v12 }
 0x3e9   : > { %v3930_v25 = vadd.f32 %v3929_v29, %v8830_v32  ;;  %v3931_v0 = vpop.f32.mrb[87].mxu0  ;;  %v5706_v50 = vpop.eup %5705  ;;  %v3557_v20 = vmul.f32 %v3429_v44, %v3301_v2  ;;  %4587 = vst [vmem:[%s9339_s12 + $0x48] sm:$0xff] %v4934_v36  ;;  %v3316_v48 = vmul.f32 0.5, %v9332_v5  ;;  %v3306_v53 = vmul.f32 0.5, %v10020_v6 }
 0x3ea   : > { %v4935_v45 = vpack.c.bf16 %v3928_v4, %v3926_v39  ;;  %v3932_v23 = vadd.f32 %v3931_v0, %v8853_v46  ;;  %v5708_v34 = vpop.eup %5707  ;;  %v3443_v13 = vadd.f32 1.0, %v5706_v50  ;;  %v3630_v9 = vpack.c.bf16 %v9316_v26, %v3558_v55 }
 0x3eb   : > { %v5710_v52 = vpop.eup %5709  ;;  %v3444_v54 = vadd.f32 1.0, %v5708_v34  ;;  %v3629_v21 = vpack.c.bf16 %v9310_v30, %v3557_v20  ;;  %v3309_v37 = vmul.f32 0.5, %v9261_v17  ;;  %v3310_v47 = vmul.f32 0.5, %v9277_v24 }
 0x3ec   : > { %4588 = vst [vmem:[%s9339_s12 + $0x50] sm:$0xff] %v4935_v45  ;;  %v4936_v57 = vpack.c.bf16 %v3932_v23, %v3930_v25  ;;  %v5712_v14 = vpop.eup %5711  ;;  %v9450_v12 = vmul.f32 %v3443_v13, %v3315_v8  ;;  %4153 = vmatprep.mubr.bf16.mxu0 %v3630_v9  ;;  %v3434_v19 = vadd.f32 1.0, %v5710_v52  ;;  %v3313_v11 = vmul.f32 0.5, %v9322_v61 }
 0x3ed   : > { %v3572_v31 = vmul.f32 %v3444_v54, %v3316_v48  ;;  %v3433_v60 = vadd.f32 1.0, %v5712_v14  ;;  %v3314_v62 = vmul.f32 0.5, %v9344_v3 }
 0x3ee   : > { %4589 = vst [vmem:[%s9339_s12 + $0x58] sm:$0xff] %v4936_v57  ;;  %v3935_v26 = vpop.f32.mrb[88].mxu0  ;;  %v3562_v16 = vmul.f32 %v3434_v19, %v3306_v53 }
 0x3ef   : > { %v5714_v27 = vpop.eup %5713  ;;  %v3936_v5 = vadd.f32 %v3935_v26, %v8830_v32  ;;  %v3937_v18 = vpop.f32.mrb[89].mxu0  ;;  %v3561_v7 = vmul.f32 %v3433_v60, %v3305_v10 }
 0x3f0   : > { %v5716_v30 = vpop.eup %5715  ;;  %v3438_v41 = vadd.f32 1.0, %v5714_v27  ;;  %v3938_v17 = vadd.f32 %v3937_v18, %v8853_v46  ;;  %v3939_v51 = vpop.f32.mrb[90].mxu0  ;;  %4154 = vmatmul.mubr.bf16.gmra.mrb[176].mxu0 %v3629_v21  ;;  %v3632_v39 = vpack.c.bf16 %v9378_v40, %v3562_v16 }
 0x3f1   : > { %v5718_v43 = vpop.eup %5717  ;;  %v3437_v58 = vadd.f32 1.0, %v5716_v30  ;;  %v3940_v24 = vadd.f32 %v3939_v51, %v8830_v32  ;;  %v3941_v1 = vpop.f32.mrb[91].mxu0  ;;  %v3631_v28 = vpack.c.bf16 %v9360_v35, %v3561_v7 }
 0x3f2   : > { %v5720_v15 = vpop.eup %5719  ;;  %v3566_v59 = vmul.f32 %v3438_v41, %v3310_v47  ;;  %v3442_v61 = vadd.f32 1.0, %v5718_v43  ;;  %v4937_v49 = vpack.c.bf16 %v3938_v17, %v3936_v5  ;;  %v3942_v3 = vadd.f32 %v3941_v1, %v8853_v46  ;;  %4163 = vmatprep.mubr.bf16.mxu0 %v3632_v39 }
 0x3f3   : > { %v3565_v42 = vmul.f32 %v3437_v58, %v3309_v37  ;;  %v3441_v4 = vadd.f32 1.0, %v5720_v15 }
 0x3f4   : > { %v3634_v29 = vpack.c.bf16 %v9420_v63, %v3566_v59  ;;  %v3570_v38 = vmul.f32 %v3442_v61, %v3314_v62  ;;  %4590 = vst [vmem:[%s9339_s12 + $0x60] sm:$0xff] %v4937_v49  ;;  %v4938_v40 = vpack.c.bf16 %v3942_v3, %v3940_v24 }
 0x3f5   : > { %v3633_v2 = vpack.c.bf16 %v9409_v22, %v3565_v42  ;;  %v3569_v44 = vmul.f32 %v3441_v4, %v3313_v11 }
 0x3f6   : > { %v3636_v36 = vpack.c.bf16 %v3572_v31, %v3570_v38  ;;  %v3945_v25 = vpop.f32.mrb[92].mxu0  ;;  %4591 = vst [vmem:[%s9339_s12 + $0x68] sm:$0xff] %v4938_v40 }
 0x3f7   : > { %v3635_v0 = vpack.c.bf16 %v9450_v12, %v3569_v44  ;;  %v3946_v35 = vadd.f32 %v3945_v25, %v8830_v32  ;;  %v3947_v33 = vpop.f32.mrb[93].mxu0 }
 0x3f8   : > { %v3948_v55 = vadd.f32 %v3947_v33, %v8853_v46  ;;  %v3949_v45 = vpop.f32.mrb[94].mxu0  ;;  %4164 = vmatmul.mubr.bf16.gmra.mrb[180].mxu0 %v3631_v28 }
 0x3f9   : > { %v3950_v63 = vadd.f32 %v3949_v45, %v8830_v32  ;;  %v3951_v23 = vpop.f32.mrb[95].mxu0  ;;  %4173 = vmatprep.mubr.bf16.mxu0 %v3634_v29 }
 0x3fa   : > { %v4939_v22 = vpack.c.bf16 %v3948_v55, %v3946_v35  ;;  %v3952_v50 = vadd.f32 %v3951_v23, %v8853_v46 }
 0x3fc   : > { %4592 = vst [vmem:[%s9339_s12 + $0x70] sm:$0xff] %v4939_v22  ;;  %v4940_v20 = vpack.c.bf16 %v3952_v50, %v3950_v63 }
 0x3fe   : > { %4593 = vst [vmem:[%s9339_s12 + $0x78] sm:$0xff] %v4940_v20  ;;  %v3955_v34 = vpop.f32.mrb[96].mxu0 }
 0x3ff   : > { %v3956_v8 = vadd.f32 %v3955_v34, %v8830_v32  ;;  %v3957_v13 = vpop.f32.mrb[97].mxu0 }
 0x400   : > { %v3958_v9 = vadd.f32 %v3957_v13, %v8853_v46  ;;  %v3959_v57 = vpop.f32.mrb[98].mxu0  ;;  %4174 = vmatmul.mubr.bf16.gmra.mrb[184].mxu0 %v3633_v2 }
 0x401   : > { %v3960_v52 = vadd.f32 %v3959_v57, %v8830_v32  ;;  %v3961_v56 = vpop.f32.mrb[99].mxu0  ;;  %4183 = vmatprep.mubr.bf16.mxu0 %v3636_v36 }
 0x402   : > { %v4941_v10 = vpack.c.bf16 %v3958_v9, %v3956_v8  ;;  %v3962_v48 = vadd.f32 %v3961_v56, %v8853_v46 }
 0x404   : > { %4594 = vst [vmem:[%s9339_s12 + $0x80] sm:$0xff] %v4941_v10  ;;  %v4942_v54 = vpack.c.bf16 %v3962_v48, %v3960_v52 }
 0x406   : > { %4595 = vst [vmem:[%s9339_s12 + $0x88] sm:$0xff] %v4942_v54  ;;  %v3965_v21 = vpop.f32.mrb[100].mxu0 }
 0x407   : > { %v3966_v14 = vadd.f32 %v3965_v21, %v8830_v32  ;;  %v3967_v6 = vpop.f32.mrb[101].mxu0 }
 0x408   : > { %v3968_v53 = vadd.f32 %v3967_v6, %v8853_v46  ;;  %v3969_v37 = vpop.f32.mrb[102].mxu0  ;;  %4184 = vmatmul.mubr.bf16.gmra.mrb[188].mxu0 %v3635_v0 }
 0x409   : > { %v3970_v12 = vadd.f32 %v3969_v37, %v8830_v32  ;;  %v3971_v19 = vpop.f32.mrb[103].mxu0 }
 0x40a   : > { %v4943_v26 = vpack.c.bf16 %v3968_v53, %v3966_v14  ;;  %v3972_v27 = vadd.f32 %v3971_v19, %v8853_v46 }
 0x40c   : > { %4596 = vst [vmem:[%s9339_s12 + $0x90] sm:$0xff] %v4943_v26  ;;  %v4944_v47 = vpack.c.bf16 %v3972_v27, %v3970_v12 }
 0x40e   : > { %4597 = vst [vmem:[%s9339_s12 + $0x98] sm:$0xff] %v4944_v47 }
 0x413   : > { %v3975_v31 = vpop.f32.mrb[104].mxu0 }
 0x414   : > { %v3976_v60 = vadd.f32 %v3975_v31, %v8830_v32  ;;  %v3977_v5 = vpop.f32.mrb[105].mxu0 }
 0x415   : > { %v3978_v18 = vadd.f32 %v3977_v5, %v8853_v46  ;;  %v3979_v30 = vpop.f32.mrb[106].mxu0 }
 0x416   : > { %v3980_v11 = vadd.f32 %v3979_v30, %v8830_v32  ;;  %v3981_v16 = vpop.f32.mrb[107].mxu0 }
 0x417   : > { %v4945_v41 = vpack.c.bf16 %v3978_v18, %v3976_v60  ;;  %v3982_v17 = vadd.f32 %v3981_v16, %v8853_v46 }
 0x419   : > { %4598 = vst [vmem:[%s9339_s12 + $0xa0] sm:$0xff] %v4945_v41  ;;  %v4946_v51 = vpack.c.bf16 %v3982_v17, %v3980_v11 }
 0x41b   : > { %4599 = vst [vmem:[%s9339_s12 + $0xa8] sm:$0xff] %v4946_v51  ;;  %v3985_v43 = vpop.f32.mrb[108].mxu0 }
 0x41c   : > { %v3986_v62 = vadd.f32 %v3985_v43, %v8830_v32  ;;  %v3987_v7 = vpop.f32.mrb[109].mxu0 }
 0x41d   : > { %v3988_v58 = vadd.f32 %v3987_v7, %v8853_v46  ;;  %v3989_v24 = vpop.f32.mrb[110].mxu0 }
 0x41e   : > { %v3990_v1 = vadd.f32 %v3989_v24, %v8830_v32  ;;  %v3991_v15 = vpop.f32.mrb[111].mxu0 }
 0x41f   : > { %v4947_v39 = vpack.c.bf16 %v3988_v58, %v3986_v62  ;;  %v3992_v59 = vadd.f32 %v3991_v15, %v8853_v46 }
 0x421   : > { %4600 = vst [vmem:[%s9339_s12 + $0xb0] sm:$0xff] %v4947_v39  ;;  %v4948_v61 = vpack.c.bf16 %v3992_v59, %v3990_v1 }
 0x423   : > { %4601 = vst [vmem:[%s9339_s12 + $0xb8] sm:$0xff] %v4948_v61  ;;  %v3995_v49 = vpop.f32.mrb[112].mxu0 }
 0x424   : > { %v3996_v28 = vadd.f32 %v3995_v49, %v8830_v32  ;;  %v3997_v42 = vpop.f32.mrb[113].mxu0 }
 0x425   : > { %v3998_v4 = vadd.f32 %v3997_v42, %v8853_v46  ;;  %v3999_v3 = vpop.f32.mrb[114].mxu0 }
 0x426   : > { %v4000_v29 = vadd.f32 %v3999_v3, %v8830_v32  ;;  %v4001_v38 = vpop.f32.mrb[115].mxu0 }
 0x427   : > { %v4949_v2 = vpack.c.bf16 %v3998_v4, %v3996_v28  ;;  %v4002_v44 = vadd.f32 %v4001_v38, %v8853_v46 }
 0x429   : > { %4602 = vst [vmem:[%s9339_s12 + $0xc0] sm:$0xff] %v4949_v2  ;;  %v4950_v40 = vpack.c.bf16 %v4002_v44, %v4000_v29 }
 0x42b   : > { %4603 = vst [vmem:[%s9339_s12 + $0xc8] sm:$0xff] %v4950_v40 }
 0x436   : > { %v4005_v36 = vpop.f32.mrb[116].mxu0 }
 0x437   : > { %v4006_v25 = vadd.f32 %v4005_v36, %v8830_v32  ;;  %v4007_v0 = vpop.f32.mrb[117].mxu0 }
 0x438   : > { %v4008_v35 = vadd.f32 %v4007_v0, %v8853_v46  ;;  %v4009_v33 = vpop.f32.mrb[118].mxu0 }
 0x439   : > { %v4010_v55 = vadd.f32 %v4009_v33, %v8830_v32  ;;  %v4011_v45 = vpop.f32.mrb[119].mxu0 }
 0x43a   : > { %v4951_v63 = vpack.c.bf16 %v4008_v35, %v4006_v25  ;;  %v4012_v23 = vadd.f32 %v4011_v45, %v8853_v46 }
 0x43c   : > { %4604 = vst [vmem:[%s9339_s12 + $0xd0] sm:$0xff] %v4951_v63  ;;  %v4952_v22 = vpack.c.bf16 %v4012_v23, %v4010_v55 }
 0x43e   : > { %4605 = vst [vmem:[%s9339_s12 + $0xd8] sm:$0xff] %v4952_v22 }
 0x43f   : > { %v4015_v50 = vpop.f32.mrb[120].mxu0 }
 0x440   : > { %v4016_v20 = vadd.f32 %v4015_v50, %v8830_v32  ;;  %v4017_v34 = vpop.f32.mrb[121].mxu0 }
 0x441   : > { %v4018_v8 = vadd.f32 %v4017_v34, %v8853_v46  ;;  %v4019_v13 = vpop.f32.mrb[122].mxu0 }
 0x442   : > { %v4020_v9 = vadd.f32 %v4019_v13, %v8830_v32  ;;  %v4021_v57 = vpop.f32.mrb[123].mxu0 }
 0x443   : > { %v4953_v52 = vpack.c.bf16 %v4018_v8, %v4016_v20  ;;  %v4022_v56 = vadd.f32 %v4021_v57, %v8853_v46 }
 0x445   : > { %4606 = vst [vmem:[%s9339_s12 + $0xe0] sm:$0xff] %v4953_v52  ;;  %v4954_v10 = vpack.c.bf16 %v4022_v56, %v4020_v9 }
 0x447   : > { %4607 = vst [vmem:[%s9339_s12 + $0xe8] sm:$0xff] %v4954_v10  ;;  %v4025_v48 = vpop.f32.mrb[124].mxu0 }
 0x448   : > { %v4026_v54 = vadd.f32 %v4025_v48, %v8830_v32  ;;  %v4027_v21 = vpop.f32.mrb[125].mxu0 }
 0x449   : > { %v4028_v14 = vadd.f32 %v4027_v21, %v8853_v46  ;;  %v4029_v6 = vpop.f32.mrb[126].mxu0 }
 0x44a   : > { %v4030_v53 = vadd.f32 %v4029_v6, %v8830_v32  ;;  %v4031_v37 = vpop.f32.mrb[127].mxu0 }
 0x44b   : > { %v4955_v12 = vpack.c.bf16 %v4028_v14, %v4026_v54  ;;  %v4032_v19 = vadd.f32 %v4031_v37, %v8853_v46 }
 0x44d   : > { %4608 = vst [vmem:[%s9339_s12 + $0xf0] sm:$0xff] %v4955_v12  ;;  %v4956_v26 = vpack.c.bf16 %v4032_v19, %v4030_v53 }
 0x44f   : > { %4609 = vst [vmem:[%s9339_s12 + $0xf8] sm:$0xff] %v4956_v26 }
 0x450   : > { %v4035_v27 = vpop.f32.mrb[128].mxu0 }
 0x451   : > { %v4036_v47 = vadd.f32 %v4035_v27, %v8830_v32  ;;  %v4037_v31 = vpop.f32.mrb[129].mxu0 }
 0x452   : > { %v4038_v60 = vadd.f32 %v4037_v31, %v8853_v46  ;;  %v4039_v5 = vpop.f32.mrb[130].mxu0 }
 0x453   : > { %v4040_v18 = vadd.f32 %v4039_v5, %v8830_v32  ;;  %v4041_v30 = vpop.f32.mrb[131].mxu0 }
 0x454   : > { %v4957_v11 = vpack.c.bf16 %v4038_v60, %v4036_v47  ;;  %v4042_v16 = vadd.f32 %v4041_v30, %v8853_v46 }
 0x456   : > { %4610 = vst [vmem:[%s9339_s12 + $0x100] sm:$0xff] %v4957_v11  ;;  %v4958_v41 = vpack.c.bf16 %v4042_v16, %v4040_v18 }
 0x458   : > { %4611 = vst [vmem:[%s9339_s12 + $0x108] sm:$0xff] %v4958_v41  ;;  %v4045_v17 = vpop.f32.mrb[132].mxu0 }
 0x459   : > { %v4046_v51 = vadd.f32 %v4045_v17, %v8830_v32  ;;  %v4047_v43 = vpop.f32.mrb[133].mxu0 }
 0x45a   : > { %v4048_v62 = vadd.f32 %v4047_v43, %v8853_v46  ;;  %v4049_v7 = vpop.f32.mrb[134].mxu0 }
 0x45b   : > { %v4050_v58 = vadd.f32 %v4049_v7, %v8830_v32  ;;  %v4051_v24 = vpop.f32.mrb[135].mxu0 }
 0x45c   : > { %v4959_v1 = vpack.c.bf16 %v4048_v62, %v4046_v51  ;;  %v4052_v15 = vadd.f32 %v4051_v24, %v8853_v46 }
 0x45e   : > { %4612 = vst [vmem:[%s9339_s12 + $0x110] sm:$0xff] %v4959_v1  ;;  %v4960_v39 = vpack.c.bf16 %v4052_v15, %v4050_v58 }
 0x460   : > { %4613 = vst [vmem:[%s9339_s12 + $0x118] sm:$0xff] %v4960_v39 }
 0x467   : > { %v4055_v59 = vpop.f32.mrb[136].mxu0 }
 0x468   : > { %v4056_v61 = vadd.f32 %v4055_v59, %v8830_v32  ;;  %v4057_v49 = vpop.f32.mrb[137].mxu0 }
 0x469   : > { %v4058_v28 = vadd.f32 %v4057_v49, %v8853_v46  ;;  %v4059_v42 = vpop.f32.mrb[138].mxu0 }
 0x46a   : > { %v4060_v4 = vadd.f32 %v4059_v42, %v8830_v32  ;;  %v4061_v3 = vpop.f32.mrb[139].mxu0 }
 0x46b   : > { %v4961_v29 = vpack.c.bf16 %v4058_v28, %v4056_v61  ;;  %v4062_v38 = vadd.f32 %v4061_v3, %v8853_v46 }
 0x46d   : > { %4614 = vst [vmem:[%s9339_s12 + $0x120] sm:$0xff] %v4961_v29  ;;  %v4962_v2 = vpack.c.bf16 %v4062_v38, %v4060_v4 }
 0x46f   : > { %4615 = vst [vmem:[%s9339_s12 + $0x128] sm:$0xff] %v4962_v2  ;;  %v4065_v44 = vpop.f32.mrb[140].mxu0 }
 0x470   : > { %v4066_v40 = vadd.f32 %v4065_v44, %v8830_v32  ;;  %v4067_v36 = vpop.f32.mrb[141].mxu0 }
 0x471   : > { %v4068_v25 = vadd.f32 %v4067_v36, %v8853_v46  ;;  %v4069_v0 = vpop.f32.mrb[142].mxu0 }
 0x472   : > { %v4070_v35 = vadd.f32 %v4069_v0, %v8830_v32  ;;  %v4071_v33 = vpop.f32.mrb[143].mxu0 }
 0x473   : > { %v4963_v55 = vpack.c.bf16 %v4068_v25, %v4066_v40  ;;  %v4072_v45 = vadd.f32 %v4071_v33, %v8853_v46 }
 0x475   : > { %4616 = vst [vmem:[%s9339_s12 + $0x130] sm:$0xff] %v4963_v55  ;;  %v4964_v63 = vpack.c.bf16 %v4072_v45, %v4070_v35 }
 0x477   : > { %4617 = vst [vmem:[%s9339_s12 + $0x138] sm:$0xff] %v4964_v63 }
 0x479   : > { %v4075_v23 = vpop.f32.mrb[144].mxu0 }
 0x47a   : > { %v4076_v22 = vadd.f32 %v4075_v23, %v8830_v32  ;;  %v4077_v50 = vpop.f32.mrb[145].mxu0 }
 0x47b   : > { %v4078_v20 = vadd.f32 %v4077_v50, %v8853_v46  ;;  %v4079_v34 = vpop.f32.mrb[146].mxu0 }
 0x47c   : > { %v4080_v8 = vadd.f32 %v4079_v34, %v8830_v32  ;;  %v4081_v13 = vpop.f32.mrb[147].mxu0 }
 0x47d   : > { %v4965_v9 = vpack.c.bf16 %v4078_v20, %v4076_v22  ;;  %v4082_v57 = vadd.f32 %v4081_v13, %v8853_v46 }
 0x47f   : > { %4618 = vst [vmem:[%s9339_s12 + $0x140] sm:$0xff] %v4965_v9  ;;  %v4966_v52 = vpack.c.bf16 %v4082_v57, %v4080_v8 }
 0x481   : > { %4619 = vst [vmem:[%s9339_s12 + $0x148] sm:$0xff] %v4966_v52 }
 0x483   : > { %v4085_v56 = vpop.f32.mrb[148].mxu0 }
 0x484   : > { %v4086_v10 = vadd.f32 %v4085_v56, %v8830_v32  ;;  %v4087_v48 = vpop.f32.mrb[149].mxu0 }
 0x485   : > { %v4088_v54 = vadd.f32 %v4087_v48, %v8853_v46  ;;  %v4089_v21 = vpop.f32.mrb[150].mxu0 }
 0x486   : > { %v4090_v14 = vadd.f32 %v4089_v21, %v8830_v32  ;;  %v4091_v6 = vpop.f32.mrb[151].mxu0 }
 0x487   : > { %v4967_v53 = vpack.c.bf16 %v4088_v54, %v4086_v10  ;;  %v4092_v37 = vadd.f32 %v4091_v6, %v8853_v46 }
 0x489   : > { %4620 = vst [vmem:[%s9339_s12 + $0x150] sm:$0xff] %v4967_v53  ;;  %v4968_v12 = vpack.c.bf16 %v4092_v37, %v4090_v14 }
 0x48b   : > { %4621 = vst [vmem:[%s9339_s12 + $0x158] sm:$0xff] %v4968_v12  ;;  %v4095_v19 = vpop.f32.mrb[152].mxu0 }
 0x48c   : > { %v4096_v26 = vadd.f32 %v4095_v19, %v8830_v32  ;;  %v4097_v27 = vpop.f32.mrb[153].mxu0 }
 0x48d   : > { %v4098_v47 = vadd.f32 %v4097_v27, %v8853_v46  ;;  %v4099_v31 = vpop.f32.mrb[154].mxu0 }
 0x48e   : > { %v4100_v60 = vadd.f32 %v4099_v31, %v8830_v32  ;;  %v4101_v5 = vpop.f32.mrb[155].mxu0 }
 0x48f   : > { %v4969_v18 = vpack.c.bf16 %v4098_v47, %v4096_v26  ;;  %v4102_v30 = vadd.f32 %v4101_v5, %v8853_v46 }
 0x491   : > { %4622 = vst [vmem:[%s9339_s12 + $0x160] sm:$0xff] %v4969_v18  ;;  %v4970_v11 = vpack.c.bf16 %v4102_v30, %v4100_v60 }
 0x493   : > { %4623 = vst [vmem:[%s9339_s12 + $0x168] sm:$0xff] %v4970_v11 }
 0x496   : > { %v4105_v16 = vpop.f32.mrb[156].mxu0 }
 0x497   : > { %v4106_v41 = vadd.f32 %v4105_v16, %v8830_v32  ;;  %v4107_v17 = vpop.f32.mrb[157].mxu0 }
 0x498   : > { %v4108_v51 = vadd.f32 %v4107_v17, %v8853_v46  ;;  %v4109_v43 = vpop.f32.mrb[158].mxu0 }
 0x499   : > { %v4110_v62 = vadd.f32 %v4109_v43, %v8830_v32  ;;  %v4111_v7 = vpop.f32.mrb[159].mxu0 }
 0x49a   : > { %v4971_v58 = vpack.c.bf16 %v4108_v51, %v4106_v41  ;;  %v4112_v24 = vadd.f32 %v4111_v7, %v8853_v46 }
 0x49c   : > { %4624 = vst [vmem:[%s9339_s12 + $0x170] sm:$0xff] %v4971_v58  ;;  %v4972_v1 = vpack.c.bf16 %v4112_v24, %v4110_v62 }
 0x49e   : > { %4625 = vst [vmem:[%s9339_s12 + $0x178] sm:$0xff] %v4972_v1  ;;  %v4115_v15 = vpop.f32.mrb[160].mxu0 }
 0x49f   : > { %v4116_v39 = vadd.f32 %v4115_v15, %v8830_v32  ;;  %v4117_v59 = vpop.f32.mrb[161].mxu0 }
 0x4a0   : > { %v4118_v61 = vadd.f32 %v4117_v59, %v8853_v46  ;;  %v4119_v49 = vpop.f32.mrb[162].mxu0 }
 0x4a1   : > { %v4120_v28 = vadd.f32 %v4119_v49, %v8830_v32  ;;  %v4121_v42 = vpop.f32.mrb[163].mxu0 }
 0x4a2   : > { %v4973_v4 = vpack.c.bf16 %v4118_v61, %v4116_v39  ;;  %v4122_v3 = vadd.f32 %v4121_v42, %v8853_v46 }
 0x4a4   : > { %4626 = vst [vmem:[%s9339_s12 + $0x180] sm:$0xff] %v4973_v4  ;;  %v4974_v29 = vpack.c.bf16 %v4122_v3, %v4120_v28 }
 0x4a6   : > { %4627 = vst [vmem:[%s9339_s12 + $0x188] sm:$0xff] %v4974_v29  ;;  %v4125_v38 = vpop.f32.mrb[164].mxu0 }
 0x4a7   : > { %v4126_v2 = vadd.f32 %v4125_v38, %v8830_v32  ;;  %v4127_v44 = vpop.f32.mrb[165].mxu0 }
 0x4a8   : > { %v4128_v40 = vadd.f32 %v4127_v44, %v8853_v46  ;;  %v4129_v36 = vpop.f32.mrb[166].mxu0 }
 0x4a9   : > { %v4130_v25 = vadd.f32 %v4129_v36, %v8830_v32  ;;  %v4131_v0 = vpop.f32.mrb[167].mxu0 }
 0x4aa   : > { %v4975_v35 = vpack.c.bf16 %v4128_v40, %v4126_v2  ;;  %v4132_v33 = vadd.f32 %v4131_v0, %v8853_v46 }
 0x4ac   : > { %4628 = vst [vmem:[%s9339_s12 + $0x190] sm:$0xff] %v4975_v35  ;;  %v4976_v55 = vpack.c.bf16 %v4132_v33, %v4130_v25 }
 0x4ae   : > { %4629 = vst [vmem:[%s9339_s12 + $0x198] sm:$0xff] %v4976_v55 }
 0x4b1   : > { %v4135_v45 = vpop.f32.mrb[168].mxu0 }
 0x4b2   : > { %v4136_v63 = vadd.f32 %v4135_v45, %v8830_v32  ;;  %v4137_v23 = vpop.f32.mrb[169].mxu0 }
 0x4b3   : > { %v4138_v22 = vadd.f32 %v4137_v23, %v8853_v46  ;;  %v4139_v50 = vpop.f32.mrb[170].mxu0 }
 0x4b4   : > { %v4140_v20 = vadd.f32 %v4139_v50, %v8830_v32  ;;  %v4141_v34 = vpop.f32.mrb[171].mxu0 }
 0x4b5   : > { %v4977_v8 = vpack.c.bf16 %v4138_v22, %v4136_v63  ;;  %v4142_v13 = vadd.f32 %v4141_v34, %v8853_v46 }
 0x4b7   : > { %4630 = vst [vmem:[%s9339_s12 + $0x1a0] sm:$0xff] %v4977_v8  ;;  %v4978_v9 = vpack.c.bf16 %v4142_v13, %v4140_v20 }
 0x4b9   : > { %4631 = vst [vmem:[%s9339_s12 + $0x1a8] sm:$0xff] %v4978_v9 }
 0x4bb   : > { %v4145_v57 = vpop.f32.mrb[172].mxu0 }
 0x4bc   : > { %v4146_v52 = vadd.f32 %v4145_v57, %v8830_v32  ;;  %v4147_v56 = vpop.f32.mrb[173].mxu0 }
 0x4bd   : > { %v4148_v10 = vadd.f32 %v4147_v56, %v8853_v46  ;;  %v4149_v48 = vpop.f32.mrb[174].mxu0 }
 0x4be   : > { %v4150_v54 = vadd.f32 %v4149_v48, %v8830_v32  ;;  %v4151_v21 = vpop.f32.mrb[175].mxu0 }
 0x4bf   : > { %v4979_v14 = vpack.c.bf16 %v4148_v10, %v4146_v52  ;;  %v4152_v6 = vadd.f32 %v4151_v21, %v8853_v46 }
 0x4c1   : > { %4632 = vst [vmem:[%s9339_s12 + $0x1b0] sm:$0xff] %v4979_v14  ;;  %v4980_v53 = vpack.c.bf16 %v4152_v6, %v4150_v54 }
 0x4c3   : > { %4633 = vst [vmem:[%s9339_s12 + $0x1b8] sm:$0xff] %v4980_v53  ;;  %v4155_v37 = vpop.f32.mrb[176].mxu0 }
 0x4c4   : > { %v4156_v12 = vadd.f32 %v4155_v37, %v8830_v32  ;;  %v4157_v19 = vpop.f32.mrb[177].mxu0 }
 0x4c5   : > { %v4158_v26 = vadd.f32 %v4157_v19, %v8853_v46  ;;  %v4159_v27 = vpop.f32.mrb[178].mxu0 }
 0x4c6   : > { %v4160_v47 = vadd.f32 %v4159_v27, %v8830_v32  ;;  %v4161_v31 = vpop.f32.mrb[179].mxu0 }
 0x4c7   : > { %v4981_v60 = vpack.c.bf16 %v4158_v26, %v4156_v12  ;;  %v4162_v5 = vadd.f32 %v4161_v31, %v8853_v46 }
 0x4c9   : > { %4634 = vst [vmem:[%s9339_s12 + $0x1c0] sm:$0xff] %v4981_v60  ;;  %v4982_v18 = vpack.c.bf16 %v4162_v5, %v4160_v47 }
 0x4cb   : > { %4635 = vst [vmem:[%s9339_s12 + $0x1c8] sm:$0xff] %v4982_v18  ;;  %v4165_v30 = vpop.f32.mrb[180].mxu0 }
 0x4cc   : > { %v4166_v11 = vadd.f32 %v4165_v30, %v8830_v32  ;;  %v4167_v16 = vpop.f32.mrb[181].mxu0 }
 0x4cd   : > { %v4168_v41 = vadd.f32 %v4167_v16, %v8853_v46  ;;  %v4169_v17 = vpop.f32.mrb[182].mxu0 }
 0x4ce   : > { %v4170_v51 = vadd.f32 %v4169_v17, %v8830_v32  ;;  %v4171_v43 = vpop.f32.mrb[183].mxu0 }
 0x4cf   : > { %v4983_v62 = vpack.c.bf16 %v4168_v41, %v4166_v11  ;;  %v4172_v7 = vadd.f32 %v4171_v43, %v8853_v46 }
 0x4d1   : > { %4636 = vst [vmem:[%s9339_s12 + $0x1d0] sm:$0xff] %v4983_v62  ;;  %v4984_v58 = vpack.c.bf16 %v4172_v7, %v4170_v51 }
 0x4d3   : > { %4637 = vst [vmem:[%s9339_s12 + $0x1d8] sm:$0xff] %v4984_v58  ;;  %v4175_v24 = vpop.f32.mrb[184].mxu0 }
 0x4d4   : > { %v4176_v1 = vadd.f32 %v4175_v24, %v8830_v32  ;;  %v4177_v15 = vpop.f32.mrb[185].mxu0 }
 0x4d5   : > { %v4178_v39 = vadd.f32 %v4177_v15, %v8853_v46  ;;  %v4179_v59 = vpop.f32.mrb[186].mxu0 }
 0x4d6   : > { %v4180_v61 = vadd.f32 %v4179_v59, %v8830_v32  ;;  %v4181_v49 = vpop.f32.mrb[187].mxu0 }
 0x4d7   : > { %v4985_v28 = vpack.c.bf16 %v4178_v39, %v4176_v1  ;;  %v4182_v42 = vadd.f32 %v4181_v49, %v8853_v46 }
 0x4d9   : > { %4638 = vst [vmem:[%s9339_s12 + $0x1e0] sm:$0xff] %v4985_v28  ;;  %v4986_v4 = vpack.c.bf16 %v4182_v42, %v4180_v61 }
 0x4db   : > { %4639 = vst [vmem:[%s9339_s12 + $0x1e8] sm:$0xff] %v4986_v4  ;;  %v4185_v3 = vpop.f32.mrb[188].mxu0 }
 0x4dc   : > { %v4186_v29 = vadd.f32 %v4185_v3, %v8830_v32  ;;  %v4187_v38 = vpop.f32.mrb[189].mxu0 }
 0x4dd   : > { %v4188_v2 = vadd.f32 %v4187_v38, %v8853_v46  ;;  %v4189_v44 = vpop.f32.mrb[190].mxu0 }
 0x4de   : > { %v4190_v40 = vadd.f32 %v4189_v44, %v8830_v32  ;;  %v4191_v36 = vpop.f32.mrb[191].mxu0 }
 0x4df   : > { %v4987_v25 = vpack.c.bf16 %v4188_v2, %v4186_v29  ;;  %v4192_v0 = vadd.f32 %v4191_v36, %v8853_v46 }
 0x4e1   : > { %4640 = vst [vmem:[%s9339_s12 + $0x1f0] sm:$0xff] %v4987_v25  ;;  %v4988_v35 = vpack.c.bf16 %v4192_v0, %v4190_v40 }
 0x4e3   : > { %4641 = vst [vmem:[%s9339_s12 + $0x1f8] sm:$0xff] %v4988_v35 }
 0x4e4   : > { %5848 = shalt.err (!%p5845_p4)
}
 0x4e5   : > { %s5849_s13 = scalar_lea.hbm %s9620_s23, 8192  ;;  %s5853_s14 = scalar_lea.hbm %s9675_s7, 16384 }
 0x4e6   : > { %p5850_p9 = scmp.ne.s32.totalorder %s9620_s23, %s5849_s13  ;;  %p5854_p8 = scmp.lt.u32.totalorder %s9620_s23, %s9675_s7 }
 0x4e7   : > { %p5855_p13 = scmp.lt.u32.totalorder %s5853_s14, %s5849_s13  ;;  %p5857_p10 = scmp.lt.u32.totalorder %s5849_s13, %s9620_s23 }
 0x4e8   : > { %p5851_p0 = pnand %p5850_p9, %p6115_p5 }
 0x4e9   : > { %p5856_p6 = por %p5855_p13, %p5854_p8 }
 0x4ea   : > { %p5852_p11 = pneg %p5851_p0 }
 0x4eb   : > { %p5858_p3 = por %p5857_p10, %p5856_p6 }
 0x4ed   : > { %p5859_p7 = pnand %p5858_p3, %p5852_p11 }
 0x4ef   : > { %5862 = shalt.err (!%p5859_p7)
}
 0x4f0   : > { %s5919_s16 = smov 128   ;;  %s5920_s29 = smov 8  }
 0x4f1   : > { %5021 = dma.vmem_to_hbm [thread:$0]  (%p6115_p5), %s9622_s21, 8192, %s9620_s23, %s4643_s28, %s5919_s16, %s5919_s16, %s5920_s29  }
 0x4f2 PF: > { %s10021_s11 = sld [smem:[#allocation15_spill]]  ;;  %s4672_s8 = sand.u32 1, %s5897_s24  }
 0x4f3   : > { %p10023_p1 = scmp.ge.s32.totalorder %s5909_s27, 2  ;;  %s4673_s30 = scalar_lea.sflag [#allocation4], %s4672_s8 }
 0x4f8   : > { %p10022_p12 = scmp.ne.s32.totalorder %s10021_s11, 0 }
 0x4fa   : > { %p5038_p2 = pnand %p10023_p1, %p10022_p12 }
 0x4fc   : > { %5892 = dma.done.wait (!%p5038_p2), %s4673_s30, 8192  }
 0x4fd   : > { %5894 = vsyncadd (!%p5038_p2), %s4673_s30, 4294959104  ;;  %p22_p4 = scmp.ge.s32.totalorder %s6101_s22, 4   ;;  %s10024_s24 = smov %s5901_s25 }
 0x4fe   : > { %s10025_s25 = smov %s5905_s26  ;;  %s10026_s26 = smov %s6111_s18 }
 0x4ff   : > { %s10027_s27 = smov %s6101_s22  ;;  %24 = sbr.rel (!%p22_p4) target bundleno = 7 (0x7), region = 105 }
 0x506   :  { %4678 = vsyncpa [#allocation3], 1 }
 0x507   :  { %4680 = vsyncpa [#allocation3 + $0x1], 1 }
 0x508   :  { %4681 = vsyncpa [#allocation6], 1 }
 0x509   :  { %4682 = vsyncpa [#allocation9], 1 }
 0x50a   :  { %4683 = vsyncpa [#allocation4], 1 }
 0x50b   :  { %4685 = vsyncpa [#allocation4 + $0x1], 1 }

</bundles_post_ra>
